<compile_context>
chip_gen: v5e
topology: v5e:2x2
jax: 0.10.0
libtpu: 0.0.40
codegen_flags: <defaults>
</compile_context>

<pallas_src>
import jax
import jax.numpy as jnp
import numpy as np
from jax.experimental import pallas as pl
from jax.experimental.pallas import tpu as pltpu

# ---------------- configuration (small, consistent with the module) ----------
B = 2          # batch_size
T = 6          # t_len (GRU sequence length)
C = 3          # csi channels
SN = 114       # subcarriers  -> L = C*SN = 342 so the encoder yields exactly 8
EMB_DIM = 8    # configs.embedding_dim
FEAT_LEN = 4   # configs.features_len[idx]
OUT = EMB_DIM * FEAT_LEN       # Linear(128 -> OUT)

L = C * SN                     # 342
L1 = (L - 12) // 6 + 1         # 56  (Conv1d(1,16,12,6))
L2 = L1 // 2                   # 28  (MaxPool1d(2))
L3 = (L2 - 7) // 3 + 1         # 8   (Conv1d(16,32,7,3))
assert L3 == 8, "encoder output length must be 8 for the reshape in forward()"
N = B * T                      # 12
H = 128                        # GRU hidden
C1 = 16                        # conv1 out channels
C2 = 32                        # conv2 out channels
HALF = 512                     # lane-padded width of each parity half (>= L2*C1 = 448)


# ------------------------------ fused kernel ----------------------------------
def wificsi_kernel(x_ref, w1_ref, b1_ref, w2_ref, b2_ref, wm_ref,
                   wih_ref, bih_ref, whh_ref, bhh_ref, wl_ref, bl_ref,
                   out_ref):
    """Encoder (conv1+relu+maxpool+conv2+relu+channel-mean) -> GRU -> Linear.

    x_ref  : (N, L)          flattened CSI samples, row n = b*T + t
    w1_ref : (L, 2*HALF)     Toeplitz conv1 weights, parity-split lane-dense cols
    b1_ref : (1, 2*HALF)
    w2_ref : (HALF, L3*C2)   Toeplitz conv2 weights (padding rows are zero)
    b2_ref : (1, L3*C2)
    wm_ref : (L3*C2, L3)     block mean matrix (AvgPool1d(32))
    wih_ref: (L3, 3H)   bih_ref: (1, 3H)
    whh_ref: (H, 3H)    bhh_ref: (1, 3H)
    wl_ref : (H, OUT)   bl_ref : (1, OUT)
    out_ref: (B, OUT)
    """
    x = x_ref[...]                                                        # (N, L)

    # ---- conv1 (as one matmul) + bias + ReLU, lane-dense parity-split layout
    h1 = jnp.dot(x, w1_ref[...], preferred_element_type=jnp.float32) + b1_ref[...]
    h1 = jnp.maximum(h1, 0.0)                                             # (N, 1024)

    # ---- MaxPool1d(2): even positions live in lanes [0,HALF), odd in [HALF,2*HALF)
    h1p = jnp.maximum(h1[:, :HALF], h1[:, HALF:])                         # (N, 512)

    # ---- conv2 (as one matmul) + bias + ReLU
    h2 = jnp.dot(h1p, w2_ref[...], preferred_element_type=jnp.float32) + b2_ref[...]
    h2 = jnp.maximum(h2, 0.0)                                             # (N, 256)

    # ---- AvgPool1d(32): channel mean as a matmul -> (N, 8) features, row n = b*T+t
    feat = jnp.dot(h2, wm_ref[...], preferred_element_type=jnp.float32)   # (N, 8)

    # ---- GRU input projection hoisted out of the recurrence (once for all T*B rows)
    gi_all = (jnp.dot(feat, wih_ref[...], preferred_element_type=jnp.float32)
              + bih_ref[...])                                             # (N, 3H)

    whh = whh_ref[...]
    bhh = bhh_ref[...]
    h = jnp.zeros((B, H), jnp.float32)                                    # h0 = 0

    # ---- fully-unrolled recurrence (T=6, torch gate order r,z,n)
    for t in range(T):
        # rows {b*T + t} of gi_all -> (B, 3H), batch-major like h
        gi = jnp.concatenate(
            [gi_all[b * T + t: b * T + t + 1, :] for b in range(B)], axis=0)
        gh = jnp.dot(h, whh, preferred_element_type=jnp.float32) + bhh    # (B, 3H)
        r = jax.nn.sigmoid(gi[:, :H] + gh[:, :H])
        z = jax.nn.sigmoid(gi[:, H:2 * H] + gh[:, H:2 * H])
        n_ = jnp.tanh(gi[:, 2 * H:] + r * gh[:, 2 * H:])
        h = (1.0 - z) * n_ + z * h

    # ---- final Linear, single unmasked store
    out_ref[...] = (jnp.dot(h, wl_ref[...], preferred_element_type=jnp.float32)
                    + bl_ref[...])                                        # (B, OUT)


# ------------------------------ full forward ----------------------------------
@jax.jit
def wificsi_forward(x_in, params):
    bsz, t_len, c, sn = x_in.shape
    x_flat = x_in.reshape(bsz * t_len, c * sn).astype(jnp.float32)        # (N, L)

    y = pl.pallas_call(
        wificsi_kernel,
        out_shape=jax.ShapeDtypeStruct((bsz, OUT), jnp.float32),
        in_specs=[pl.BlockSpec(memory_space=pltpu.MemorySpace.VMEM)] * 12,
        out_specs=pl.BlockSpec(memory_space=pltpu.MemorySpace.VMEM),
    )(x_flat,
      params["w1_big"], params["b1_big"],
      params["w2_big"], params["b2_big"], params["w_mean"],
      params["wih_t"], params["bih"], params["whh_t"], params["bhh"],
      params["wl_t"], params["bl"])

    return y.reshape(bsz, EMB_DIM, -1)                                    # (B, D, F)


# --------------------- host-side weight layout construction -------------------
def build_kernel_params(w1, b1v, w2, b2v, wih, whh, bihv, bhhv, wl, blv):
    """Pre-lower the conv weights to Toeplitz matrices with lane-dense layouts."""
    w1_np = np.asarray(w1, np.float32)    # (16, 1, 12)  [cout, cin, tap]
    b1_np = np.asarray(b1v, np.float32)   # (16,)
    w2_np = np.asarray(w2, np.float32)    # (32, 16, 7)  [cout, cin, tap]
    b2_np = np.asarray(b2v, np.float32)   # (32,)

    # conv1 Toeplitz: column = parity*HALF + pooled_pos*16 + channel, o = 2*p + parity
    w1_big = np.zeros((L, 2 * HALF), np.float32)
    b1_big = np.zeros((1, 2 * HALF), np.float32)
    tap1 = w1_np[:, 0, :].T               # (12, 16) [tap, cout]
    for o in range(L1):
        parity, p = o % 2, o // 2
        col = parity * HALF + p * C1
        w1_big[6 * o: 6 * o + 12, col: col + C1] = tap1
        b1_big[0, col: col + C1] = b1_np

    # conv2 Toeplitz: rows indexed by pooled (pos, chan); cols by (out_pos, chan)
    w2_big = np.zeros((HALF, L3 * C2), np.float32)
    b2_big = np.zeros((1, L3 * C2), np.float32)
    for o in range(L3):
        b2_big[0, o * C2:(o + 1) * C2] = b2_np
        for k in range(7):
            p = 3 * o + k
            w2_big[p * C1:(p + 1) * C1, o * C2:(o + 1) * C2] = w2_np[:, :, k].T
    # rows [L2*C1, HALF) stay zero -> padding lanes never contribute

    # AvgPool1d(32) as a (256, 8) block-mean matrix
    w_mean = np.zeros((L3 * C2, L3), np.float32)
    for o in range(L3):
        w_mean[o * C2:(o + 1) * C2, o] = 1.0 / C2

    return {
        "w1_big": jnp.asarray(w1_big), "b1_big": jnp.asarray(b1_big),
        "w2_big": jnp.asarray(w2_big), "b2_big": jnp.asarray(b2_big),
        "w_mean": jnp.asarray(w_mean),
        "wih_t": jnp.asarray(wih).T,                 # (8, 384)
        "whh_t": jnp.asarray(whh).T,                 # (128, 384)
        "bih": jnp.asarray(bihv).reshape(1, 3 * H),
        "bhh": jnp.asarray(bhhv).reshape(1, 3 * H),
        "wl_t": jnp.asarray(wl).T,                   # (128, OUT)
        "bl": jnp.asarray(blv).reshape(1, OUT),
    }


# --------------------------- pure-JAX reference --------------------------------
def reference_forward(x_in, p):
    n = B * T
    x = x_in.reshape(n, -1).astype(jnp.float32)
    idx1 = 6 * jnp.arange(L1)[:, None] + jnp.arange(12)[None, :]
    p1 = x[:, idx1]                                                       # (N,56,12)
    h1 = jnp.maximum(jnp.einsum("nok,ck->noc", p1, p["w1"][:, 0, :]) + p["b1v"], 0.0)
    h1p = jnp.max(h1.reshape(n, L2, 2, C1), axis=2)                       # (N,28,16)
    idx2 = 3 * jnp.arange(L3)[:, None] + jnp.arange(7)[None, :]
    p2 = h1p[:, idx2, :]                                                  # (N,8,7,16)
    h2 = jnp.maximum(jnp.einsum("nokc,dck->nod", p2, p["w2"]) + p["b2v"], 0.0)
    m = jnp.mean(h2, axis=2)                                              # (N,8)
    seq = m.reshape(B, T, L3).transpose(1, 0, 2)                          # (T,B,8)
    h = jnp.zeros((B, H), jnp.float32)
    for t in range(T):
        gi = seq[t] @ p["wih"].T + p["bihv"]
        gh = h @ p["whh"].T + p["bhhv"]
        r = jax.nn.sigmoid(gi[:, :H] + gh[:, :H])
        z = jax.nn.sigmoid(gi[:, H:2 * H] + gh[:, H:2 * H])
        nn_ = jnp.tanh(gi[:, 2 * H:] + r * gh[:, 2 * H:])
        h = (1.0 - z) * nn_ + z * h
    y = h @ p["wl"].T + p["blv"]
    return y.reshape(B, EMB_DIM, -1)


# ------------------------------- main ------------------------------------------
if __name__ == "__main__":
    key = jax.random.PRNGKey(0)
    keys = jax.random.split(key, 16)

    def unif(k, shape, bound):
        return jax.random.uniform(k, shape, jnp.float32, -bound, bound)

    # deterministic parameters in native PyTorch shapes
    w1 = unif(keys[0], (16, 1, 12), 12 ** -0.5)        # Conv1d(1,16,12,6).weight
    b1v = unif(keys[1], (16,), 12 ** -0.5)
    w2 = unif(keys[2], (32, 16, 7), (16 * 7) ** -0.5)  # Conv1d(16,32,7,3).weight
    b2v = unif(keys[3], (32,), (16 * 7) ** -0.5)
    wih = unif(keys[4], (3 * H, 8), H ** -0.5)         # GRU weight_ih_l0
    whh = unif(keys[5], (3 * H, H), H ** -0.5)         # GRU weight_hh_l0
    bihv = unif(keys[6], (3 * H,), H ** -0.5)
    bhhv = unif(keys[7], (3 * H,), H ** -0.5)
    wl = unif(keys[8], (OUT, H), H ** -0.5)            # Linear(128, OUT).weight
    blv = unif(keys[9], (OUT,), H ** -0.5)

    params = build_kernel_params(w1, b1v, w2, b2v, wih, whh, bihv, bhhv, wl, blv)
    ref_params = {"w1": w1, "b1v": b1v, "w2": w2, "b2v": b2v,
                  "wih": wih, "whh": whh, "bihv": bihv, "bhhv": bhhv,
                  "wl": wl, "blv": blv}

    x_in = jax.random.normal(keys[10], (B, T, C, SN), jnp.float32)

    out = wificsi_forward(x_in, params)
    out = jax.block_until_ready(out)

    ref = reference_forward(x_in, ref_params)
    assert out.shape == (B, EMB_DIM, FEAT_LEN), out.shape
    assert bool(jnp.all(jnp.isfinite(out)))
    assert bool(jnp.allclose(out, ref, rtol=2e-2, atol=2e-2)), \
        float(jnp.max(jnp.abs(out - ref)))

    print("KERNEL_OK")
</pallas_src>

<mosaic_0001>
module attributes {stable_mosaic.version = 11 : i64} {
  func.func @wificsi_kernel(%arg0: memref<12x342xf32, #tpu.memory_space<vmem>>, %arg1: memref<342x1024xf32, #tpu.memory_space<vmem>>, %arg2: memref<1x1024xf32, #tpu.memory_space<vmem>>, %arg3: memref<512x256xf32, #tpu.memory_space<vmem>>, %arg4: memref<1x256xf32, #tpu.memory_space<vmem>>, %arg5: memref<256x8xf32, #tpu.memory_space<vmem>>, %arg6: memref<8x384xf32, #tpu.memory_space<vmem>>, %arg7: memref<1x384xf32, #tpu.memory_space<vmem>>, %arg8: memref<128x384xf32, #tpu.memory_space<vmem>>, %arg9: memref<1x384xf32, #tpu.memory_space<vmem>>, %arg10: memref<128x32xf32, #tpu.memory_space<vmem>>, %arg11: memref<1x32xf32, #tpu.memory_space<vmem>>, %arg12: memref<2x32xf32, #tpu.memory_space<vmem>>) attributes {dimension_semantics = [], scalar_prefetch = 0 : i64, scratch_operands = 0 : i64, tpu.core_type = #tpu.core_type<tc>} {
    %c0 = arith.constant 0 : index
    %c0_0 = arith.constant 0 : index
    %0 = vector.load %arg0[%c0, %c0_0] : memref<12x342xf32, #tpu.memory_space<vmem>>, vector<12x342xf32>
    %c0_1 = arith.constant 0 : index
    %c0_2 = arith.constant 0 : index
    %1 = vector.load %arg1[%c0_1, %c0_2] : memref<342x1024xf32, #tpu.memory_space<vmem>>, vector<342x1024xf32>
    %cst = arith.constant dense<0.000000e+00> : vector<12x1024xf32>
    %2 = tpu.matmul %0, %1, %cst {dimension_numbers = #tpu.dot_dimension_numbers<[1], [0], [0], [1], [0, 0, 1, 1], [], []>} : vector<12x342xf32>, vector<342x1024xf32>, vector<12x1024xf32> -> vector<12x1024xf32>
    %c0_3 = arith.constant 0 : index
    %c0_4 = arith.constant 0 : index
    %3 = vector.load %arg2[%c0_3, %c0_4] : memref<1x1024xf32, #tpu.memory_space<vmem>>, vector<1x1024xf32>
    %4 = vector.broadcast %3 : vector<1x1024xf32> to vector<12x1024xf32>
    %5 = arith.addf %2, %4 : vector<12x1024xf32>
    %cst_5 = arith.constant 0.000000e+00 : f32
    %6 = vector.broadcast %cst_5 : f32 to vector<12x1024xf32>
    %7 = arith.maximumf %5, %6 : vector<12x1024xf32>
    %8 = vector.extract_strided_slice %7 {offsets = [0, 0], sizes = [12, 512], strides = [1, 1]} : vector<12x1024xf32> to vector<12x512xf32>
    %9 = vector.extract_strided_slice %7 {offsets = [0, 512], sizes = [12, 512], strides = [1, 1]} : vector<12x1024xf32> to vector<12x512xf32>
    %10 = arith.maximumf %8, %9 : vector<12x512xf32>
    %c0_6 = arith.constant 0 : index
    %c0_7 = arith.constant 0 : index
    %11 = vector.load %arg3[%c0_6, %c0_7] : memref<512x256xf32, #tpu.memory_space<vmem>>, vector<512x256xf32>
    %cst_8 = arith.constant dense<0.000000e+00> : vector<12x256xf32>
    %12 = tpu.matmul %10, %11, %cst_8 {dimension_numbers = #tpu.dot_dimension_numbers<[1], [0], [0], [1], [0, 0, 1, 1], [], []>} : vector<12x512xf32>, vector<512x256xf32>, vector<12x256xf32> -> vector<12x256xf32>
    %c0_9 = arith.constant 0 : index
    %c0_10 = arith.constant 0 : index
    %13 = vector.load %arg4[%c0_9, %c0_10] : memref<1x256xf32, #tpu.memory_space<vmem>>, vector<1x256xf32>
    %14 = vector.broadcast %13 : vector<1x256xf32> to vector<12x256xf32>
    %15 = arith.addf %12, %14 : vector<12x256xf32>
    %cst_11 = arith.constant 0.000000e+00 : f32
    %16 = vector.broadcast %cst_11 : f32 to vector<12x256xf32>
    %17 = arith.maximumf %15, %16 : vector<12x256xf32>
    %c0_12 = arith.constant 0 : index
    %c0_13 = arith.constant 0 : index
    %18 = vector.load %arg5[%c0_12, %c0_13] : memref<256x8xf32, #tpu.memory_space<vmem>>, vector<256x8xf32>
    %cst_14 = arith.constant dense<0.000000e+00> : vector<12x8xf32>
    %19 = tpu.matmul %17, %18, %cst_14 {dimension_numbers = #tpu.dot_dimension_numbers<[1], [0], [0], [1], [0, 0, 1, 1], [], []>} : vector<12x256xf32>, vector<256x8xf32>, vector<12x8xf32> -> vector<12x8xf32>
    %c0_15 = arith.constant 0 : index
    %c0_16 = arith.constant 0 : index
    %20 = vector.load %arg6[%c0_15, %c0_16] : memref<8x384xf32, #tpu.memory_space<vmem>>, vector<8x384xf32>
    %cst_17 = arith.constant dense<0.000000e+00> : vector<12x384xf32>
    %21 = tpu.matmul %19, %20, %cst_17 {dimension_numbers = #tpu.dot_dimension_numbers<[1], [0], [0], [1], [0, 0, 1, 1], [], []>} : vector<12x8xf32>, vector<8x384xf32>, vector<12x384xf32> -> vector<12x384xf32>
    %c0_18 = arith.constant 0 : index
    %c0_19 = arith.constant 0 : index
    %22 = vector.load %arg7[%c0_18, %c0_19] : memref<1x384xf32, #tpu.memory_space<vmem>>, vector<1x384xf32>
    %23 = vector.broadcast %22 : vector<1x384xf32> to vector<12x384xf32>
    %24 = arith.addf %21, %23 : vector<12x384xf32>
    %c0_20 = arith.constant 0 : index
    %c0_21 = arith.constant 0 : index
    %25 = vector.load %arg8[%c0_20, %c0_21] : memref<128x384xf32, #tpu.memory_space<vmem>>, vector<128x384xf32>
    %c0_22 = arith.constant 0 : index
    %c0_23 = arith.constant 0 : index
    %26 = vector.load %arg9[%c0_22, %c0_23] : memref<1x384xf32, #tpu.memory_space<vmem>>, vector<1x384xf32>
    %cst_24 = arith.constant 0.000000e+00 : f32
    %27 = vector.broadcast %cst_24 : f32 to vector<2x128xf32>
    %28 = vector.extract_strided_slice %24 {offsets = [0, 0], sizes = [1, 384], strides = [1, 1]} : vector<12x384xf32> to vector<1x384xf32>
    %29 = vector.extract_strided_slice %24 {offsets = [6, 0], sizes = [1, 384], strides = [1, 1]} : vector<12x384xf32> to vector<1x384xf32>
    %30 = tpu.concatenate %28, %29 in 0 : vector<1x384xf32>, vector<1x384xf32> -> vector<2x384xf32>
    %cst_25 = arith.constant dense<0.000000e+00> : vector<2x384xf32>
    %31 = tpu.matmul %27, %25, %cst_25 {dimension_numbers = #tpu.dot_dimension_numbers<[1], [0], [0], [1], [0, 0, 1, 1], [], []>} : vector<2x128xf32>, vector<128x384xf32>, vector<2x384xf32> -> vector<2x384xf32>
    %32 = vector.broadcast %26 : vector<1x384xf32> to vector<2x384xf32>
    %33 = arith.addf %31, %32 : vector<2x384xf32>
    %34 = vector.extract_strided_slice %30 {offsets = [0, 0], sizes = [2, 128], strides = [1, 1]} : vector<2x384xf32> to vector<2x128xf32>
    %35 = vector.extract_strided_slice %33 {offsets = [0, 0], sizes = [2, 128], strides = [1, 1]} : vector<2x384xf32> to vector<2x128xf32>
    %36 = arith.addf %34, %35 : vector<2x128xf32>
    %37 = arith.negf %36 : vector<2x128xf32>
    %38 = math.exp %37 : vector<2x128xf32>
    %cst_26 = arith.constant 1.000000e+00 : f32
    %39 = vector.broadcast %cst_26 : f32 to vector<2x128xf32>
    %40 = arith.addf %39, %38 : vector<2x128xf32>
    %41 = arith.divf %39, %40 : vector<2x128xf32>
    %42 = vector.extract_strided_slice %30 {offsets = [0, 128], sizes = [2, 128], strides = [1, 1]} : vector<2x384xf32> to vector<2x128xf32>
    %43 = vector.extract_strided_slice %33 {offsets = [0, 128], sizes = [2, 128], strides = [1, 1]} : vector<2x384xf32> to vector<2x128xf32>
    %44 = arith.addf %42, %43 : vector<2x128xf32>
    %45 = arith.negf %44 : vector<2x128xf32>
    %46 = math.exp %45 : vector<2x128xf32>
    %cst_27 = arith.constant 1.000000e+00 : f32
    %47 = vector.broadcast %cst_27 : f32 to vector<2x128xf32>
    %48 = arith.addf %47, %46 : vector<2x128xf32>
    %49 = arith.divf %47, %48 : vector<2x128xf32>
    %50 = vector.extract_strided_slice %30 {offsets = [0, 256], sizes = [2, 128], strides = [1, 1]} : vector<2x384xf32> to vector<2x128xf32>
    %51 = vector.extract_strided_slice %33 {offsets = [0, 256], sizes = [2, 128], strides = [1, 1]} : vector<2x384xf32> to vector<2x128xf32>
    %52 = arith.mulf %41, %51 : vector<2x128xf32>
    %53 = arith.addf %50, %52 : vector<2x128xf32>
    %54 = math.tanh %53 : vector<2x128xf32>
    %cst_28 = arith.constant 1.000000e+00 : f32
    %55 = vector.broadcast %cst_28 : f32 to vector<2x128xf32>
    %56 = arith.subf %55, %49 : vector<2x128xf32>
    %57 = arith.mulf %56, %54 : vector<2x128xf32>
    %58 = arith.mulf %49, %27 : vector<2x128xf32>
    %59 = arith.addf %57, %58 : vector<2x128xf32>
    %60 = vector.extract_strided_slice %24 {offsets = [1, 0], sizes = [1, 384], strides = [1, 1]} : vector<12x384xf32> to vector<1x384xf32>
    %61 = vector.extract_strided_slice %24 {offsets = [7, 0], sizes = [1, 384], strides = [1, 1]} : vector<12x384xf32> to vector<1x384xf32>
    %62 = tpu.concatenate %60, %61 in 0 : vector<1x384xf32>, vector<1x384xf32> -> vector<2x384xf32>
    %cst_29 = arith.constant dense<0.000000e+00> : vector<2x384xf32>
    %63 = tpu.matmul %59, %25, %cst_29 {dimension_numbers = #tpu.dot_dimension_numbers<[1], [0], [0], [1], [0, 0, 1, 1], [], []>} : vector<2x128xf32>, vector<128x384xf32>, vector<2x384xf32> -> vector<2x384xf32>
    %64 = vector.broadcast %26 : vector<1x384xf32> to vector<2x384xf32>
    %65 = arith.addf %63, %64 : vector<2x384xf32>
    %66 = vector.extract_strided_slice %62 {offsets = [0, 0], sizes = [2, 128], strides = [1, 1]} : vector<2x384xf32> to vector<2x128xf32>
    %67 = vector.extract_strided_slice %65 {offsets = [0, 0], sizes = [2, 128], strides = [1, 1]} : vector<2x384xf32> to vector<2x128xf32>
    %68 = arith.addf %66, %67 : vector<2x128xf32>
    %69 = arith.negf %68 : vector<2x128xf32>
    %70 = math.exp %69 : vector<2x128xf32>
    %cst_30 = arith.constant 1.000000e+00 : f32
    %71 = vector.broadcast %cst_30 : f32 to vector<2x128xf32>
    %72 = arith.addf %71, %70 : vector<2x128xf32>
    %73 = arith.divf %71, %72 : vector<2x128xf32>
    %74 = vector.extract_strided_slice %62 {offsets = [0, 128], sizes = [2, 128], strides = [1, 1]} : vector<2x384xf32> to vector<2x128xf32>
    %75 = vector.extract_strided_slice %65 {offsets = [0, 128], sizes = [2, 128], strides = [1, 1]} : vector<2x384xf32> to vector<2x128xf32>
    %76 = arith.addf %74, %75 : vector<2x128xf32>
    %77 = arith.negf %76 : vector<2x128xf32>
    %78 = math.exp %77 : vector<2x128xf32>
    %cst_31 = arith.constant 1.000000e+00 : f32
    %79 = vector.broadcast %cst_31 : f32 to vector<2x128xf32>
    %80 = arith.addf %79, %78 : vector<2x128xf32>
    %81 = arith.divf %79, %80 : vector<2x128xf32>
    %82 = vector.extract_strided_slice %62 {offsets = [0, 256], sizes = [2, 128], strides = [1, 1]} : vector<2x384xf32> to vector<2x128xf32>
    %83 = vector.extract_strided_slice %65 {offsets = [0, 256], sizes = [2, 128], strides = [1, 1]} : vector<2x384xf32> to vector<2x128xf32>
    %84 = arith.mulf %73, %83 : vector<2x128xf32>
    %85 = arith.addf %82, %84 : vector<2x128xf32>
    %86 = math.tanh %85 : vector<2x128xf32>
    %cst_32 = arith.constant 1.000000e+00 : f32
    %87 = vector.broadcast %cst_32 : f32 to vector<2x128xf32>
    %88 = arith.subf %87, %81 : vector<2x128xf32>
    %89 = arith.mulf %88, %86 : vector<2x128xf32>
    %90 = arith.mulf %81, %59 : vector<2x128xf32>
    %91 = arith.addf %89, %90 : vector<2x128xf32>
    %92 = vector.extract_strided_slice %24 {offsets = [2, 0], sizes = [1, 384], strides = [1, 1]} : vector<12x384xf32> to vector<1x384xf32>
    %93 = vector.extract_strided_slice %24 {offsets = [8, 0], sizes = [1, 384], strides = [1, 1]} : vector<12x384xf32> to vector<1x384xf32>
    %94 = tpu.concatenate %92, %93 in 0 : vector<1x384xf32>, vector<1x384xf32> -> vector<2x384xf32>
    %cst_33 = arith.constant dense<0.000000e+00> : vector<2x384xf32>
    %95 = tpu.matmul %91, %25, %cst_33 {dimension_numbers = #tpu.dot_dimension_numbers<[1], [0], [0], [1], [0, 0, 1, 1], [], []>} : vector<2x128xf32>, vector<128x384xf32>, vector<2x384xf32> -> vector<2x384xf32>
    %96 = vector.broadcast %26 : vector<1x384xf32> to vector<2x384xf32>
    %97 = arith.addf %95, %96 : vector<2x384xf32>
    %98 = vector.extract_strided_slice %94 {offsets = [0, 0], sizes = [2, 128], strides = [1, 1]} : vector<2x384xf32> to vector<2x128xf32>
    %99 = vector.extract_strided_slice %97 {offsets = [0, 0], sizes = [2, 128], strides = [1, 1]} : vector<2x384xf32> to vector<2x128xf32>
    %100 = arith.addf %98, %99 : vector<2x128xf32>
    %101 = arith.negf %100 : vector<2x128xf32>
    %102 = math.exp %101 : vector<2x128xf32>
    %cst_34 = arith.constant 1.000000e+00 : f32
    %103 = vector.broadcast %cst_34 : f32 to vector<2x128xf32>
    %104 = arith.addf %103, %102 : vector<2x128xf32>
    %105 = arith.divf %103, %104 : vector<2x128xf32>
    %106 = vector.extract_strided_slice %94 {offsets = [0, 128], sizes = [2, 128], strides = [1, 1]} : vector<2x384xf32> to vector<2x128xf32>
    %107 = vector.extract_strided_slice %97 {offsets = [0, 128], sizes = [2, 128], strides = [1, 1]} : vector<2x384xf32> to vector<2x128xf32>
    %108 = arith.addf %106, %107 : vector<2x128xf32>
    %109 = arith.negf %108 : vector<2x128xf32>
    %110 = math.exp %109 : vector<2x128xf32>
    %cst_35 = arith.constant 1.000000e+00 : f32
    %111 = vector.broadcast %cst_35 : f32 to vector<2x128xf32>
    %112 = arith.addf %111, %110 : vector<2x128xf32>
    %113 = arith.divf %111, %112 : vector<2x128xf32>
    %114 = vector.extract_strided_slice %94 {offsets = [0, 256], sizes = [2, 128], strides = [1, 1]} : vector<2x384xf32> to vector<2x128xf32>
    %115 = vector.extract_strided_slice %97 {offsets = [0, 256], sizes = [2, 128], strides = [1, 1]} : vector<2x384xf32> to vector<2x128xf32>
    %116 = arith.mulf %105, %115 : vector<2x128xf32>
    %117 = arith.addf %114, %116 : vector<2x128xf32>
    %118 = math.tanh %117 : vector<2x128xf32>
    %cst_36 = arith.constant 1.000000e+00 : f32
    %119 = vector.broadcast %cst_36 : f32 to vector<2x128xf32>
    %120 = arith.subf %119, %113 : vector<2x128xf32>
    %121 = arith.mulf %120, %118 : vector<2x128xf32>
    %122 = arith.mulf %113, %91 : vector<2x128xf32>
    %123 = arith.addf %121, %122 : vector<2x128xf32>
    %124 = vector.extract_strided_slice %24 {offsets = [3, 0], sizes = [1, 384], strides = [1, 1]} : vector<12x384xf32> to vector<1x384xf32>
    %125 = vector.extract_strided_slice %24 {offsets = [9, 0], sizes = [1, 384], strides = [1, 1]} : vector<12x384xf32> to vector<1x384xf32>
    %126 = tpu.concatenate %124, %125 in 0 : vector<1x384xf32>, vector<1x384xf32> -> vector<2x384xf32>
    %cst_37 = arith.constant dense<0.000000e+00> : vector<2x384xf32>
    %127 = tpu.matmul %123, %25, %cst_37 {dimension_numbers = #tpu.dot_dimension_numbers<[1], [0], [0], [1], [0, 0, 1, 1], [], []>} : vector<2x128xf32>, vector<128x384xf32>, vector<2x384xf32> -> vector<2x384xf32>
    %128 = vector.broadcast %26 : vector<1x384xf32> to vector<2x384xf32>
    %129 = arith.addf %127, %128 : vector<2x384xf32>
    %130 = vector.extract_strided_slice %126 {offsets = [0, 0], sizes = [2, 128], strides = [1, 1]} : vector<2x384xf32> to vector<2x128xf32>
    %131 = vector.extract_strided_slice %129 {offsets = [0, 0], sizes = [2, 128], strides = [1, 1]} : vector<2x384xf32> to vector<2x128xf32>
    %132 = arith.addf %130, %131 : vector<2x128xf32>
    %133 = arith.negf %132 : vector<2x128xf32>
    %134 = math.exp %133 : vector<2x128xf32>
    %cst_38 = arith.constant 1.000000e+00 : f32
    %135 = vector.broadcast %cst_38 : f32 to vector<2x128xf32>
    %136 = arith.addf %135, %134 : vector<2x128xf32>
    %137 = arith.divf %135, %136 : vector<2x128xf32>
    %138 = vector.extract_strided_slice %126 {offsets = [0, 128], sizes = [2, 128], strides = [1, 1]} : vector<2x384xf32> to vector<2x128xf32>
    %139 = vector.extract_strided_slice %129 {offsets = [0, 128], sizes = [2, 128], strides = [1, 1]} : vector<2x384xf32> to vector<2x128xf32>
    %140 = arith.addf %138, %139 : vector<2x128xf32>
    %141 = arith.negf %140 : vector<2x128xf32>
    %142 = math.exp %141 : vector<2x128xf32>
    %cst_39 = arith.constant 1.000000e+00 : f32
    %143 = vector.broadcast %cst_39 : f32 to vector<2x128xf32>
    %144 = arith.addf %143, %142 : vector<2x128xf32>
    %145 = arith.divf %143, %144 : vector<2x128xf32>
    %146 = vector.extract_strided_slice %126 {offsets = [0, 256], sizes = [2, 128], strides = [1, 1]} : vector<2x384xf32> to vector<2x128xf32>
    %147 = vector.extract_strided_slice %129 {offsets = [0, 256], sizes = [2, 128], strides = [1, 1]} : vector<2x384xf32> to vector<2x128xf32>
    %148 = arith.mulf %137, %147 : vector<2x128xf32>
    %149 = arith.addf %146, %148 : vector<2x128xf32>
    %150 = math.tanh %149 : vector<2x128xf32>
    %cst_40 = arith.constant 1.000000e+00 : f32
    %151 = vector.broadcast %cst_40 : f32 to vector<2x128xf32>
    %152 = arith.subf %151, %145 : vector<2x128xf32>
    %153 = arith.mulf %152, %150 : vector<2x128xf32>
    %154 = arith.mulf %145, %123 : vector<2x128xf32>
    %155 = arith.addf %153, %154 : vector<2x128xf32>
    %156 = vector.extract_strided_slice %24 {offsets = [4, 0], sizes = [1, 384], strides = [1, 1]} : vector<12x384xf32> to vector<1x384xf32>
    %157 = vector.extract_strided_slice %24 {offsets = [10, 0], sizes = [1, 384], strides = [1, 1]} : vector<12x384xf32> to vector<1x384xf32>
    %158 = tpu.concatenate %156, %157 in 0 : vector<1x384xf32>, vector<1x384xf32> -> vector<2x384xf32>
    %cst_41 = arith.constant dense<0.000000e+00> : vector<2x384xf32>
    %159 = tpu.matmul %155, %25, %cst_41 {dimension_numbers = #tpu.dot_dimension_numbers<[1], [0], [0], [1], [0, 0, 1, 1], [], []>} : vector<2x128xf32>, vector<128x384xf32>, vector<2x384xf32> -> vector<2x384xf32>
    %160 = vector.broadcast %26 : vector<1x384xf32> to vector<2x384xf32>
    %161 = arith.addf %159, %160 : vector<2x384xf32>
    %162 = vector.extract_strided_slice %158 {offsets = [0, 0], sizes = [2, 128], strides = [1, 1]} : vector<2x384xf32> to vector<2x128xf32>
    %163 = vector.extract_strided_slice %161 {offsets = [0, 0], sizes = [2, 128], strides = [1, 1]} : vector<2x384xf32> to vector<2x128xf32>
    %164 = arith.addf %162, %163 : vector<2x128xf32>
    %165 = arith.negf %164 : vector<2x128xf32>
    %166 = math.exp %165 : vector<2x128xf32>
    %cst_42 = arith.constant 1.000000e+00 : f32
    %167 = vector.broadcast %cst_42 : f32 to vector<2x128xf32>
    %168 = arith.addf %167, %166 : vector<2x128xf32>
    %169 = arith.divf %167, %168 : vector<2x128xf32>
    %170 = vector.extract_strided_slice %158 {offsets = [0, 128], sizes = [2, 128], strides = [1, 1]} : vector<2x384xf32> to vector<2x128xf32>
    %171 = vector.extract_strided_slice %161 {offsets = [0, 128], sizes = [2, 128], strides = [1, 1]} : vector<2x384xf32> to vector<2x128xf32>
    %172 = arith.addf %170, %171 : vector<2x128xf32>
    %173 = arith.negf %172 : vector<2x128xf32>
    %174 = math.exp %173 : vector<2x128xf32>
    %cst_43 = arith.constant 1.000000e+00 : f32
    %175 = vector.broadcast %cst_43 : f32 to vector<2x128xf32>
    %176 = arith.addf %175, %174 : vector<2x128xf32>
    %177 = arith.divf %175, %176 : vector<2x128xf32>
    %178 = vector.extract_strided_slice %158 {offsets = [0, 256], sizes = [2, 128], strides = [1, 1]} : vector<2x384xf32> to vector<2x128xf32>
    %179 = vector.extract_strided_slice %161 {offsets = [0, 256], sizes = [2, 128], strides = [1, 1]} : vector<2x384xf32> to vector<2x128xf32>
    %180 = arith.mulf %169, %179 : vector<2x128xf32>
    %181 = arith.addf %178, %180 : vector<2x128xf32>
    %182 = math.tanh %181 : vector<2x128xf32>
    %cst_44 = arith.constant 1.000000e+00 : f32
    %183 = vector.broadcast %cst_44 : f32 to vector<2x128xf32>
    %184 = arith.subf %183, %177 : vector<2x128xf32>
    %185 = arith.mulf %184, %182 : vector<2x128xf32>
    %186 = arith.mulf %177, %155 : vector<2x128xf32>
    %187 = arith.addf %185, %186 : vector<2x128xf32>
    %188 = vector.extract_strided_slice %24 {offsets = [5, 0], sizes = [1, 384], strides = [1, 1]} : vector<12x384xf32> to vector<1x384xf32>
    %189 = vector.extract_strided_slice %24 {offsets = [11, 0], sizes = [1, 384], strides = [1, 1]} : vector<12x384xf32> to vector<1x384xf32>
    %190 = tpu.concatenate %188, %189 in 0 : vector<1x384xf32>, vector<1x384xf32> -> vector<2x384xf32>
    %cst_45 = arith.constant dense<0.000000e+00> : vector<2x384xf32>
    %191 = tpu.matmul %187, %25, %cst_45 {dimension_numbers = #tpu.dot_dimension_numbers<[1], [0], [0], [1], [0, 0, 1, 1], [], []>} : vector<2x128xf32>, vector<128x384xf32>, vector<2x384xf32> -> vector<2x384xf32>
    %192 = vector.broadcast %26 : vector<1x384xf32> to vector<2x384xf32>
    %193 = arith.addf %191, %192 : vector<2x384xf32>
    %194 = vector.extract_strided_slice %190 {offsets = [0, 0], sizes = [2, 128], strides = [1, 1]} : vector<2x384xf32> to vector<2x128xf32>
    %195 = vector.extract_strided_slice %193 {offsets = [0, 0], sizes = [2, 128], strides = [1, 1]} : vector<2x384xf32> to vector<2x128xf32>
    %196 = arith.addf %194, %195 : vector<2x128xf32>
    %197 = arith.negf %196 : vector<2x128xf32>
    %198 = math.exp %197 : vector<2x128xf32>
    %cst_46 = arith.constant 1.000000e+00 : f32
    %199 = vector.broadcast %cst_46 : f32 to vector<2x128xf32>
    %200 = arith.addf %199, %198 : vector<2x128xf32>
    %201 = arith.divf %199, %200 : vector<2x128xf32>
    %202 = vector.extract_strided_slice %190 {offsets = [0, 128], sizes = [2, 128], strides = [1, 1]} : vector<2x384xf32> to vector<2x128xf32>
    %203 = vector.extract_strided_slice %193 {offsets = [0, 128], sizes = [2, 128], strides = [1, 1]} : vector<2x384xf32> to vector<2x128xf32>
    %204 = arith.addf %202, %203 : vector<2x128xf32>
    %205 = arith.negf %204 : vector<2x128xf32>
    %206 = math.exp %205 : vector<2x128xf32>
    %cst_47 = arith.constant 1.000000e+00 : f32
    %207 = vector.broadcast %cst_47 : f32 to vector<2x128xf32>
    %208 = arith.addf %207, %206 : vector<2x128xf32>
    %209 = arith.divf %207, %208 : vector<2x128xf32>
    %210 = vector.extract_strided_slice %190 {offsets = [0, 256], sizes = [2, 128], strides = [1, 1]} : vector<2x384xf32> to vector<2x128xf32>
    %211 = vector.extract_strided_slice %193 {offsets = [0, 256], sizes = [2, 128], strides = [1, 1]} : vector<2x384xf32> to vector<2x128xf32>
    %212 = arith.mulf %201, %211 : vector<2x128xf32>
    %213 = arith.addf %210, %212 : vector<2x128xf32>
    %214 = math.tanh %213 : vector<2x128xf32>
    %cst_48 = arith.constant 1.000000e+00 : f32
    %215 = vector.broadcast %cst_48 : f32 to vector<2x128xf32>
    %216 = arith.subf %215, %209 : vector<2x128xf32>
    %217 = arith.mulf %216, %214 : vector<2x128xf32>
    %218 = arith.mulf %209, %187 : vector<2x128xf32>
    %219 = arith.addf %217, %218 : vector<2x128xf32>
    %c0_49 = arith.constant 0 : index
    %c0_50 = arith.constant 0 : index
    %220 = vector.load %arg10[%c0_49, %c0_50] : memref<128x32xf32, #tpu.memory_space<vmem>>, vector<128x32xf32>
    %cst_51 = arith.constant dense<0.000000e+00> : vector<2x32xf32>
    %221 = tpu.matmul %219, %220, %cst_51 {dimension_numbers = #tpu.dot_dimension_numbers<[1], [0], [0], [1], [0, 0, 1, 1], [], []>} : vector<2x128xf32>, vector<128x32xf32>, vector<2x32xf32> -> vector<2x32xf32>
    %c0_52 = arith.constant 0 : index
    %c0_53 = arith.constant 0 : index
    %222 = vector.load %arg11[%c0_52, %c0_53] : memref<1x32xf32, #tpu.memory_space<vmem>>, vector<1x32xf32>
    %223 = vector.broadcast %222 : vector<1x32xf32> to vector<2x32xf32>
    %224 = arith.addf %221, %223 : vector<2x32xf32>
    %c0_54 = arith.constant 0 : index
    %c0_55 = arith.constant 0 : index
    %225 = vector.load %arg12[%c0_54, %c0_55] : memref<2x32xf32, #tpu.memory_space<vmem>>, vector<2x32xf32>
    tpu.vector_store %arg12[%c0_54, %c0_55], %224 {strides = array<i32>} : memref<2x32xf32, #tpu.memory_space<vmem>>, vector<2x32xf32>,
    return
  }
}

</mosaic_0001>

<bundles_post_ra>
// kernel: wificsi_forward.1
= control target key start
LH: loop header
LB: loop body
LE: loop exit
PB: predicated region body
PF: predicated region fallthrough
CT: control target
= control target key end

     0   :  { %17 = vsyncpa [#allocation3], 0  ;;  %s3785_s0 = inlined_call_operand.vmem [shape: f32[12,342], index: 0, kind: input, shape index: {}]   ;;  %s3786_s1 = inlined_call_operand.hbm [shape: f32[342,1024], index: 1, kind: input, shape index: {}]   ;;  %s3787_s2 = inlined_call_operand.hbm [shape: f32[1,1024], index: 2, kind: input, shape index: {}]   ;;  %s3788_s3 = inlined_call_operand.hbm [shape: f32[512,256], index: 3, kind: input, shape index: {}]   ;;  %s3789_s4 = inlined_call_operand.hbm [shape: f32[1,256], index: 4, kind: input, shape index: {}]   ;;  %s3790_s5 = inlined_call_operand.vmem [shape: f32[256,8], index: 5, kind: input, shape index: {}]   ;;  %s3791_s6 = inlined_call_operand.hbm [shape: f32[8,384], index: 6, kind: input, shape index: {}]   ;;  %s3792_s7 = inlined_call_operand.hbm [shape: f32[1,384], index: 7, kind: input, shape index: {}]   ;;  %s3793_s8 = inlined_call_operand.hbm [shape: f32[128,384], index: 8, kind: input, shape index: {}]   ;;  %s3794_s9 = inlined_call_operand.hbm [shape: f32[1,384], index: 9, kind: input, shape index: {}]   ;;  %s3795_s10 = inlined_call_operand.vmem [shape: f32[128,32], index: 10, kind: input, shape index: {}]   ;;  %s3796_s11 = inlined_call_operand.hbm [shape: f32[1,32], index: 11, kind: input, shape index: {}]   ;;  %s3797_s12 = inlined_call_operand.vmem [shape: f32[2,32], index: 12, kind: output, shape index: {}]  }
   0x1   :  { %18 = vsyncpa [#allocation5], 0 }
   0x2   :  { %19 = vsyncpa [#allocation8], 0 }
   0x3   :  { %20 = vsyncpa [#allocation11], 0  ;;  %s42_s23 = sshll.u32 %s3787_s2, 4  ;;  %s43_s23 = int_to_ptr.hbm [resolvable:$true] %s42_s23 }
   0x4   :  { %21 = vsyncpa [#allocation14], 0  ;;  %s2814_s24 = smov [#allocation4]   ;;  %s66_s28 = sshll.u32 %s3789_s4, 4  ;;  %s67_s28 = int_to_ptr.hbm [resolvable:$true] %s66_s28 }
   0x5   :  { %s44_s25 = sshll.u32 %s2814_s24, 4  ;;  %s2815_s29 = smov [#allocation7]   ;;  %s45_s25 = int_to_ptr.vmem [resolvable:$true] %s44_s25 }
   0x6   :  { %47 = dma.hbm_to_vmem [thread:$0]  %s43_s23, 128, %s45_s25, [#allocation5]  }
   0x7   :  { %s68_s30 = sshll.u32 %s2815_s29, 4  ;;  %s90_s15 = sshll.u32 %s3792_s7, 4  ;;  %s69_s30 = int_to_ptr.vmem [resolvable:$true] %s68_s30  ;;  %s91_s15 = int_to_ptr.hbm [resolvable:$true] %s90_s15 }
   0x8   :  { %71 = dma.hbm_to_vmem [thread:$0]  %s67_s28, 32, %s69_s30, [#allocation8]  }
   0x9   :  { %s114_s17 = sshll.u32 %s3794_s9, 4  ;;  %s2816_s18 = smov [#allocation10]   ;;  %s115_s17 = int_to_ptr.hbm [resolvable:$true] %s114_s17 }
   0xa   :  { %s92_s19 = sshll.u32 %s2816_s18, 4  ;;  %s2817_s4 = smov [#allocation13]   ;;  %s93_s19 = int_to_ptr.vmem [resolvable:$true] %s92_s19 }
   0xb   :  { %95 = dma.hbm_to_vmem [thread:$0]  %s91_s15, 48, %s93_s19, [#allocation11]  }
   0xc   :  { %s116_s20 = sshll.u32 %s2817_s4, 4  ;;  %s28_s23 = sshll.u32 %s3786_s1, 4  ;;  %s117_s20 = int_to_ptr.vmem [resolvable:$true] %s116_s20  ;;  %s29_s23 = int_to_ptr.hbm [resolvable:$true] %s28_s23 }
   0xd   :  { %119 = dma.hbm_to_vmem [thread:$0]  %s115_s17, 48, %s117_s20, [#allocation14]  }
   0xe   :  { %s2818_s7 = smov [#allocation2]   ;;  %s52_s9 = sshll.u32 %s3788_s3, 4  ;;  %s53_s9 = int_to_ptr.hbm [resolvable:$true] %s52_s9 }
   0xf   :  { %s30_s24 = sshll.u32 %s2818_s7, 4  ;;  %s2819_s27 = smov 1024   ;;  %s31_s24 = int_to_ptr.vmem [resolvable:$true] %s30_s24 }
  0x10   :  { %s2820_s28 = smov 64   ;;  %s2821_s29 = smov [#allocation6]  }
  0x11   :  { %36 = dma.hbm_to_vmem [thread:$0]  %s29_s23, 44032, %s31_s24, [#allocation3], %s2819_s27, %s2819_s27, %s2820_s28  }
  0x12   :  { %s54_s30 = sshll.u32 %s2821_s29, 4  ;;  %s2822_s13 = smov 256   ;;  %s55_s30 = int_to_ptr.vmem [resolvable:$true] %s54_s30 }
  0x13   :  { %s2823_s14 = smov 16   ;;  %s79_s2 = sshll.u32 %s3791_s6, 4  ;;  %s80_s2 = int_to_ptr.hbm [resolvable:$true] %s79_s2 }
  0x14   :  { %60 = dma.hbm_to_vmem [thread:$0]  %s53_s9, 16384, %s55_s30, [#allocation5], %s2822_s13, %s2822_s13, %s2823_s14  }
  0x15   :  { %s2824_s16 = smov [#allocation9]   ;;  %s100_s19 = sshll.u32 %s3793_s8, 4  ;;  %s101_s19 = int_to_ptr.hbm [resolvable:$true] %s100_s19 }
  0x16   :  { %s81_s17 = sshll.u32 %s2824_s16, 4  ;;  %s2825_s4 = smov [#allocation12]   ;;  %s82_s17 = int_to_ptr.vmem [resolvable:$true] %s81_s17 }
  0x17   :  { %84 = dma.hbm_to_vmem [thread:$0]  %s80_s2, 384, %s82_s17, [#allocation8]  }
  0x18   :  { %s102_s20 = sshll.u32 %s2825_s4, 4  ;;  %s2826_s21 = smov 384   ;;  %s103_s20 = int_to_ptr.vmem [resolvable:$true] %s102_s20 }
  0x19   :  { %s2827_s22 = smov 24   ;;  %s127_s6 = sshll.u32 %s3796_s11, 4  ;;  %s128_s6 = int_to_ptr.hbm [resolvable:$true] %s127_s6 }
  0x1a   :  { %108 = dma.hbm_to_vmem [thread:$0]  %s101_s19, 6144, %s103_s20, [#allocation11], %s2826_s21, %s2826_s21, %s2827_s22  }
  0x1b   :  { %s2828_s24 = smov [#allocation15]  }
  0x1c   :  { %s129_s25 = sshll.u32 %s2828_s24, 4  ;;  %s130_s25 = int_to_ptr.vmem [resolvable:$true] %s129_s25 }
  0x1d   :  { %132 = dma.hbm_to_vmem [thread:$0]  %s128_s6, 16, %s130_s25, [#allocation14]  }
  0x1e   :  { %2804 = dma.done.wait [#allocation3], 44032  }
  0x1f   :  { %2805 = vsyncadd [#allocation3], 4294923264 }
  0x20   :  { %2806 = dma.done.wait [#allocation5], 16512  }
  0x21   :  { %2807 = vsyncadd [#allocation5], 4294950784 }
  0x22   :  { %2808 = dma.done.wait [#allocation8], 416  }
  0x23   :  { %2809 = vsyncadd [#allocation8], 4294966880 }
  0x24   :  { %2810 = dma.done.wait [#allocation11], 6192  }
  0x25   :  { %2811 = vsyncadd [#allocation11], 4294961104 }
  0x26   :  { %2812 = dma.done.wait [#allocation14], 64  }
  0x27   :  { %2813 = vsyncadd [#allocation14], 4294967232  ;;  %vm544_vm0 = vcmask 1045504   ;;  %v296_v0 = vld [vmem:[#allocation2 + $0x3c8] sm:$0xff]  ;;  %v511_v1 = vld [vmem:[#allocation2 + $0xa80] sm:$0x3f] }
  0x28   :  { %v288_v2 = vld [vmem:[#allocation2 + $0x388] sm:$0xff]  ;;  %638 = vmatpush.msra.mxu3 %v296_v0  ;;  %2460 = vmatpush.msk.msra.mxu2 %vm544_vm0, %v511_v1  ;;  %v503_v3 = vld [vmem:[#allocation2 + $0xa40] sm:$0xff]  ;;  %v2926_v36 = vld [vmem:[%s3785_s0 + $0x10] sm:$0xff]  ;;  %vm537_vm1 = vcmask 703488   ;;  %vm1556_vm2 = vcmask 64512   ;;  %vm1690_vm3 = vcmask 1040384  }
  0x29   :  { %v280_v4 = vld [vmem:[#allocation2 + $0x348] sm:$0xff]  ;;  %v495_v5 = vld [vmem:[#allocation2 + $0xa00] sm:$0xff] }
  0x2a   :  { %639 = vmatpush.msra.mxu3 %v288_v2  ;;  %621 = vmatpush.msra.mxu2 %v503_v3  ;;  %v272_v6 = vld [vmem:[#allocation2 + $0x308] sm:$0xff]  ;;  %v487_v7 = vld [vmem:[#allocation2 + $0x9c0] sm:$0xff]  ;;  %v297_v3 = vld [vmem:[#allocation2 + $0x3d0] sm:$0xff] }
  0x2b   :  { %v423_v8 = vld [vmem:[#allocation2 + $0x7c0] sm:$0xff]  ;;  %v264_v9 = vld [vmem:[#allocation2 + $0x2c8] sm:$0xff] }
  0x2c   :  { %640 = vmatpush.msra.mxu3 %v280_v4  ;;  %622 = vmatpush.msra.mxu2 %v495_v5  ;;  %v479_v10 = vld [vmem:[#allocation2 + $0x980] sm:$0xff]  ;;  %v256_v13 = vld [vmem:[#allocation2 + $0x288] sm:$0xff] }
  0x2d   :  { %592 = vmatpush.msra.mxu1 %v423_v8  ;;  %v415_v11 = vld [vmem:[#allocation2 + $0x780] sm:$0xff]  ;;  %v248_v16 = vld [vmem:[#allocation2 + $0x248] sm:$0xff]  ;;  %v289_v8 = vld [vmem:[#allocation2 + $0x390] sm:$0xff] }
  0x2e   :  { %641 = vmatpush.msra.mxu3 %v272_v6  ;;  %623 = vmatpush.msra.mxu2 %v487_v7  ;;  %v407_v12 = vld [vmem:[#allocation2 + $0x740] sm:$0xff]  ;;  %v240_v19 = vld [vmem:[#allocation2 + $0x208] sm:$0xff]  ;;  %v2947_v7 = vld [vmem:[%s3785_s0 + $0x18] sm:$0xf] }
  0x2f   :  { %v471_v14 = vld [vmem:[#allocation2 + $0x940] sm:$0xff]  ;;  %593 = vmatpush.msra.mxu1 %v415_v11  ;;  %v232_v22 = vld [vmem:[#allocation2 + $0x1c8] sm:$0xff] }
  0x30   :  { %642 = vmatpush.msra.mxu3 %v264_v9  ;;  %624 = vmatpush.msra.mxu2 %v479_v10  ;;  %v399_v15 = vld [vmem:[#allocation2 + $0x700] sm:$0xff]  ;;  %v224_v27 = vld [vmem:[#allocation2 + $0x188] sm:$0xff] }
  0x31   :  { %v463_v17 = vld [vmem:[#allocation2 + $0x900] sm:$0xff]  ;;  %594 = vmatpush.msra.mxu1 %v407_v12  ;;  %v216_v31 = vld [vmem:[#allocation2 + $0x148] sm:$0xff]  ;;  %v281_v12 = vld [vmem:[#allocation2 + $0x350] sm:$0xff] }
  0x32   :  { %643 = vmatpush.msra.mxu3 %v256_v13  ;;  %625 = vmatpush.msra.mxu2 %v471_v14  ;;  %v391_v18 = vld [vmem:[#allocation2 + $0x6c0] sm:$0xff]  ;;  %v424_v33 = vld [vmem:[#allocation2 + $0x7c8] sm:$0xff] }
  0x33   :  { %v455_v20 = vld [vmem:[#allocation2 + $0x8c0] sm:$0xff]  ;;  %595 = vmatpush.msra.mxu1 %v399_v15  ;;  %v208_v35 = vld [vmem:[#allocation2 + $0x108] sm:$0xff] }
  0x34   :  { %644 = vmatpush.msra.mxu3 %v248_v16  ;;  %626 = vmatpush.msra.mxu2 %v463_v17  ;;  %v383_v21 = vld [vmem:[#allocation2 + $0x680] sm:$0xff]  ;;  %v416_v37 = vld [vmem:[#allocation2 + $0x788] sm:$0xff]  ;;  %v273_v16 = vld [vmem:[#allocation2 + $0x310] sm:$0xff] }
  0x35   :  { %v447_v23 = vld [vmem:[#allocation2 + $0x880] sm:$0xff]  ;;  %596 = vmatpush.msra.mxu1 %v391_v18  ;;  %v200_v39 = vld [vmem:[#allocation2 + $0xc8] sm:$0xff] }
  0x36   :  { %v295_v24 = vld [vmem:[#allocation2 + $0x3c0] sm:$0xff]  ;;  %645 = vmatpush.msra.mxu3 %v240_v19  ;;  %627 = vmatpush.msra.mxu2 %v455_v20  ;;  %v408_v41 = vld [vmem:[#allocation2 + $0x748] sm:$0xff]  ;;  %v265_v20 = vld [vmem:[#allocation2 + $0x2d0] sm:$0xff] }
  0x37   :  { %v375_v25 = vld [vmem:[#allocation2 + $0x640] sm:$0xff]  ;;  %597 = vmatpush.msra.mxu1 %v383_v21  ;;  %569 = vmatpush.msra.mxu0 %v295_v24  ;;  %v192_v43 = vld [vmem:[#allocation2 + $0x88] sm:$0xff]  ;;  %v257_v24 = vld [vmem:[#allocation2 + $0x290] sm:$0xff] }
  0x38   :  { %v287_v26 = vld [vmem:[#allocation2 + $0x380] sm:$0xff]  ;;  %646 = vmatpush.msra.mxu3 %v232_v22  ;;  %628 = vmatpush.msra.mxu2 %v447_v23  ;;  %v400_v45 = vld [vmem:[#allocation2 + $0x708] sm:$0xff] }
  0x39   :  { %v439_v28 = vld [vmem:[#allocation2 + $0x840] sm:$0xff]  ;;  %598 = vmatpush.msra.mxu1 %v375_v25  ;;  %570 = vmatpush.msra.mxu0 %v287_v26  ;;  %v184_v47 = vld [vmem:[#allocation2 + $0x48] sm:$0xff] }
  0x3a   :  { %v367_v29 = vld [vmem:[#allocation2 + $0x600] sm:$0xff]  ;;  %647 = vmatpush.msra.mxu3 %v224_v27  ;;  %629 = vmatpush.msra.mxu2 %v439_v28  ;;  %v392_v49 = vld [vmem:[#allocation2 + $0x6c8] sm:$0xff]  ;;  %v249_v28 = vld [vmem:[#allocation2 + $0x250] sm:$0xff] }
  0x3b   :  { %v279_v30 = vld [vmem:[#allocation2 + $0x340] sm:$0xff]  ;;  %599 = vmatpush.msra.mxu1 %v367_v29  ;;  %v176_v51 = vld [vmem:[#allocation2 + $0x8] sm:$0xff] }
  0x3c   :  { %v431_v32 = vld [vmem:[#allocation2 + $0x800] sm:$0xff]  ;;  %571 = vmatpush.msra.mxu0 %v279_v30  ;;  %648 = vmatpush.msra.mxu3 %v216_v31  ;;  %v512_v53 = vld [vmem:[#allocation2 + $0xa88] sm:$0x3f]  ;;  %v425_v31 = vld [vmem:[#allocation2 + $0x7d0] sm:$0xff] }
  0x3d   :  { %v359_v34 = vld [vmem:[#allocation2 + $0x5c0] sm:$0xff]  ;;  %630 = vmatpush.msra.mxu2 %v431_v32  ;;  %v384_v54 = vld [vmem:[#allocation2 + $0x688] sm:$0xff] }
  0x3e   :  { %v351_v38 = vld [vmem:[#allocation2 + $0x580] sm:$0xff]  ;;  %600 = vmatpush.msra.mxu1 %v359_v34  ;;  %649 = vmatpush.msra.mxu3 %v208_v35  ;;  %v504_v57 = vld [vmem:[#allocation2 + $0xa48] sm:$0xff]  ;;  %v417_v34 = vld [vmem:[#allocation2 + $0x790] sm:$0xff] }
  0x3f   :  { %661 = vmatpush.msrb.mxu2 %v424_v33  ;;  %v271_v40 = vld [vmem:[#allocation2 + $0x300] sm:$0xff]  ;;  %v376_v58 = vld [vmem:[#allocation2 + $0x648] sm:$0xff]  ;;  %v241_v35 = vld [vmem:[#allocation2 + $0x210] sm:$0xff] }
  0x40   :  { %v343_v42 = vld [vmem:[#allocation2 + $0x540] sm:$0xff]  ;;  %2461 = vmatmul.msk.f32.vlgmr.msra.gmra.mxu2 %vm537_vm1, %v2926_v36  ;;  %601 = vmatpush.msra.mxu1 %v351_v38  ;;  %v2939_v60 = vld [vmem:[%s3785_s0 + $0x28] sm:$0xf] }
  0x41   :  { %662 = vmatpush.msrb.mxu2 %v416_v37  ;;  %v263_v44 = vld [vmem:[#allocation2 + $0x2c0] sm:$0xff]  ;;  %650 = vmatpush.msra.mxu3 %v200_v39  ;;  %v496_v61 = vld [vmem:[#allocation2 + $0xa08] sm:$0xff]  ;;  %v298_v37 = vld [vmem:[#allocation2 + $0x3d8] sm:$0xff] }
  0x42   :  { %v335_v46 = vld [vmem:[#allocation2 + $0x500] sm:$0xff]  ;;  %572 = vmatpush.msra.mxu0 %v271_v40  ;;  %602 = vmatpush.msra.mxu1 %v343_v42  ;;  %v368_v62 = vld [vmem:[#allocation2 + $0x608] sm:$0xff]  ;;  %v409_v39 = vld [vmem:[#allocation2 + $0x750] sm:$0xff] }
  0x43   :  { %663 = vmatpush.msrb.mxu2 %v408_v41  ;;  %v255_v48 = vld [vmem:[#allocation2 + $0x280] sm:$0xff]  ;;  %651 = vmatpush.msra.mxu3 %v192_v43  ;;  %v488_v1 = vld [vmem:[#allocation2 + $0x9c8] sm:$0xff]  ;;  %v233_v40 = vld [vmem:[#allocation2 + $0x1d0] sm:$0xff] }
  0x44   :  { %v327_v50 = vld [vmem:[#allocation2 + $0x4c0] sm:$0xff]  ;;  %573 = vmatpush.msra.mxu0 %v263_v44  ;;  %603 = vmatpush.msra.mxu1 %v335_v46  ;;  %v360_v2 = vld [vmem:[#allocation2 + $0x5c8] sm:$0xff]  ;;  %v290_v41 = vld [vmem:[#allocation2 + $0x398] sm:$0xff] }
  0x45   :  { %664 = vmatpush.msrb.mxu2 %v400_v45  ;;  %v247_v52 = vld [vmem:[#allocation2 + $0x240] sm:$0xff]  ;;  %652 = vmatpush.msra.mxu3 %v184_v47  ;;  %v480_v5 = vld [vmem:[#allocation2 + $0x988] sm:$0xff]  ;;  %v401_v42 = vld [vmem:[#allocation2 + $0x710] sm:$0xff] }
  0x46   :  { %574 = vmatpush.msra.mxu0 %v255_v48  ;;  %604 = vmatpush.msra.mxu1 %v327_v50  ;;  %v2933_v55 = vld [vmem:[%s3785_s0] sm:$0xff]  ;;  %v352_v6 = vld [vmem:[#allocation2 + $0x588] sm:$0xff]  ;;  %v225_v43 = vld [vmem:[#allocation2 + $0x190] sm:$0xff] }
  0x47   :  { %665 = vmatpush.msrb.mxu2 %v392_v49  ;;  %v319_v56 = vld [vmem:[#allocation2 + $0x480] sm:$0xff]  ;;  %653 = vmatpush.msra.mxu3 %v176_v51  ;;  %v472_v9 = vld [vmem:[#allocation2 + $0x948] sm:$0xff]  ;;  %v282_v44 = vld [vmem:[#allocation2 + $0x358] sm:$0xff] }
  0x48   :  { %575 = vmatpush.msra.mxu0 %v247_v52  ;;  %v311_v59 = vld [vmem:[#allocation2 + $0x440] sm:$0xff]  ;;  %654 = vmatmul.f32.vlgmr.msra.gmra.mxu3 %v2933_v55  ;;  %v344_v10 = vld [vmem:[#allocation2 + $0x548] sm:$0xff]  ;;  %v393_v45 = vld [vmem:[#allocation2 + $0x6d0] sm:$0xff] }
  0x49   :  { %2463 = vmatpush.msk.msrb.mxu3 %vm544_vm0, %v512_v53  ;;  %666 = vmatpush.msrb.mxu2 %v384_v54  ;;  %v303_v63 = vld [vmem:[#allocation2 + $0x400] sm:$0xff]  ;;  %v464_v13 = vld [vmem:[#allocation2 + $0x908] sm:$0xff]  ;;  %v217_v46 = vld [vmem:[#allocation2 + $0x150] sm:$0xff] }
  0x4a   :  { %605 = vmatpush.msra.mxu1 %v319_v56  ;;  %v239_v0 = vld [vmem:[#allocation2 + $0x200] sm:$0xff]  ;;  %2462 = vmatmul.msk.f32.gmra.mxu2 %vm537_vm1, %v2939_v60  ;;  %v336_v14 = vld [vmem:[#allocation2 + $0x508] sm:$0xff]  ;;  %v513_v47 = vld [vmem:[#allocation2 + $0xa90] sm:$0x3f] }
  0x4b   :  { %690 = vmatpush.msrb.mxu3 %v504_v57  ;;  %667 = vmatpush.msrb.mxu2 %v376_v58  ;;  %v231_v4 = vld [vmem:[#allocation2 + $0x1c0] sm:$0xff]  ;;  %v456_v17 = vld [vmem:[#allocation2 + $0x8c8] sm:$0xff]  ;;  %v274_v48 = vld [vmem:[#allocation2 + $0x318] sm:$0xff] }
  0x4c   :  { %606 = vmatpush.msra.mxu1 %v311_v59  ;;  %576 = vmatpush.msra.mxu0 %v239_v0  ;;  %v223_v11 = vld [vmem:[#allocation2 + $0x180] sm:$0xff]  ;;  %v328_v18 = vld [vmem:[#allocation2 + $0x4c8] sm:$0xff]  ;;  %v385_v49 = vld [vmem:[#allocation2 + $0x690] sm:$0xff] }
  0x4d   :  { %691 = vmatpush.msrb.mxu3 %v496_v61  ;;  %668 = vmatpush.msrb.mxu2 %v368_v62  ;;  %v215_v15 = vld [vmem:[#allocation2 + $0x140] sm:$0xff]  ;;  %v448_v21 = vld [vmem:[#allocation2 + $0x888] sm:$0xff]  ;;  %v209_v50 = vld [vmem:[#allocation2 + $0x110] sm:$0xff] }
  0x4e   :  { %607 = vmatpush.msra.mxu1 %v303_v63  ;;  %577 = vmatpush.msra.mxu0 %v231_v4  ;;  %v207_v19 = vld [vmem:[#allocation2 + $0x100] sm:$0xff]  ;;  %v320_v22 = vld [vmem:[#allocation2 + $0x488] sm:$0xff]  ;;  %v505_v51 = vld [vmem:[#allocation2 + $0xa50] sm:$0xff] }
  0x4f   :  { %692 = vmatpush.msrb.mxu3 %v488_v1  ;;  %669 = vmatpush.msrb.mxu2 %v360_v2  ;;  %v199_v23 = vld [vmem:[#allocation2 + $0xc0] sm:$0xff]  ;;  %v440_v25 = vld [vmem:[#allocation2 + $0x848] sm:$0xff]  ;;  %v266_v52 = vld [vmem:[#allocation2 + $0x2d8] sm:$0xff] }
  0x50   :  { %707 = vmatpush.msrb.mxu1 %v297_v3  ;;  %657 = vmatmul.f32.gmra.mxu3 %v2947_v7  ;;  %v312_v26 = vld [vmem:[#allocation2 + $0x448] sm:$0xff]  ;;  %v191_v27 = vld [vmem:[#allocation2 + $0x80] sm:$0xff]  ;;  %v377_v53 = vld [vmem:[#allocation2 + $0x650] sm:$0xff] }
  0x51   :  { %693 = vmatpush.msrb.mxu3 %v480_v5  ;;  %670 = vmatpush.msrb.mxu2 %v352_v6  ;;  %v432_v29 = vld [vmem:[#allocation2 + $0x808] sm:$0xff]  ;;  %v183_v33 = vld [vmem:[#allocation2 + $0x40] sm:$0xff]  ;;  %v201_v54 = vld [vmem:[#allocation2 + $0xd0] sm:$0xff] }
  0x52   :  { %708 = vmatpush.msrb.mxu1 %v289_v8  ;;  %578 = vmatpush.msra.mxu0 %v223_v11  ;;  %v304_v30 = vld [vmem:[#allocation2 + $0x408] sm:$0xff]  ;;  %v175_v38 = vld [vmem:[#allocation2] sm:$0xff]  ;;  %v497_v56 = vld [vmem:[#allocation2 + $0xa10] sm:$0xff] }
  0x53   :  { %694 = vmatpush.msrb.mxu3 %v472_v9  ;;  %671 = vmatpush.msrb.mxu2 %v344_v10  ;;  %v2953_v32 = vld [vmem:[%s3785_s0 + $0x8] sm:$0xff]  ;;  %v258_v57 = vld [vmem:[#allocation2 + $0x298] sm:$0xff]  ;;  %v369_v58 = vld [vmem:[#allocation2 + $0x610] sm:$0xff] }
  0x54   :  { %709 = vmatpush.msrb.mxu1 %v281_v12  ;;  %579 = vmatpush.msra.mxu0 %v215_v15  ;;  %v193_v59 = vld [vmem:[#allocation2 + $0x90] sm:$0xff]  ;;  %v250_v62 = vld [vmem:[#allocation2 + $0x258] sm:$0xff]  ;;  %v2964_v4 = vld [vmem:[%s3785_s0 + $0x20] sm:$0xf] }
  0x55   :  { %695 = vmatpush.msrb.mxu3 %v464_v13  ;;  %672 = vmatpush.msrb.mxu2 %v336_v14  ;;  %v489_v61 = vld [vmem:[#allocation2 + $0x9d0] sm:$0xff]  ;;  %v242_v2 = vld [vmem:[#allocation2 + $0x218] sm:$0xff] }
  0x56   :  { %710 = vmatpush.msrb.mxu1 %v273_v16  ;;  %580 = vmatpush.msra.mxu0 %v207_v19  ;;  %v361_v63 = vld [vmem:[#allocation2 + $0x5d0] sm:$0xff]  ;;  %v234_v9 = vld [vmem:[#allocation2 + $0x1d8] sm:$0xff] }
  0x57   :  { %696 = vmatpush.msrb.mxu3 %v456_v17  ;;  %673 = vmatpush.msrb.mxu2 %v328_v18  ;;  %v185_v0 = vld [vmem:[#allocation2 + $0x50] sm:$0xff]  ;;  %v426_v10 = vld [vmem:[#allocation2 + $0x7d8] sm:$0xff] }
  0x58   :  { %711 = vmatpush.msrb.mxu1 %v265_v20  ;;  %581 = vmatpush.msra.mxu0 %v199_v23  ;;  %v481_v1 = vld [vmem:[#allocation2 + $0x990] sm:$0xff]  ;;  %v226_v13 = vld [vmem:[#allocation2 + $0x198] sm:$0xff] }
  0x59   :  { %697 = vmatpush.msrb.mxu3 %v448_v21  ;;  %674 = vmatpush.msrb.mxu2 %v320_v22  ;;  %v353_v3 = vld [vmem:[#allocation2 + $0x590] sm:$0xff]  ;;  %v418_v14 = vld [vmem:[#allocation2 + $0x798] sm:$0xff] }
  0x5a   :  { %712 = vmatpush.msrb.mxu1 %v257_v24  ;;  %582 = vmatpush.msra.mxu0 %v191_v27  ;;  %v177_v5 = vld [vmem:[#allocation2 + $0x10] sm:$0xff]  ;;  %v218_v17 = vld [vmem:[#allocation2 + $0x158] sm:$0xff] }
  0x5b   :  { %698 = vmatpush.msrb.mxu3 %v440_v25  ;;  %675 = vmatpush.msrb.mxu2 %v312_v26  ;;  %v473_v6 = vld [vmem:[#allocation2 + $0x950] sm:$0xff]  ;;  %v410_v18 = vld [vmem:[#allocation2 + $0x758] sm:$0xff] }
  0x5c   :  { %713 = vmatpush.msrb.mxu1 %v249_v28  ;;  %583 = vmatpush.msra.mxu0 %v183_v33  ;;  %v345_v8 = vld [vmem:[#allocation2 + $0x550] sm:$0xff]  ;;  %v210_v21 = vld [vmem:[#allocation2 + $0x118] sm:$0xff] }
  0x5d   :  { %699 = vmatpush.msrb.mxu3 %v432_v29  ;;  %676 = vmatpush.msrb.mxu2 %v304_v30  ;;  %v337_v11 = vld [vmem:[#allocation2 + $0x510] sm:$0xff]  ;;  %v402_v22 = vld [vmem:[#allocation2 + $0x718] sm:$0xff] }
  0x5e   :  { %677 = vmatmul.f32.vlgmr.msrb.gmra.mxu2 %v2953_v32  ;;  %2464 = vmatmul.msk.f32.vlgmr.msrb.gmra.mxu3 %vm537_vm1, %v2926_v36  ;;  %v465_v12 = vld [vmem:[#allocation2 + $0x910] sm:$0xff]  ;;  %v202_v25 = vld [vmem:[#allocation2 + $0xd8] sm:$0xff] }
  0x5f   :  { %730 = vmatpush.msra.mxu3 %v425_v31  ;;  %714 = vmatpush.msrb.mxu1 %v241_v35  ;;  %v329_v15 = vld [vmem:[#allocation2 + $0x4d0] sm:$0xff]  ;;  %v394_v26 = vld [vmem:[#allocation2 + $0x6d8] sm:$0xff] }
  0x60   :  { %776 = vmatpush.msra.mxu2 %v298_v37  ;;  %584 = vmatpush.msra.mxu0 %v175_v38  ;;  %v457_v16 = vld [vmem:[#allocation2 + $0x8d0] sm:$0xff]  ;;  %v514_v28 = vld [vmem:[#allocation2 + $0xa98] sm:$0x3f] }
  0x61   :  { %731 = vmatpush.msra.mxu3 %v417_v34  ;;  %715 = vmatpush.msrb.mxu1 %v233_v40  ;;  %v321_v19 = vld [vmem:[#allocation2 + $0x490] sm:$0xff]  ;;  %v194_v30 = vld [vmem:[#allocation2 + $0x98] sm:$0xff]  ;;  %v299_v34 = vld [vmem:[#allocation2 + $0x3e0] sm:$0xff] }
  0x62   :  { %777 = vmatpush.msra.mxu2 %v290_v41  ;;  %585 = vmatmul.f32.vlgmr.msra.gmra.mxu0 %v2933_v55  ;;  %v449_v20 = vld [vmem:[#allocation2 + $0x890] sm:$0xff]  ;;  %v386_v31 = vld [vmem:[#allocation2 + $0x698] sm:$0xff] }
  0x63   :  { %732 = vmatpush.msra.mxu3 %v409_v39  ;;  %716 = vmatpush.msrb.mxu1 %v225_v43  ;;  %v313_v23 = vld [vmem:[#allocation2 + $0x450] sm:$0xff]  ;;  %v506_v33 = vld [vmem:[#allocation2 + $0xa58] sm:$0xff]  ;;  %v291_v39 = vld [vmem:[#allocation2 + $0x3a0] sm:$0xff] }
  0x64   :  { %778 = vmatpush.msra.mxu2 %v282_v44  ;;  %608 = vmatmul.f32.vlgmr.msra.gmra.mxu1 %v2953_v32  ;;  %v441_v24 = vld [vmem:[#allocation2 + $0x850] sm:$0xff]  ;;  %v186_v35 = vld [vmem:[#allocation2 + $0x58] sm:$0xff]  ;;  %v283_v43 = vld [vmem:[#allocation2 + $0x360] sm:$0xff] }
  0x65   :  { %733 = vmatpush.msra.mxu3 %v401_v42  ;;  %717 = vmatpush.msrb.mxu1 %v217_v46  ;;  %v305_v27 = vld [vmem:[#allocation2 + $0x410] sm:$0xff]  ;;  %v498_v37 = vld [vmem:[#allocation2 + $0xa18] sm:$0xff]  ;;  %v427_v44 = vld [vmem:[#allocation2 + $0x7e0] sm:$0xff] }
  0x66   :  { %2466 = vmatpush.msk.msrb.mxu0 %vm544_vm0, %v513_v47  ;;  %779 = vmatpush.msra.mxu2 %v274_v48  ;;  %v433_v29 = vld [vmem:[#allocation2 + $0x810] sm:$0xff]  ;;  %v378_v38 = vld [vmem:[#allocation2 + $0x658] sm:$0xff]  ;;  %v275_v47 = vld [vmem:[#allocation2 + $0x320] sm:$0xff] }
  0x67   :  { %734 = vmatpush.msra.mxu3 %v393_v45  ;;  %718 = vmatpush.msrb.mxu1 %v209_v50  ;;  %v178_v40 = vld [vmem:[#allocation2 + $0x18] sm:$0xff] }
  0x68   :  { %759 = vmatpush.msrb.mxu0 %v505_v51  ;;  %780 = vmatpush.msra.mxu2 %v266_v52  ;;  %v490_v41 = vld [vmem:[#allocation2 + $0x9d8] sm:$0xff]  ;;  %v267_v51 = vld [vmem:[#allocation2 + $0x2e0] sm:$0xff] }
  0x69   :  { %735 = vmatpush.msra.mxu3 %v385_v49  ;;  %719 = vmatpush.msrb.mxu1 %v201_v54  ;;  %v370_v42 = vld [vmem:[#allocation2 + $0x618] sm:$0xff]  ;;  %v419_v49 = vld [vmem:[#allocation2 + $0x7a0] sm:$0xff] }
  0x6a   :  { %760 = vmatpush.msrb.mxu0 %v497_v56  ;;  %781 = vmatpush.msra.mxu2 %v258_v57  ;;  %v482_v45 = vld [vmem:[#allocation2 + $0x998] sm:$0xff]  ;;  %v259_v56 = vld [vmem:[#allocation2 + $0x2a0] sm:$0xff] }
  0x6b   :  { %736 = vmatpush.msra.mxu3 %v377_v53  ;;  %720 = vmatpush.msrb.mxu1 %v193_v59  ;;  %v362_v46 = vld [vmem:[#allocation2 + $0x5d8] sm:$0xff]  ;;  %v411_v53 = vld [vmem:[#allocation2 + $0x760] sm:$0xff] }
  0x6c   :  { %761 = vmatpush.msrb.mxu0 %v489_v61  ;;  %782 = vmatpush.msra.mxu2 %v250_v62  ;;  %v474_v48 = vld [vmem:[#allocation2 + $0x958] sm:$0xff]  ;;  %v251_v61 = vld [vmem:[#allocation2 + $0x260] sm:$0xff] }
  0x6d   :  { %737 = vmatpush.msra.mxu3 %v369_v58  ;;  %721 = vmatpush.msrb.mxu1 %v185_v0  ;;  %v354_v50 = vld [vmem:[#allocation2 + $0x598] sm:$0xff]  ;;  %v403_v58 = vld [vmem:[#allocation2 + $0x720] sm:$0xff] }
  0x6e   :  { %762 = vmatpush.msrb.mxu0 %v481_v1  ;;  %783 = vmatpush.msra.mxu2 %v242_v2  ;;  %v466_v52 = vld [vmem:[#allocation2 + $0x918] sm:$0xff]  ;;  %v243_v2 = vld [vmem:[#allocation2 + $0x220] sm:$0xff] }
  0x6f   :  { %738 = vmatpush.msra.mxu3 %v361_v63  ;;  %680 = vmatmul.f32.gmra.mxu2 %v2964_v4  ;;  %v346_v54 = vld [vmem:[#allocation2 + $0x558] sm:$0xff]  ;;  %v395_v63 = vld [vmem:[#allocation2 + $0x6e0] sm:$0xff] }
  0x70   :  { %722 = vmatpush.msrb.mxu1 %v177_v5  ;;  %763 = vmatpush.msrb.mxu0 %v473_v6  ;;  %v458_v57 = vld [vmem:[#allocation2 + $0x8d8] sm:$0xff] }
  0x71   :  { %739 = vmatpush.msra.mxu3 %v353_v3  ;;  %784 = vmatpush.msra.mxu2 %v234_v9  ;;  %v338_v59 = vld [vmem:[#allocation2 + $0x518] sm:$0xff]  ;;  %v387_v3 = vld [vmem:[#allocation2 + $0x6a0] sm:$0xff] }
  0x72   :  { %799 = vmatpush.msra.mxu1 %v426_v10  ;;  %2465 = vmatmul.msk.f32.gmra.mxu3 %vm537_vm1, %v2939_v60  ;;  %v450_v62 = vld [vmem:[#allocation2 + $0x898] sm:$0xff]  ;;  %v379_v9 = vld [vmem:[#allocation2 + $0x660] sm:$0xff] }
  0x73   :  { %740 = vmatpush.msra.mxu3 %v345_v8  ;;  %764 = vmatpush.msrb.mxu0 %v465_v12  ;;  %v330_v0 = vld [vmem:[#allocation2 + $0x4d8] sm:$0xff]  ;;  %v235_v8 = vld [vmem:[#allocation2 + $0x1e0] sm:$0xff] }
  0x74   :  { %785 = vmatpush.msra.mxu2 %v226_v13  ;;  %800 = vmatpush.msra.mxu1 %v418_v14  ;;  %v442_v1 = vld [vmem:[#allocation2 + $0x858] sm:$0xff]  ;;  %v515_v10 = vld [vmem:[#allocation2 + $0xaa0] sm:$0x3f] }
  0x75   :  { %741 = vmatpush.msra.mxu3 %v337_v11  ;;  %765 = vmatpush.msrb.mxu0 %v457_v16  ;;  %v322_v5 = vld [vmem:[#allocation2 + $0x498] sm:$0xff]  ;;  %v227_v12 = vld [vmem:[#allocation2 + $0x1a0] sm:$0xff] }
  0x76   :  { %786 = vmatpush.msra.mxu2 %v218_v17  ;;  %801 = vmatpush.msra.mxu1 %v410_v18  ;;  %v434_v6 = vld [vmem:[#allocation2 + $0x818] sm:$0xff]  ;;  %v371_v13 = vld [vmem:[#allocation2 + $0x620] sm:$0xff] }
  0x77   :  { %742 = vmatpush.msra.mxu3 %v329_v15  ;;  %766 = vmatpush.msrb.mxu0 %v449_v20  ;;  %v314_v11 = vld [vmem:[#allocation2 + $0x458] sm:$0xff]  ;;  %v507_v14 = vld [vmem:[#allocation2 + $0xa60] sm:$0xff] }
  0x78   :  { %787 = vmatpush.msra.mxu2 %v210_v21  ;;  %802 = vmatpush.msra.mxu1 %v402_v22  ;;  %v306_v15 = vld [vmem:[#allocation2 + $0x418] sm:$0xff]  ;;  %v219_v16 = vld [vmem:[#allocation2 + $0x160] sm:$0xff] }
  0x79   :  { %743 = vmatpush.msra.mxu3 %v321_v19  ;;  %767 = vmatpush.msrb.mxu0 %v441_v24  ;;  %v363_v17 = vld [vmem:[#allocation2 + $0x5e0] sm:$0xff]  ;;  %v300_v19 = vld [vmem:[#allocation2 + $0x3e8] sm:$0xff] }
  0x7a   :  { %788 = vmatpush.msra.mxu2 %v202_v25  ;;  %803 = vmatpush.msra.mxu1 %v394_v26  ;;  %v499_v18 = vld [vmem:[#allocation2 + $0xa20] sm:$0xff] }
  0x7b   :  { %744 = vmatpush.msra.mxu3 %v313_v23  ;;  %588 = vmatmul.f32.gmra.mxu0 %v2947_v7  ;;  %v211_v20 = vld [vmem:[#allocation2 + $0x120] sm:$0xff]  ;;  %v292_v23 = vld [vmem:[#allocation2 + $0x3a8] sm:$0xff] }
  0x7c   :  { %768 = vmatpush.msrb.mxu0 %v433_v29  ;;  %789 = vmatpush.msra.mxu2 %v194_v30  ;;  %v355_v21 = vld [vmem:[#allocation2 + $0x5a0] sm:$0xff] }
  0x7d   :  { %745 = vmatpush.msra.mxu3 %v305_v27  ;;  %804 = vmatpush.msra.mxu1 %v386_v31  ;;  %v491_v22 = vld [vmem:[#allocation2 + $0x9e0] sm:$0xff]  ;;  %v284_v27 = vld [vmem:[#allocation2 + $0x368] sm:$0xff] }
  0x7e   :  { %845 = vmatpush.msra.mxu0 %v299_v34  ;;  %611 = vmatmul.f32.gmra.mxu1 %v2964_v4  ;;  %v203_v24 = vld [vmem:[#allocation2 + $0xe0] sm:$0xff]  ;;  %v276_v31 = vld [vmem:[#allocation2 + $0x328] sm:$0xff] }
  0x7f   :  { %2469 = vmatpush.msk.msrb.mxu3 %vm544_vm0, %v514_v28  ;;  %790 = vmatpush.msra.mxu2 %v186_v35  ;;  %v347_v25 = vld [vmem:[#allocation2 + $0x560] sm:$0xff] }
  0x80   :  { %805 = vmatpush.msra.mxu1 %v378_v38  ;;  %846 = vmatpush.msra.mxu0 %v291_v39  ;;  %v483_v26 = vld [vmem:[#allocation2 + $0x9a0] sm:$0xff] }
  0x81   :  { %828 = vmatpush.msrb.mxu3 %v506_v33  ;;  %791 = vmatpush.msra.mxu2 %v178_v40  ;;  %v195_v28 = vld [vmem:[#allocation2 + $0xa0] sm:$0xff] }
  0x82   :  { %806 = vmatpush.msra.mxu1 %v370_v42  ;;  %847 = vmatpush.msra.mxu0 %v283_v43  ;;  %v339_v29 = vld [vmem:[#allocation2 + $0x520] sm:$0xff]  ;;  %v428_v42 = vld [vmem:[#allocation2 + $0x7e8] sm:$0xff] }
  0x83   :  { %829 = vmatpush.msrb.mxu3 %v498_v37  ;;  %868 = vmatpush.msrb.mxu2 %v427_v44  ;;  %v475_v30 = vld [vmem:[#allocation2 + $0x960] sm:$0xff]  ;;  %v268_v37 = vld [vmem:[#allocation2 + $0x2e8] sm:$0xff] }
  0x84   :  { %807 = vmatpush.msra.mxu1 %v362_v46  ;;  %746 = vmatmul.f32.vlgmr.msra.gmra.mxu3 %v2953_v32  ;;  %v187_v33 = vld [vmem:[#allocation2 + $0x60] sm:$0xff]  ;;  %v420_v46 = vld [vmem:[#allocation2 + $0x7a8] sm:$0xff] }
  0x85   :  { %830 = vmatpush.msrb.mxu3 %v490_v41  ;;  %848 = vmatpush.msra.mxu0 %v275_v47  ;;  %v331_v34 = vld [vmem:[#allocation2 + $0x4e0] sm:$0xff]  ;;  %v260_v41 = vld [vmem:[#allocation2 + $0x2a8] sm:$0xff] }
  0x86   :  { %869 = vmatpush.msrb.mxu2 %v419_v49  ;;  %808 = vmatpush.msra.mxu1 %v354_v50  ;;  %v467_v35 = vld [vmem:[#allocation2 + $0x920] sm:$0xff]  ;;  %v244_v49 = vld [vmem:[#allocation2 + $0x228] sm:$0xff] }
  0x87   :  { %831 = vmatpush.msrb.mxu3 %v482_v45  ;;  %849 = vmatpush.msra.mxu0 %v267_v51  ;;  %v179_v38 = vld [vmem:[#allocation2 + $0x20] sm:$0xff]  ;;  %v252_v45 = vld [vmem:[#allocation2 + $0x268] sm:$0xff] }
  0x88   :  { %870 = vmatpush.msrb.mxu2 %v411_v53  ;;  %809 = vmatpush.msra.mxu1 %v346_v54  ;;  %v323_v39 = vld [vmem:[#allocation2 + $0x4a0] sm:$0xff]  ;;  %v412_v50 = vld [vmem:[#allocation2 + $0x768] sm:$0xff] }
  0x89   :  { %832 = vmatpush.msrb.mxu3 %v474_v48  ;;  %850 = vmatpush.msra.mxu0 %v259_v56  ;;  %v459_v40 = vld [vmem:[#allocation2 + $0x8e0] sm:$0xff]  ;;  %v236_v53 = vld [vmem:[#allocation2 + $0x1e8] sm:$0xff] }
  0x8a   :  { %871 = vmatpush.msrb.mxu2 %v403_v58  ;;  %810 = vmatpush.msra.mxu1 %v338_v59  ;;  %v315_v43 = vld [vmem:[#allocation2 + $0x460] sm:$0xff]  ;;  %v404_v54 = vld [vmem:[#allocation2 + $0x728] sm:$0xff] }
  0x8b   :  { %833 = vmatpush.msrb.mxu3 %v466_v52  ;;  %851 = vmatpush.msra.mxu0 %v251_v61  ;;  %v451_v44 = vld [vmem:[#allocation2 + $0x8a0] sm:$0xff]  ;;  %v301_v52 = vld [vmem:[#allocation2 + $0x3f0] sm:$0xff]  ;;  %v516_v56 = vld [vmem:[#allocation2 + $0xaa8] sm:$0x3f] }
  0x8c   :  { %872 = vmatpush.msrb.mxu2 %v395_v63  ;;  %749 = vmatmul.f32.gmra.mxu3 %v2964_v4  ;;  %v307_v47 = vld [vmem:[#allocation2 + $0x420] sm:$0xff]  ;;  %v228_v58 = vld [vmem:[#allocation2 + $0x1a8] sm:$0xff] }
  0x8d   :  { %834 = vmatpush.msrb.mxu3 %v458_v57  ;;  %811 = vmatpush.msra.mxu1 %v330_v0  ;;  %v443_v48 = vld [vmem:[#allocation2 + $0x860] sm:$0xff]  ;;  %v293_v57 = vld [vmem:[#allocation2 + $0x3b0] sm:$0xff]  ;;  %v396_v59 = vld [vmem:[#allocation2 + $0x6e8] sm:$0xff] }
  0x8e   :  { %852 = vmatpush.msra.mxu0 %v243_v2  ;;  %873 = vmatpush.msrb.mxu2 %v387_v3  ;;  %v435_v51 = vld [vmem:[#allocation2 + $0x820] sm:$0xff]  ;;  %v508_v61 = vld [vmem:[#allocation2 + $0xa68] sm:$0xff]  ;;  %v277_v2 = vld [vmem:[#allocation2 + $0x330] sm:$0xff] }
  0x8f   :  { %835 = vmatpush.msrb.mxu3 %v450_v62  ;;  %812 = vmatpush.msra.mxu1 %v322_v5  ;;  %v285_v62 = vld [vmem:[#allocation2 + $0x370] sm:$0xff]  ;;  %v220_v63 = vld [vmem:[#allocation2 + $0x168] sm:$0xff] }
  0x90   :  { %853 = vmatpush.msra.mxu0 %v235_v8  ;;  %874 = vmatpush.msrb.mxu2 %v379_v9  ;;  %v388_v0 = vld [vmem:[#allocation2 + $0x6a8] sm:$0xff] }
  0x91   :  { %836 = vmatpush.msrb.mxu3 %v442_v1  ;;  %813 = vmatpush.msra.mxu1 %v314_v11  ;;  %v500_v1 = vld [vmem:[#allocation2 + $0xa28] sm:$0xff]  ;;  %v261_v11 = vld [vmem:[#allocation2 + $0x2b0] sm:$0xff] }
  0x92   :  { %854 = vmatpush.msra.mxu0 %v227_v12  ;;  %875 = vmatpush.msrb.mxu2 %v371_v13  ;;  %v380_v3 = vld [vmem:[#allocation2 + $0x668] sm:$0xff] }
  0x93   :  { %837 = vmatpush.msrb.mxu3 %v434_v6  ;;  %792 = vmatmul.f32.vlgmr.msra.gmra.mxu2 %v2933_v55  ;;  %v492_v5 = vld [vmem:[#allocation2 + $0x9e8] sm:$0xff]  ;;  %v269_v6 = vld [vmem:[#allocation2 + $0x2f0] sm:$0xff] }
  0x94   :  { %723 = vmatmul.f32.vlgmr.msrb.gmra.mxu1 %v2933_v55  ;;  %855 = vmatpush.msra.mxu0 %v219_v16  ;;  %v204_v8 = vld [vmem:[#allocation2 + $0xe8] sm:$0xff] }
  0x95   :  { %2472 = vmatpush.msk.msra.mxu3 %vm544_vm0, %v515_v10  ;;  %814 = vmatpush.msra.mxu1 %v306_v15  ;;  %v372_v9 = vld [vmem:[#allocation2 + $0x628] sm:$0xff]  ;;  %v253_v15 = vld [vmem:[#allocation2 + $0x270] sm:$0xff] }
  0x96   :  { %876 = vmatpush.msrb.mxu2 %v363_v17  ;;  %2470 = vmatmul.msk.f32.vlgmr.msrb.gmra.mxu3 %vm537_vm1, %v2926_v36  ;;  %v484_v10 = vld [vmem:[#allocation2 + $0x9a8] sm:$0xff] }
  0x97   :  { %897 = vmatpush.msra.mxu3 %v507_v14  ;;  %914 = vmatpush.msrb.mxu1 %v300_v19  ;;  %v196_v12 = vld [vmem:[#allocation2 + $0xa8] sm:$0xff]  ;;  %v245_v19 = vld [vmem:[#allocation2 + $0x230] sm:$0xff] }
  0x98   :  { %856 = vmatpush.msra.mxu0 %v211_v20  ;;  %877 = vmatpush.msrb.mxu2 %v355_v21  ;;  %v364_v13 = vld [vmem:[#allocation2 + $0x5e8] sm:$0xff] }
  0x99   :  { %898 = vmatpush.msra.mxu3 %v499_v18  ;;  %2467 = vmatmul.msk.f32.vlgmr.msrb.gmra.mxu0 %vm537_vm1, %v2926_v36  ;;  %v476_v14 = vld [vmem:[#allocation2 + $0x968] sm:$0xff] }
  0x9a   :  { %915 = vmatpush.msrb.mxu1 %v292_v23  ;;  %857 = vmatpush.msra.mxu0 %v203_v24  ;;  %v188_v16 = vld [vmem:[#allocation2 + $0x68] sm:$0xff]  ;;  %v237_v23 = vld [vmem:[#allocation2 + $0x1f0] sm:$0xff] }
  0x9b   :  { %899 = vmatpush.msra.mxu3 %v491_v22  ;;  %878 = vmatpush.msrb.mxu2 %v347_v25  ;;  %v356_v17 = vld [vmem:[#allocation2 + $0x5a8] sm:$0xff]  ;;  %v429_v24 = vld [vmem:[#allocation2 + $0x7f0] sm:$0xff] }
  0x9c   :  { %916 = vmatpush.msrb.mxu1 %v284_v27  ;;  %858 = vmatpush.msra.mxu0 %v195_v28  ;;  %v468_v18 = vld [vmem:[#allocation2 + $0x928] sm:$0xff]  ;;  %v229_v27 = vld [vmem:[#allocation2 + $0x1b0] sm:$0xff] }
  0x9d   :  { %900 = vmatpush.msra.mxu3 %v483_v26  ;;  %879 = vmatpush.msrb.mxu2 %v339_v29  ;;  %v180_v20 = vld [vmem:[#allocation2 + $0x28] sm:$0xff]  ;;  %v421_v28 = vld [vmem:[#allocation2 + $0x7b0] sm:$0xff] }
  0x9e   :  { %795 = vmatmul.f32.gmra.mxu2 %v2947_v7  ;;  %917 = vmatpush.msrb.mxu1 %v276_v31  ;;  %v348_v21 = vld [vmem:[#allocation2 + $0x568] sm:$0xff]  ;;  %v221_v31 = vld [vmem:[#allocation2 + $0x170] sm:$0xff] }
  0x9f   :  { %901 = vmatpush.msra.mxu3 %v475_v30  ;;  %859 = vmatpush.msra.mxu0 %v187_v33  ;;  %v460_v22 = vld [vmem:[#allocation2 + $0x8e8] sm:$0xff]  ;;  %v413_v33 = vld [vmem:[#allocation2 + $0x770] sm:$0xff] }
  0xa0   :  { %880 = vmatpush.msrb.mxu2 %v331_v34  ;;  %918 = vmatpush.msrb.mxu1 %v268_v37  ;;  %v340_v25 = vld [vmem:[#allocation2 + $0x528] sm:$0xff]  ;;  %v213_v37 = vld [vmem:[#allocation2 + $0x130] sm:$0xff] }
  0xa1   :  { %902 = vmatpush.msra.mxu3 %v467_v35  ;;  %860 = vmatpush.msra.mxu0 %v179_v38  ;;  %v452_v26 = vld [vmem:[#allocation2 + $0x8a8] sm:$0xff]  ;;  %v405_v38 = vld [vmem:[#allocation2 + $0x730] sm:$0xff] }
  0xa2   :  { %2471 = vmatmul.msk.f32.gmra.mxu3 %vm537_vm1, %v2939_v60  ;;  %881 = vmatpush.msrb.mxu2 %v323_v39  ;;  %v332_v29 = vld [vmem:[#allocation2 + $0x4e8] sm:$0xff]  ;;  %v517_v39 = vld [vmem:[#allocation2 + $0xab0] sm:$0x3f] }
  0xa3   :  { %903 = vmatpush.msra.mxu3 %v459_v40  ;;  %2468 = vmatmul.msk.f32.gmra.mxu0 %vm537_vm1, %v2939_v60  ;;  %v444_v30 = vld [vmem:[#allocation2 + $0x868] sm:$0xff] }
  0xa4   :  { %919 = vmatpush.msrb.mxu1 %v260_v41  ;;  %937 = vmatpush.msrb.mxu0 %v428_v42  ;;  %v324_v34 = vld [vmem:[#allocation2 + $0x4a8] sm:$0xff]  ;;  %v205_v41 = vld [vmem:[#allocation2 + $0xf0] sm:$0xff] }
  0xa5   :  { %726 = vmatmul.f32.gmra.mxu1 %v2947_v7  ;;  %882 = vmatpush.msrb.mxu2 %v315_v43  ;;  %v436_v35 = vld [vmem:[#allocation2 + $0x828] sm:$0xff]  ;;  %v3001_v42 = vld [vmem:[%s3785_s0 + $0x10] sm:$0xff] }
  0xa6   :  { %904 = vmatpush.msra.mxu3 %v451_v44  ;;  %920 = vmatpush.msrb.mxu1 %v252_v45  ;;  %v316_v40 = vld [vmem:[#allocation2 + $0x468] sm:$0xff]  ;;  %v397_v43 = vld [vmem:[#allocation2 + $0x6f0] sm:$0xff] }
  0xa7   :  { %938 = vmatpush.msrb.mxu0 %v420_v46  ;;  %883 = vmatpush.msrb.mxu2 %v307_v47  ;;  %v509_v44 = vld [vmem:[#allocation2 + $0xa70] sm:$0xff]  ;;  %v308_v45 = vld [vmem:[#allocation2 + $0x428] sm:$0xff] }
  0xa8   :  { %905 = vmatpush.msra.mxu3 %v443_v48  ;;  %884 = vmatmul.f32.vlgmr.msrb.gmra.mxu2 %v2953_v32  ;;  %v197_v46 = vld [vmem:[#allocation2 + $0xb0] sm:$0xff] }
  0xa9   :  { %921 = vmatpush.msrb.mxu1 %v244_v49  ;;  %939 = vmatpush.msrb.mxu0 %v412_v50  ;;  %v389_v47 = vld [vmem:[#allocation2 + $0x6b0] sm:$0xff] }
  0xaa   :  { %906 = vmatpush.msra.mxu3 %v435_v51  ;;  %983 = vmatpush.msra.mxu2 %v301_v52  ;;  %v501_v48 = vld [vmem:[#allocation2 + $0xa30] sm:$0xff]  ;;  %v302_v51 = vld [vmem:[#allocation2 + $0x3f8] sm:$0xff] }
  0xab   :  { %2473 = vmatmul.msk.f32.vlgmr.msra.gmra.mxu3 %vm537_vm1, %v2926_v36  ;;  %922 = vmatpush.msrb.mxu1 %v236_v53  ;;  %v212_v36 = vld [vmem:[#allocation2 + $0x128] sm:$0xff]  ;;  %v189_v49 = vld [vmem:[#allocation2 + $0x70] sm:$0xff] }
  0xac   :  { %940 = vmatpush.msrb.mxu0 %v404_v54  ;;  %2475 = vmatpush.msk.msrb.mxu3 %vm544_vm0, %v516_v56  ;;  %v381_v50 = vld [vmem:[#allocation2 + $0x670] sm:$0xff]  ;;  %v430_v56 = vld [vmem:[#allocation2 + $0x7f8] sm:$0xff] }
  0xad   :  { %984 = vmatpush.msra.mxu2 %v293_v57  ;;  %861 = vmatmul.f32.vlgmr.msra.gmra.mxu0 %v2933_v55  ;;  %v493_v52 = vld [vmem:[#allocation2 + $0x9f0] sm:$0xff]  ;;  %v294_v57 = vld [vmem:[#allocation2 + $0x3b8] sm:$0xff] }
  0xae   :  { %923 = vmatpush.msrb.mxu1 %v228_v58  ;;  %941 = vmatpush.msrb.mxu0 %v396_v59  ;;  %v181_v53 = vld [vmem:[#allocation2 + $0x30] sm:$0xff] }
  0xaf   :  { %966 = vmatpush.msrb.mxu3 %v508_v61  ;;  %815 = vmatmul.f32.vlgmr.msra.gmra.mxu1 %v2953_v32  ;;  %v373_v54 = vld [vmem:[#allocation2 + $0x630] sm:$0xff]  ;;  %v422_v61 = vld [vmem:[#allocation2 + $0x7b8] sm:$0xff] }
  0xb0   :  { %985 = vmatpush.msra.mxu2 %v285_v62  ;;  %924 = vmatpush.msrb.mxu1 %v220_v63  ;;  %v365_v58 = vld [vmem:[#allocation2 + $0x5f0] sm:$0xff] }
  0xb1   :  { %942 = vmatpush.msrb.mxu0 %v388_v0  ;;  %967 = vmatpush.msrb.mxu3 %v500_v1  ;;  %v477_v59 = vld [vmem:[#allocation2 + $0x970] sm:$0xff]  ;;  %v414_v0 = vld [vmem:[#allocation2 + $0x778] sm:$0xff] }
  0xb2   :  { %986 = vmatpush.msra.mxu2 %v277_v2  ;;  %925 = vmatpush.msrb.mxu1 %v212_v36  ;;  %v357_v62 = vld [vmem:[#allocation2 + $0x5b0] sm:$0xff]  ;;  %v286_v1 = vld [vmem:[#allocation2 + $0x378] sm:$0xff] }
  0xb3   :  { %887 = vmatmul.f32.gmra.mxu2 %v2964_v4  ;;  %943 = vmatpush.msrb.mxu0 %v380_v3  ;;  %v469_v63 = vld [vmem:[#allocation2 + $0x930] sm:$0xff]  ;;  %v406_v36 = vld [vmem:[#allocation2 + $0x738] sm:$0xff] }
  0xb4   :  { %968 = vmatpush.msrb.mxu3 %v492_v5  ;;  %987 = vmatpush.msra.mxu2 %v269_v6  ;;  %v349_v2 = vld [vmem:[#allocation2 + $0x570] sm:$0xff]  ;;  %v278_v3 = vld [vmem:[#allocation2 + $0x338] sm:$0xff] }
  0xb5   :  { %2474 = vmatmul.msk.f32.gmra.mxu3 %vm537_vm1, %v2939_v60  ;;  %926 = vmatpush.msrb.mxu1 %v204_v8  ;;  %v341_v5 = vld [vmem:[#allocation2 + $0x530] sm:$0xff]  ;;  %v398_v8 = vld [vmem:[#allocation2 + $0x6f8] sm:$0xff] }
  0xb6   :  { %944 = vmatpush.msrb.mxu0 %v372_v9  ;;  %969 = vmatpush.msrb.mxu3 %v484_v10  ;;  %v453_v6 = vld [vmem:[#allocation2 + $0x8b0] sm:$0xff] }
  0xb7   :  { %988 = vmatpush.msra.mxu2 %v261_v11  ;;  %864 = vmatmul.f32.gmra.mxu0 %v2947_v7  ;;  %v333_v9 = vld [vmem:[#allocation2 + $0x4f0] sm:$0xff]  ;;  %v262_v11 = vld [vmem:[#allocation2 + $0x2b8] sm:$0xff] }
  0xb8   :  { %927 = vmatpush.msrb.mxu1 %v196_v12  ;;  %945 = vmatpush.msrb.mxu0 %v364_v13  ;;  %v445_v10 = vld [vmem:[#allocation2 + $0x870] sm:$0xff]  ;;  %v3015_v12 = vld [vmem:[%s3785_s0] sm:$0xff]  ;;  %v390_v13 = vld [vmem:[#allocation2 + $0x6b8] sm:$0xff] }
  0xb9   :  { %970 = vmatpush.msrb.mxu3 %v476_v14  ;;  %818 = vmatmul.f32.gmra.mxu1 %v2964_v4  ;;  %v325_v14 = vld [vmem:[#allocation2 + $0x4b0] sm:$0xff] }
  0xba   :  { %989 = vmatpush.msra.mxu2 %v253_v15  ;;  %928 = vmatpush.msrb.mxu1 %v188_v16  ;;  %v437_v15 = vld [vmem:[#allocation2 + $0x830] sm:$0xff]  ;;  %v254_v16 = vld [vmem:[#allocation2 + $0x278] sm:$0xff] }
  0xbb   :  { %946 = vmatpush.msrb.mxu0 %v356_v17  ;;  %971 = vmatpush.msrb.mxu3 %v468_v18  ;;  %v382_v17 = vld [vmem:[#allocation2 + $0x678] sm:$0xff] }
  0xbc   :  { %990 = vmatpush.msra.mxu2 %v245_v19  ;;  %929 = vmatpush.msrb.mxu1 %v180_v20  ;;  %v518_v18 = vld [vmem:[#allocation2 + $0xab8] sm:$0x3f]  ;;  %v317_v19 = vld [vmem:[#allocation2 + $0x470] sm:$0xff] }
  0xbd   :  { %947 = vmatpush.msrb.mxu0 %v348_v21  ;;  %972 = vmatpush.msrb.mxu3 %v460_v22  ;;  %v374_v20 = vld [vmem:[#allocation2 + $0x638] sm:$0xff] }
  0xbe   :  { %991 = vmatpush.msra.mxu2 %v237_v23  ;;  %1006 = vmatpush.msra.mxu1 %v429_v24  ;;  %v246_v21 = vld [vmem:[#allocation2 + $0x238] sm:$0xff]  ;;  %v309_v23 = vld [vmem:[#allocation2 + $0x430] sm:$0xff] }
  0xbf   :  { %948 = vmatpush.msrb.mxu0 %v340_v25  ;;  %973 = vmatpush.msrb.mxu3 %v452_v26  ;;  %v510_v22 = vld [vmem:[#allocation2 + $0xa78] sm:$0xff] }
  0xc0   :  { %992 = vmatpush.msra.mxu2 %v229_v27  ;;  %1007 = vmatpush.msra.mxu1 %v421_v28  ;;  %v366_v24 = vld [vmem:[#allocation2 + $0x5f8] sm:$0xff] }
  0xc1   :  { %949 = vmatpush.msrb.mxu0 %v332_v29  ;;  %974 = vmatpush.msrb.mxu3 %v444_v30  ;;  %v502_v25 = vld [vmem:[#allocation2 + $0xa38] sm:$0xff] }
  0xc2   :  { %993 = vmatpush.msra.mxu2 %v221_v31  ;;  %1008 = vmatpush.msra.mxu1 %v413_v33  ;;  %v238_v26 = vld [vmem:[#allocation2 + $0x1f8] sm:$0xff] }
  0xc3   :  { %950 = vmatpush.msrb.mxu0 %v324_v34  ;;  %975 = vmatpush.msrb.mxu3 %v436_v35  ;;  %v3024_v27 = vld [vmem:[%s3785_s0 + $0x18] sm:$0xf] }
  0xc4   :  { %994 = vmatpush.msra.mxu2 %v213_v37  ;;  %2476 = vmatmul.msk.f32.vlgmr.msrb.gmra.mxu3 %vm537_vm1, %v3001_v42  ;;  %v358_v28 = vld [vmem:[#allocation2 + $0x5b8] sm:$0xff]  ;;  %v1173_v37 = vld [vmem:[#allocation6 + $0xe0] sm:$0xff] }
  0xc5   :  { %1009 = vmatpush.msra.mxu1 %v405_v38  ;;  %2478 = vmatpush.msk.msra.mxu3 %vm544_vm0, %v517_v39  ;;  %v494_v29 = vld [vmem:[#allocation2 + $0x9f8] sm:$0xff] }
  0xc6   :  { %951 = vmatpush.msrb.mxu0 %v316_v40  ;;  %930 = vmatmul.f32.vlgmr.msrb.gmra.mxu1 %v2933_v55  ;;  %v485_v55 = vld [vmem:[#allocation2 + $0x9b0] sm:$0xff]  ;;  %v230_v30 = vld [vmem:[#allocation2 + $0x1b8] sm:$0xff] }
  0xc7   :  { %995 = vmatpush.msra.mxu2 %v205_v41  ;;  %1010 = vmatpush.msra.mxu1 %v397_v43  ;;  %v1175_v31 = vld [vmem:[#allocation6 + $0xf0] sm:$0xff] }
  0xc8   :  { %1035 = vmatpush.msra.mxu3 %v509_v44  ;;  %952 = vmatpush.msrb.mxu0 %v308_v45  ;;  %v350_v33 = vld [vmem:[#allocation2 + $0x578] sm:$0xff] }
  0xc9   :  { %996 = vmatpush.msra.mxu2 %v197_v46  ;;  %953 = vmatmul.f32.vlgmr.msrb.gmra.mxu0 %v2953_v32  ;;  %v486_v34 = vld [vmem:[#allocation2 + $0x9b8] sm:$0xff] }
  0xca   :  { %1011 = vmatpush.msra.mxu1 %v389_v47  ;;  %1036 = vmatpush.msra.mxu3 %v501_v48  ;;  %v222_v35 = vld [vmem:[#allocation2 + $0x178] sm:$0xff] }
  0xcb   :  { %997 = vmatpush.msra.mxu2 %v189_v49  ;;  %1052 = vmatpush.msra.mxu0 %v302_v51  ;;  %v3028_v38 = vpop.f32.mrf.mxu3  ;;  %v342_v39 = vld [vmem:[#allocation2 + $0x538] sm:$0xff] }
  0xcc   :  { %1012 = vmatpush.msra.mxu1 %v381_v50  ;;  %1037 = vmatpush.msra.mxu3 %v493_v52  ;;  %v478_v40 = vld [vmem:[#allocation2 + $0x978] sm:$0xff]  ;;  %v1169_v50 = vld [vmem:[#allocation6 + $0xc0] sm:$0xff] }
  0xcd   :  { %998 = vmatpush.msra.mxu2 %v181_v53  ;;  %2477 = vmatmul.msk.f32.gmra.mxu3 %vm537_vm1, %v2939_v60  ;;  %v461_v60 = vld [vmem:[#allocation2 + $0x8f0] sm:$0xff]  ;;  %v214_v41 = vld [vmem:[#allocation2 + $0x138] sm:$0xff] }
  0xce   :  { %1013 = vmatpush.msra.mxu1 %v373_v54  ;;  %1038 = vmatpush.msra.mxu3 %v485_v55  ;;  %v334_v43 = vld [vmem:[#allocation2 + $0x4f8] sm:$0xff] }
  0xcf   :  { %1075 = vmatpush.msrb.mxu2 %v430_v56  ;;  %933 = vmatmul.f32.gmra.mxu1 %v2947_v7  ;;  %v270_v7 = vld [vmem:[#allocation2 + $0x2f8] sm:$0xff] }
  0xd0   :  { %1053 = vmatpush.msra.mxu0 %v294_v57  ;;  %1014 = vmatpush.msra.mxu1 %v365_v58  ;;  %v470_v44 = vld [vmem:[#allocation2 + $0x938] sm:$0xff] }
  0xd1   :  { %1039 = vmatpush.msra.mxu3 %v477_v59  ;;  %1076 = vmatpush.msrb.mxu2 %v422_v61  ;;  %v206_v45 = vld [vmem:[#allocation2 + $0xf8] sm:$0xff]  ;;  %v1165_v61 = vld [vmem:[#allocation6 + $0xa0] sm:$0xff] }
  0xd2   :  { %956 = vmatmul.f32.gmra.mxu0 %v2964_v4  ;;  %1015 = vmatpush.msra.mxu1 %v357_v62  ;;  %v1171_v46 = vld [vmem:[#allocation6 + $0xd0] sm:$0xff]  ;;  %v2583_v62 = vld [vmem:[%s3785_s0 + $0x8] sm:$0xff] }
  0xd3   :  { %1040 = vmatpush.msra.mxu3 %v469_v63  ;;  %1077 = vmatpush.msrb.mxu2 %v414_v0  ;;  %v326_v47 = vld [vmem:[#allocation2 + $0x4b8] sm:$0xff]  ;;  %v3038_v58 = vpop.f32.mrf.mxu3  ;;  %v3046_v0 = vpop.f32.mrf.mxu2 }
  0xd4   :  { %1054 = vmatpush.msra.mxu0 %v286_v1  ;;  %1016 = vmatpush.msra.mxu1 %v349_v2  ;;  %v462_v48 = vld [vmem:[#allocation2 + $0x8f8] sm:$0xff]  ;;  %v1161_v1 = vld [vmem:[#allocation6 + $0x80] sm:$0xff] }
  0xd5   :  { %1041 = vmatpush.msra.mxu3 %v461_v60  ;;  %1078 = vmatpush.msrb.mxu2 %v406_v36  ;;  %v198_v49 = vld [vmem:[#allocation2 + $0xb8] sm:$0xff]  ;;  %v1157_v60 = vld [vmem:[#allocation6 + $0x60] sm:$0xff] }
  0xd6   :  { %1055 = vmatpush.msra.mxu0 %v278_v3  ;;  %1017 = vmatpush.msra.mxu1 %v341_v5  ;;  %v318_v51 = vld [vmem:[#allocation2 + $0x478] sm:$0xff] }
  0xd7   :  { %1042 = vmatpush.msra.mxu3 %v453_v6  ;;  %999 = vmatmul.f32.vlgmr.msra.gmra.mxu2 %v3015_v12  ;;  %v454_v52 = vld [vmem:[#allocation2 + $0x8b8] sm:$0xff]  ;;  %v1153_v6 = vld [vmem:[#allocation6 + $0x40] sm:$0xff] }
  0xd8   :  { %1056 = vmatpush.msra.mxu0 %v270_v7  ;;  %1079 = vmatpush.msrb.mxu2 %v398_v8  ;;  %v190_v53 = vld [vmem:[#allocation2 + $0x78] sm:$0xff] }
  0xd9   :  { %1018 = vmatpush.msra.mxu1 %v333_v9  ;;  %1043 = vmatpush.msra.mxu3 %v445_v10  ;;  %v1167_v54 = vld [vmem:[#allocation6 + $0xb0] sm:$0xff] }
  0xda   :  { %1057 = vmatpush.msra.mxu0 %v262_v11  ;;  %1080 = vmatpush.msrb.mxu2 %v390_v13  ;;  %v310_v55 = vld [vmem:[#allocation2 + $0x438] sm:$0xff]  ;;  %v1201_v11 = vld [vmem:[#allocation6 + $0x1c0] sm:$0xff] }
  0xdb   :  { %1019 = vmatpush.msra.mxu1 %v325_v14  ;;  %1044 = vmatpush.msra.mxu3 %v437_v15  ;;  %v446_v56 = vld [vmem:[#allocation2 + $0x878] sm:$0xff]  ;;  %v3054_v8 = vpop.f32.mrf.mxu2  ;;  %v1145_v15 = vld [vmem:[#allocation6] sm:$0xff] }
  0xdc   :  { %1058 = vmatpush.msra.mxu0 %v254_v16  ;;  %2479 = vmatmul.msk.f32.vlgmr.msra.gmra.mxu3 %vm537_vm1, %v3001_v42  ;;  %v182_v57 = vld [vmem:[#allocation2 + $0x38] sm:$0xff]  ;;  %v1197_v16 = vld [vmem:[#allocation6 + $0x1a0] sm:$0xff] }
  0xdd   :  { %1081 = vmatpush.msrb.mxu2 %v382_v17  ;;  %2481 = vmatpush.msk.msrb.mxu3 %vm544_vm0, %v518_v18  ;;  %v438_v59 = vld [vmem:[#allocation2 + $0x838] sm:$0xff]  ;;  %v1176_v17 = vld [vmem:[#allocation6 + $0xf8] sm:$0xff] }
  0xde   :  { %1020 = vmatpush.msra.mxu1 %v317_v19  ;;  %1059 = vmatpush.msra.mxu0 %v246_v21  ;;  %v1163_v63 = vld [vmem:[#allocation6 + $0x90] sm:$0xff]  ;;  %v1174_v21 = vld [vmem:[#allocation6 + $0xe8] sm:$0xff] }
  0xdf   :  { %1082 = vmatpush.msrb.mxu2 %v374_v20  ;;  %1104 = vmatpush.msrb.mxu3 %v510_v22  ;;  %v1159_v2 = vld [vmem:[#allocation6 + $0x70] sm:$0xff]  ;;  %v3060_v18 = vpop.f32.mrf.mxu0 }
  0xe0   :  { %1021 = vmatpush.msra.mxu1 %v309_v23  ;;  %1002 = vmatmul.f32.gmra.mxu2 %v3024_v27  ;;  %v1155_v3 = vld [vmem:[#allocation6 + $0x50] sm:$0xff] }
  0xe1   :  { %1022 = vmatmul.f32.vlgmr.msra.gmra.mxu1 %v2953_v32  ;;  %1083 = vmatpush.msrb.mxu2 %v366_v24  ;;  %v3033_v32 = vld [vmem:[%s3785_s0 + $0x28] sm:$0xf]  ;;  %v3048_v36 = vpop.f32.mrf.mxu3  ;;  %v1207_v5 = vld [vmem:[#allocation6 + $0x1f0] sm:$0xff] }
  0xe2   :  { %1105 = vmatpush.msrb.mxu3 %v502_v25  ;;  %1060 = vmatpush.msra.mxu0 %v238_v26  ;;  %v1203_v7 = vld [vmem:[#allocation6 + $0x1d0] sm:$0xff]  ;;  %v1193_v24 = vld [vmem:[#allocation6 + $0x180] sm:$0xff]  ;;  %v1172_v25 = vld [vmem:[#allocation6 + $0xd8] sm:$0xff] }
  0xe3   :  { %1279 = vmatpush.msrb.mxu1 %v1175_v31  ;;  %1084 = vmatpush.msrb.mxu2 %v358_v28  ;;  %v1151_v9 = vld [vmem:[#allocation6 + $0x30] sm:$0xff]  ;;  %v3062_v20 = vpop.f32.mrf.mxu2  ;;  %v3066_v26 = vld [vmem:[#allocation4] sm:$0xff] }
  0xe4   :  { %1106 = vmatpush.msrb.mxu3 %v494_v29  ;;  %1061 = vmatpush.msra.mxu0 %v230_v30  ;;  %v1147_v13 = vld [vmem:[#allocation6 + $0x10] sm:$0xff]  ;;  %v523_v28 = vperm.slane %v3066_v26, 2 }
  0xe5   :  { %2480 = vmatmul.msk.f32.gmra.mxu3 %vm537_vm1, %v3033_v32  ;;  %1085 = vmatpush.msrb.mxu2 %v350_v33  ;;  %v1199_v14 = vld [vmem:[#allocation6 + $0x1b0] sm:$0xff] }
  0xe6   :  { %1107 = vmatpush.msrb.mxu3 %v486_v34  ;;  %1062 = vmatpush.msra.mxu0 %v222_v35  ;;  %v1195_v19 = vld [vmem:[#allocation6 + $0x190] sm:$0xff]  ;;  %v1170_v34 = vld [vmem:[#allocation6 + $0xc8] sm:$0xff] }
  0xe7   :  { %1280 = vmatpush.msrb.mxu1 %v1173_v37  ;;  %1086 = vmatpush.msrb.mxu2 %v342_v39  ;;  %v1191_v33 = vld [vmem:[#allocation6 + $0x170] sm:$0xff]  ;;  %v1189_v37 = vld [vmem:[#allocation6 + $0x160] sm:$0xff] }
  0xe8   :  { %1108 = vmatpush.msrb.mxu3 %v478_v40  ;;  %1063 = vmatpush.msra.mxu0 %v214_v41  ;;  %v1187_v39 = vld [vmem:[#allocation6 + $0x150] sm:$0xff]  ;;  %v1166_v41 = vld [vmem:[#allocation6 + $0xa8] sm:$0xff] }
  0xe9   :  { %1025 = vmatmul.f32.gmra.mxu1 %v2964_v4  ;;  %1087 = vmatpush.msrb.mxu2 %v334_v43  ;;  %v1239_v43 = vld [vmem:[#allocation6 + $0x2f0] sm:$0xff] }
  0xea   :  { %1109 = vmatpush.msrb.mxu3 %v470_v44  ;;  %1064 = vmatpush.msra.mxu0 %v206_v45  ;;  %v1185_v44 = vld [vmem:[#allocation6 + $0x140] sm:$0xff]  ;;  %v1164_v45 = vld [vmem:[#allocation6 + $0x98] sm:$0xff] }
  0xeb   :  { %1281 = vmatpush.msrb.mxu1 %v1171_v46  ;;  %1088 = vmatpush.msrb.mxu2 %v326_v47 }
  0xec   :  { %1110 = vmatpush.msrb.mxu3 %v462_v48  ;;  %1065 = vmatpush.msra.mxu0 %v198_v49 }
  0xed   :  { %1282 = vmatpush.msrb.mxu1 %v1169_v50  ;;  %1089 = vmatpush.msrb.mxu2 %v318_v51  ;;  %v1237_v50 = vld [vmem:[#allocation6 + $0x2e0] sm:$0xff]  ;;  %v1183_v51 = vld [vmem:[#allocation6 + $0x130] sm:$0xff] }
  0xee   :  { %1111 = vmatpush.msrb.mxu3 %v454_v52  ;;  %1066 = vmatpush.msra.mxu0 %v190_v53  ;;  %v1162_v52 = vld [vmem:[#allocation6 + $0x88] sm:$0xff]  ;;  %v1235_v53 = vld [vmem:[#allocation6 + $0x2d0] sm:$0xff] }
  0xef   :  { %1283 = vmatpush.msrb.mxu1 %v1167_v54  ;;  %1090 = vmatpush.msrb.mxu2 %v310_v55  ;;  %v1181_v54 = vld [vmem:[#allocation6 + $0x120] sm:$0xff]  ;;  %v1160_v55 = vld [vmem:[#allocation6 + $0x78] sm:$0xff] }
  0xf0   :  { %1112 = vmatpush.msrb.mxu3 %v446_v56  ;;  %1091 = vmatmul.f32.vlgmr.msrb.gmra.mxu2 %v2583_v62  ;;  %v1233_v56 = vld [vmem:[#allocation6 + $0x2c0] sm:$0xff] }
  0xf1   :  { %1067 = vmatpush.msra.mxu0 %v182_v57  ;;  %1284 = vmatpush.msrb.mxu1 %v1165_v61  ;;  %v1179_v57 = vld [vmem:[#allocation6 + $0x110] sm:$0xff]  ;;  %v1177_v62 = vld [vmem:[#allocation6 + $0x100] sm:$0xff] }
  0xf2   :  { %1113 = vmatpush.msrb.mxu3 %v438_v59  ;;  %1068 = vmatmul.f32.vlgmr.msra.gmra.mxu0 %v3015_v12  ;;  %v3058_v12 = vpop.f32.mrf.mxu1  ;;  %v3071_v29 = vpop.f32.mrf.mxu2  ;;  %v1158_v59 = vld [vmem:[#allocation6 + $0x68] sm:$0xff]  ;;  %v1231_v61 = vld [vmem:[#allocation6 + $0x2b0] sm:$0xff] }
  0xf3   :  { %2482 = vmatmul.msk.f32.vlgmr.msrb.gmra.mxu3 %vm537_vm1, %v3001_v42  ;;  %1285 = vmatpush.msrb.mxu1 %v1163_v63  ;;  %v1205_v42 = vld [vmem:[#allocation6 + $0x1e0] sm:$0xff]  ;;  %v1156_v63 = vld [vmem:[#allocation6 + $0x58] sm:$0xff] }
  0xf4   :  { %1302 = vmatpush.msrb.mxu0 %v1207_v5  ;;  %1325 = vmatpush.msra.mxu3 %v1239_v43  ;;  %v1198_v43 = vld [vmem:[#allocation6 + $0x1a8] sm:$0xff] }
  0xf5   :  { %1286 = vmatpush.msrb.mxu1 %v1161_v1  ;;  %v3056_v10 = vpop.f32.mrf.mxu3 }
  0xf6   :  { %1303 = vmatpush.msrb.mxu0 %v1205_v42  ;;  %1326 = vmatpush.msra.mxu3 %v1237_v50  ;;  %v1217_v50 = vld [vmem:[#allocation6 + $0x240] sm:$0xff] }
  0xf7   :  { %1287 = vmatpush.msrb.mxu1 %v1159_v2  ;;  %v1229_v2 = vld [vmem:[#allocation6 + $0x2a0] sm:$0xff] }
  0xf8   :  { %1094 = vmatmul.f32.gmra.mxu2 %v2964_v4  ;;  %1304 = vmatpush.msrb.mxu0 %v1203_v7  ;;  %v1149_v4 = vld [vmem:[#allocation6 + $0x20] sm:$0xff] }
  0xf9   :  { %1288 = vmatpush.msrb.mxu1 %v1157_v60  ;;  %1327 = vmatpush.msra.mxu3 %v1235_v53  ;;  %v1208_v60 = vld [vmem:[#allocation6 + $0x1f8] sm:$0xff] }
  0xfa   :  { %1071 = vmatmul.f32.gmra.mxu0 %v3024_v27  ;;  %v3068_v27 = vpop.f32.mrf.mxu0 }
  0xfb   :  { %2483 = vmatmul.msk.f32.gmra.mxu3 %vm537_vm1, %v3033_v32  ;;  %1289 = vmatpush.msrb.mxu1 %v1155_v3  ;;  %v3064_v23 = vpop.f32.mrf.mxu1  ;;  %v1168_v32 = vld [vmem:[#allocation6 + $0xb8] sm:$0xff]  ;;  %v521_v3 = vperm.slane %v3066_v26, 0 }
  0xfc   :  { %1305 = vmatpush.msrb.mxu0 %v1201_v11  ;;  %1328 = vmatpush.msra.mxu3 %v1233_v56  ;;  %v1152_v11 = vld [vmem:[#allocation6 + $0x38] sm:$0xff]  ;;  %v1215_v56 = vld [vmem:[#allocation6 + $0x230] sm:$0xff] }
  0xfd   :  { %1290 = vmatpush.msrb.mxu1 %v1153_v6  ;;  %v1154_v6 = vld [vmem:[#allocation6 + $0x48] sm:$0xff]  ;;  %v590_v53 = vadd.f32 %v3068_v27, %v521_v3 }
  0xfe   :  { %1306 = vmatpush.msrb.mxu0 %v1199_v14  ;;  %1329 = vmatpush.msra.mxu3 %v1231_v61 }
  0xff   :  { %1291 = vmatpush.msrb.mxu1 %v1151_v9  ;;  %v1227_v9 = vld [vmem:[#allocation6 + $0x290] sm:$0xff] }
 0x100   :  { %1307 = vmatpush.msrb.mxu0 %v1197_v16  ;;  %1330 = vmatpush.msra.mxu3 %v1229_v2  ;;  %v1204_v16 = vld [vmem:[#allocation6 + $0x1d8] sm:$0xff]  ;;  %v1265_v2 = vld [vmem:[#allocation6 + $0x3c0] sm:$0xff] }
 0x101   :  { %1292 = vmatpush.msrb.mxu1 %v1149_v4  ;;  %v1206_v4 = vld [vmem:[#allocation6 + $0x1e8] sm:$0xff] }
 0x102   :  { %1308 = vmatpush.msrb.mxu0 %v1195_v19  ;;  %v524_v19 = vperm.slane %v3066_v26, 3  ;;  %1331 = vmatpush.msra.mxu3 %v1227_v9 }
 0x103   :  { %1293 = vmatpush.msrb.mxu1 %v1147_v13 }
 0x104   :  { %1309 = vmatpush.msrb.mxu0 %v1193_v24  ;;  %v525_v24 = vperm.slane %v3066_v26, 4 }
 0x105   :  { %1294 = vmatpush.msrb.mxu1 %v1145_v15  ;;  %v1225_v15 = vld [vmem:[#allocation6 + $0x280] sm:$0xff] }
 0x106   :  { %1310 = vmatpush.msrb.mxu0 %v1191_v33  ;;  %1332 = vmatpush.msra.mxu3 %v1225_v15 }
 0x107   :  { %v747_v22 = vpop.f32.mrf.mxu3  ;;  %1371 = vmatpush.msra.mxu1 %v1176_v17  ;;  %v587_v17 = vadd.f32 %v3060_v18, %v521_v3  ;;  %v1190_v3 = vld [vmem:[#allocation6 + $0x168] sm:$0xff] }
 0x108   :  { %1311 = vmatpush.msrb.mxu0 %v1189_v37 }
 0x109   :  { %1372 = vmatpush.msra.mxu1 %v1174_v21  ;;  %v1150_v21 = vld [vmem:[#allocation6 + $0x28] sm:$0xff] }
 0x10a   :  { %1312 = vmatpush.msrb.mxu0 %v1187_v39  ;;  %v1146_v39 = vld [vmem:[#allocation6 + $0x8] sm:$0xff] }
 0x10b   :  { %1373 = vmatpush.msra.mxu1 %v1172_v25  ;;  %v1223_v25 = vld [vmem:[#allocation6 + $0x270] sm:$0xff] }
 0x10c   :  { %1313 = vmatpush.msrb.mxu0 %v1185_v44  ;;  %1333 = vmatpush.msra.mxu3 %v1223_v25  ;;  %v1259_v25 = vld [vmem:[#allocation6 + $0x390] sm:$0xff] }
 0x10d   :  { %1374 = vmatpush.msra.mxu1 %v1170_v34  ;;  %v1221_v34 = vld [vmem:[#allocation6 + $0x260] sm:$0xff] }
 0x10e   :  { %1314 = vmatpush.msrb.mxu0 %v1183_v51  ;;  %1334 = vmatpush.msra.mxu3 %v1221_v34  ;;  %v1196_v51 = vld [vmem:[#allocation6 + $0x198] sm:$0xff]  ;;  %v1257_v34 = vld [vmem:[#allocation6 + $0x380] sm:$0xff] }
 0x10f   :  { %v3073_v30 = vpop.f32.mrf.mxu3  ;;  %1375 = vmatpush.msra.mxu1 %v1168_v32 }
 0x110   :  { %1315 = vmatpush.msrb.mxu0 %v1181_v54 }
 0x111   :  { %v724_v31 = vpop.f32.mrf.mxu1  ;;  %1376 = vmatpush.msra.mxu1 %v1166_v41  ;;  %v1219_v41 = vld [vmem:[#allocation6 + $0x250] sm:$0xff] }
 0x112   :  { %v725_v35 = vadd.f32 %v724_v31, %v523_v28  ;;  %1316 = vmatpush.msrb.mxu0 %v1179_v57  ;;  %v610_v31 = vadd.f32 %v3058_v12, %v587_v17  ;;  %1335 = vmatpush.msra.mxu3 %v1219_v41  ;;  %v1267_v57 = vld [vmem:[#allocation6 + $0x3d0] sm:$0xff] }
 0x113   :  { %1377 = vmatpush.msra.mxu1 %v1164_v45 }
 0x114   :  { %v748_v40 = vadd.f32 %v747_v22, %v725_v35  ;;  %1317 = vmatpush.msrb.mxu0 %v1177_v62  ;;  %v1200_v35 = vld [vmem:[#allocation6 + $0x1b8] sm:$0xff]  ;;  %v633_v12 = vadd.f32 %v3046_v0, %v610_v31  ;;  %1336 = vmatpush.msra.mxu3 %v1217_v50  ;;  %v1194_v0 = vld [vmem:[#allocation6 + $0x188] sm:$0xff]  ;;  %v1213_v62 = vld [vmem:[#allocation6 + $0x220] sm:$0xff] }
 0x115   :  { %1378 = vmatpush.msra.mxu1 %v1162_v52  ;;  %v1269_v52 = vld [vmem:[#allocation6 + $0x3e0] sm:$0xff]  ;;  %v1184_v31 = vld [vmem:[#allocation6 + $0x138] sm:$0xff] }
 0x116   :  { %v770_v46 = vpop.f32.mrf.mxu0  ;;  %v793_v48 = vpop.f32.mrf.mxu2  ;;  %1394 = vmatpush.msra.mxu0 %v1208_v60  ;;  %1337 = vmatpush.msra.mxu3 %v1215_v56  ;;  %v1211_v60 = vld [vmem:[#allocation6 + $0x210] sm:$0xff]  ;;  %v1226_v56 = vld [vmem:[#allocation6 + $0x288] sm:$0xff] }
 0x117   :  { %v3075_v47 = vadd.f32 %v770_v46, %v748_v40  ;;  %1379 = vmatpush.msra.mxu1 %v1160_v55  ;;  %v794_v33 = vadd.f32 %v793_v48, %v524_v19  ;;  %v1271_v48 = vld [vmem:[#allocation6 + $0x3f0] sm:$0xff] }
 0x118   :  { %1395 = vmatpush.msra.mxu0 %v1206_v4  ;;  %1348 = vmatpush.msra.mxu2 %v1271_v48  ;;  %v1230_v48 = vld [vmem:[#allocation6 + $0x2a8] sm:$0xff] }
 0x119   :  { %v3077_v49 = vpop.f32.mrf.mxu3  ;;  %1380 = vmatpush.msra.mxu1 %v1158_v59  ;;  %v1121_v59 = vmax.f32 %v633_v12, 0.0  ;;  %1338 = vmatpush.msra.mxu3 %v1213_v62  ;;  %v1232_v12 = vld [vmem:[#allocation6 + $0x2b8] sm:$0xff] }
 0x11a   :  { %1396 = vmatpush.msra.mxu0 %v1204_v16  ;;  %1349 = vmatpush.msra.mxu2 %v1269_v52  ;;  %v1228_v52 = vld [vmem:[#allocation6 + $0x298] sm:$0xff] }
 0x11b   :  { %1381 = vmatpush.msra.mxu1 %v1156_v63  ;;  %v1192_v63 = vld [vmem:[#allocation6 + $0x178] sm:$0xff]  ;;  %1339 = vmatpush.msra.mxu3 %v1211_v60  ;;  %v1241_v60 = vld [vmem:[#allocation6 + $0x300] sm:$0xff] }
 0x11c   :  { %1350 = vmatpush.msra.mxu2 %v1267_v57 }
 0x11d   :  { %1382 = vmatpush.msra.mxu1 %v1154_v6  ;;  %v1263_v6 = vld [vmem:[#allocation6 + $0x3b0] sm:$0xff] }
 0x11e   :  { %1351 = vmatpush.msra.mxu2 %v1265_v2  ;;  %v1222_v2 = vld [vmem:[#allocation6 + $0x268] sm:$0xff] }
 0x11f   :  { %1383 = vmatpush.msra.mxu1 %v1152_v11 }
 0x120   :  { %v773_v1 = vpop.f32.mrf.mxu0  ;;  %1352 = vmatpush.msra.mxu2 %v1263_v6 }
 0x121   :  { %v3080_v42 = vpop.f32.mrf.mxu2  ;;  %1384 = vmatpush.msra.mxu1 %v1150_v21  ;;  %v1186_v21 = vld [vmem:[#allocation6 + $0x148] sm:$0xff] }
 0x122   :  { %v727_v5 = vpop.f32.mrf.mxu1  ;;  %v797_v27 = vadd.f32 %v3080_v42, %v524_v19  ;;  %v1261_v42 = vld [vmem:[#allocation6 + $0x3a0] sm:$0xff] }
 0x123   :  { %v728_v7 = vadd.f32 %v727_v5, %v523_v28  ;;  %v1202_v28 = vld [vmem:[#allocation6 + $0x1c8] sm:$0xff]  ;;  %1353 = vmatpush.msra.mxu2 %v1261_v42 }
 0x124   :  { %1397 = vmatpush.msra.mxu0 %v1202_v28  ;;  %v1270_v42 = vld [vmem:[#allocation6 + $0x3e8] sm:$0xff] }
 0x125   :  { %v751_v13 = vadd.f32 %v3073_v30, %v728_v7  ;;  %v3083_v14 = vpop.f32.mrf.mxu3  ;;  %v1148_v30 = vld [vmem:[#allocation6 + $0x18] sm:$0xff]  ;;  %v1209_v7 = vld [vmem:[#allocation6 + $0x200] sm:$0xff]  ;;  %1354 = vmatpush.msra.mxu2 %v1259_v25 }
 0x126   :  { %1385 = vmatpush.msra.mxu1 %v1148_v30  ;;  %1398 = vmatpush.msra.mxu0 %v1200_v35  ;;  %v1236_v35 = vld [vmem:[#allocation6 + $0x2d8] sm:$0xff] }
 0x127   :  { %v3087_v22 = vadd.f32 %v773_v1, %v751_v13  ;;  %v613_v1 = vadd.f32 %v3064_v23, %v590_v53  ;;  %v1188_v23 = vld [vmem:[#allocation6 + $0x158] sm:$0xff]  ;;  %1340 = vmatpush.msra.mxu3 %v1209_v7  ;;  %1355 = vmatpush.msra.mxu2 %v1257_v34 }
 0x128   :  { %1386 = vmatpush.msra.mxu1 %v1146_v39  ;;  %1399 = vmatpush.msra.mxu0 %v1198_v43  ;;  %v1240_v13 = vld [vmem:[#allocation6 + $0x2f8] sm:$0xff]  ;;  %v1234_v39 = vld [vmem:[#allocation6 + $0x2c8] sm:$0xff]  ;;  %v1253_v43 = vld [vmem:[#allocation6 + $0x360] sm:$0xff] }
 0x129   :  { %v636_v15 = vadd.f32 %v3054_v8, %v613_v1  ;;  %1417 = vmatpush.msrb.mxu3 %v1240_v13  ;;  %v1260_v34 = vld [vmem:[#allocation6 + $0x398] sm:$0xff] }
 0x12a   :  { %v862_v18 = vpop.f32.mrf.mxu0  ;;  %1400 = vmatpush.msra.mxu0 %v1196_v51 }
 0x12b   :  { %v863_v37 = vadd.f32 %v862_v18, %v525_v24  ;;  %v885_v32 = vpop.f32.mrf.mxu2  ;;  %v1129_v8 = vmax.f32 %v636_v15, 0.0  ;;  %v1216_v15 = vld [vmem:[#allocation6 + $0x238] sm:$0xff] }
 0x12c   :  { %v816_v40 = vpop.f32.mrf.mxu1  ;;  %1401 = vmatpush.msra.mxu0 %v1194_v0 }
 0x12d   :  { %v817_v44 = vadd.f32 %v816_v40, %v794_v33  ;;  %v886_v45 = vadd.f32 %v885_v32, %v863_v37  ;;  %v522_v33 = vperm.slane %v3066_v26, 1  ;;  %v1182_v37 = vld [vmem:[#allocation6 + $0x128] sm:$0xff]  ;;  %v1180_v40 = vld [vmem:[#allocation6 + $0x118] sm:$0xff] }
 0x12e   :  { %v908_v46 = vpop.f32.mrf.mxu3  ;;  %1402 = vmatpush.msra.mxu0 %v1192_v63  ;;  %v1224_v63 = vld [vmem:[#allocation6 + $0x278] sm:$0xff] }
 0x12f   :  { %v3096_v54 = vadd.f32 %v3077_v49, %v817_v44  ;;  %v909_v55 = vadd.f32 %v908_v46, %v886_v45  ;;  %v656_v41 = vadd.f32 %v3028_v38, %v522_v33  ;;  %v526_v44 = vperm.slane %v3066_v26, 5  ;;  %v1178_v45 = vld [vmem:[#allocation6 + $0x108] sm:$0xff]  ;;  %v1251_v46 = vld [vmem:[#allocation6 + $0x350] sm:$0xff]  ;;  %v1249_v38 = vld [vmem:[#allocation6 + $0x340] sm:$0xff] }
 0x130   :  { %1403 = vmatpush.msra.mxu0 %v1190_v3  ;;  %v659_v57 = vadd.f32 %v3038_v58, %v522_v33  ;;  %v1220_v3 = vld [vmem:[#allocation6 + $0x258] sm:$0xff]  ;;  %v1210_v33 = vld [vmem:[#allocation6 + $0x208] sm:$0xff] }
 0x131   :  { %v1125_v61 = vmax.f32 %v909_v55, 0.0  ;;  %v679_v50 = vadd.f32 %v3062_v20, %v656_v41  ;;  %v1247_v55 = vld [vmem:[#allocation6 + $0x330] sm:$0xff]  ;;  %v1245_v20 = vld [vmem:[#allocation6 + $0x320] sm:$0xff]  ;;  %v1254_v41 = vld [vmem:[#allocation6 + $0x368] sm:$0xff] }
 0x132   :  { %1404 = vmatpush.msra.mxu0 %v1188_v23  ;;  %v682_v58 = vadd.f32 %v3071_v29, %v659_v57  ;;  %v1244_v57 = vld [vmem:[#allocation6 + $0x318] sm:$0xff] }
 0x133   :  { %v3100_v49 = vmax.f32 %v1121_v59, %v1125_v61  ;;  %v702_v59 = vadd.f32 %v3048_v36, %v679_v50 }
 0x134   :  { %v865_v5 = vpop.f32.mrf.mxu0  ;;  %1405 = vmatpush.msra.mxu0 %v1186_v21  ;;  %v1266_v21 = vld [vmem:[#allocation6 + $0x3c8] sm:$0xff] }
 0x135   :  { %v866_v9 = vadd.f32 %v865_v5, %v525_v24  ;;  %1295 = vmatmul.f32.vlgmr.msrb.gmra.mxu1 %v3100_v49  ;;  %v1238_v24 = vld [vmem:[#allocation6 + $0x2e8] sm:$0xff]  ;;  %v1272_v5 = vld [vmem:[#allocation6 + $0x3f8] sm:$0xff]  ;;  %v1122_v6 = vmax.f32 %v702_v59, 0.0 }
 0x136   :  { %v888_v4 = vpop.f32.mrf.mxu2  ;;  %v819_v11 = vpop.f32.mrf.mxu1  ;;  %1418 = vmatpush.msrb.mxu3 %v1238_v24  ;;  %1406 = vmatpush.msra.mxu0 %v1184_v31 }
 0x137   :  { %v820_v16 = vadd.f32 %v819_v11, %v797_v27  ;;  %v889_v17 = vadd.f32 %v888_v4, %v866_v9  ;;  %v1243_v27 = vld [vmem:[#allocation6 + $0x310] sm:$0xff]  ;;  %v1218_v4 = vld [vmem:[#allocation6 + $0x248] sm:$0xff]  ;;  %v705_v11 = vadd.f32 %v3056_v10, %v682_v58  ;;  %v1264_v10 = vld [vmem:[#allocation6 + $0x3b8] sm:$0xff]  ;;  %v1124_v58 = vmax.f32 %v3096_v54, 0.0 }
 0x138   :  { %v911_v19 = vpop.f32.mrf.mxu3  ;;  %1419 = vmatpush.msrb.mxu3 %v1236_v35  ;;  %1407 = vmatpush.msra.mxu0 %v1182_v37  ;;  %v1258_v37 = vld [vmem:[#allocation6 + $0x388] sm:$0xff]  ;;  %v1482_v54 = vld [vmem:[%s3790_s5 + $0x78] sm:$0xff] }
 0x139   :  { %v3107_v28 = vadd.f32 %v3083_v14, %v820_v16  ;;  %v912_v30 = vadd.f32 %v911_v19, %v889_v17  ;;  %v1255_v14 = vld [vmem:[#allocation6 + $0x370] sm:$0xff]  ;;  %v1268_v16 = vld [vmem:[#allocation6 + $0x3d8] sm:$0xff]  ;;  %v1214_v19 = vld [vmem:[#allocation6 + $0x228] sm:$0xff]  ;;  %v1130_v25 = vmax.f32 %v705_v11, 0.0  ;;  %1499 = vmatpush.msrb.mxu1 %v1482_v54 }
 0x13a   :  { %1356 = vmatpush.msra.mxu2 %v1255_v14  ;;  %1420 = vmatpush.msrb.mxu3 %v1234_v39  ;;  %v1256_v14 = vld [vmem:[#allocation6 + $0x378] sm:$0xff] }
 0x13b   :  { %v1133_v18 = vmax.f32 %v912_v30, 0.0  ;;  %1408 = vmatpush.msra.mxu0 %v1180_v40  ;;  %v1212_v30 = vld [vmem:[#allocation6 + $0x218] sm:$0xff] }
 0x13c   :  { %1357 = vmatpush.msra.mxu2 %v1253_v43  ;;  %1421 = vmatpush.msrb.mxu3 %v1232_v12 }
 0x13d   :  { %v3110_v32 = vmax.f32 %v1129_v8, %v1133_v18  ;;  %1409 = vmatpush.msra.mxu0 %v1178_v45  ;;  %v1262_v8 = vld [vmem:[#allocation6 + $0x3a8] sm:$0xff]  ;;  %v527_v18 = vperm.slane %v3066_v26, 6 }
 0x13e   :  { %1358 = vmatpush.msra.mxu2 %v1251_v46  ;;  %1422 = vmatpush.msrb.mxu3 %v1230_v48  ;;  %v1250_v45 = vld [vmem:[#allocation6 + $0x348] sm:$0xff]  ;;  %v1123_v46 = vmax.f32 %v3075_v47, 0.0  ;;  %v1131_v47 = vmax.f32 %v3087_v22, 0.0 }
 0x13f   :  { %1298 = vmatmul.f32.gmra.mxu1 %v3110_v32 }
 0x140   :  { %1359 = vmatpush.msra.mxu2 %v1249_v38  ;;  %1423 = vmatpush.msrb.mxu3 %v1228_v52  ;;  %v1248_v52 = vld [vmem:[#allocation6 + $0x338] sm:$0xff] }
 0x142   :  { %1360 = vmatpush.msra.mxu2 %v1247_v55  ;;  %1424 = vmatpush.msrb.mxu3 %v1226_v56  ;;  %v1246_v55 = vld [vmem:[#allocation6 + $0x328] sm:$0xff] }
 0x143   :  { %v931_v51 = vpop.f32.mrf.mxu1 }
 0x144   :  { %v932_v53 = vadd.f32 %v931_v51, %v526_v44  ;;  %1361 = vmatpush.msra.mxu2 %v1245_v20  ;;  %1425 = vmatpush.msrb.mxu3 %v1224_v63  ;;  %v528_v63 = vperm.slane %v3066_v26, 7 }
 0x146   :  { %v954_v0 = vpop.f32.mrf.mxu0  ;;  %1362 = vmatpush.msra.mxu2 %v1243_v27  ;;  %1426 = vmatpush.msrb.mxu3 %v1222_v2 }
 0x147   :  { %v955_v61 = vadd.f32 %v954_v0, %v932_v53  ;;  %v977_v62 = vpop.f32.mrf.mxu3  ;;  %1387 = vmatmul.f32.vlgmr.msra.gmra.mxu1 %v3100_v49 }
 0x148   :  { %1363 = vmatpush.msra.mxu2 %v1241_v60  ;;  %1427 = vmatpush.msrb.mxu3 %v1220_v3 }
 0x149   :  { %v978_v1 = vadd.f32 %v977_v62, %v955_v61  ;;  %v1242_v61 = vld [vmem:[#allocation6 + $0x308] sm:$0xff] }
 0x14a   :  { %1440 = vmatpush.msrb.mxu2 %v1272_v5  ;;  %1428 = vmatpush.msrb.mxu3 %v1218_v4 }
 0x14b   :  { %v1126_v36 = vmax.f32 %v978_v1, 0.0 }
 0x14c   :  { %v934_v7 = vpop.f32.mrf.mxu1  ;;  %1441 = vmatpush.msrb.mxu2 %v1270_v42  ;;  %1429 = vmatpush.msrb.mxu3 %v1216_v15  ;;  %v1480_v15 = vld [vmem:[%s3790_s5 + $0x68] sm:$0xff] }
 0x14d   :  { %v1138_v49 = vmax.f32 %v1122_v6, %v1126_v36  ;;  %v935_v9 = vadd.f32 %v934_v7, %v526_v44  ;;  %v1252_v44 = vld [vmem:[#allocation6 + $0x358] sm:$0xff] }
 0x14e   :  { %1442 = vmatpush.msrb.mxu2 %v1268_v16  ;;  %1430 = vmatpush.msrb.mxu3 %v1214_v19  ;;  %v1478_v16 = vld [vmem:[%s3790_s5 + $0x58] sm:$0xff]  ;;  %v1475_v19 = vld [vmem:[%s3790_s5 + $0x40] sm:$0xff] }
 0x14f   :  { %v957_v23 = vpop.f32.mrf.mxu0  ;;  %1318 = vmatmul.f32.vlgmr.msrb.gmra.mxu0 %v1138_v49  ;;  %1390 = vmatmul.f32.gmra.mxu1 %v3110_v32 }
 0x150   :  { %v958_v13 = vadd.f32 %v957_v23, %v935_v9  ;;  %v980_v29 = vpop.f32.mrf.mxu3  ;;  %1443 = vmatpush.msrb.mxu2 %v1266_v21  ;;  %1431 = vmatpush.msrb.mxu3 %v1212_v30  ;;  %v1132_v23 = vmax.f32 %v3107_v28, 0.0  ;;  %v1479_v28 = vld [vmem:[%s3790_s5 + $0x60] sm:$0xff]  ;;  %v1474_v21 = vld [vmem:[%s3790_s5 + $0x38] sm:$0xff]  ;;  %v1473_v30 = vld [vmem:[%s3790_s5 + $0x30] sm:$0xff] }
 0x152   :  { %v981_v17 = vadd.f32 %v980_v29, %v958_v13  ;;  %1444 = vmatpush.msrb.mxu2 %v1264_v10  ;;  %1432 = vmatpush.msrb.mxu3 %v1210_v33  ;;  %v1481_v13 = vld [vmem:[%s3790_s5 + $0x70] sm:$0xff]  ;;  %v1496_v10 = vld [vmem:[%s3790_s5 + $0xe8] sm:$0xff]  ;;  %v1471_v33 = vld [vmem:[%s3790_s5 + $0x20] sm:$0xff] }
 0x153   :  { %1500 = vmatpush.msrb.mxu1 %v1481_v13  ;;  %v1477_v29 = vld [vmem:[%s3790_s5 + $0x50] sm:$0xff] }
 0x154   :  { %v1134_v24 = vmax.f32 %v981_v17, 0.0  ;;  %1445 = vmatpush.msrb.mxu2 %v1262_v8  ;;  %v1476_v17 = vld [vmem:[%s3790_s5 + $0x48] sm:$0xff]  ;;  %v1495_v8 = vld [vmem:[%s3790_s5 + $0xe0] sm:$0xff] }
 0x155   :  { %1501 = vmatpush.msrb.mxu1 %v1480_v15 }
 0x156   :  { %v1142_v31 = vmax.f32 %v1130_v25, %v1134_v24  ;;  %1446 = vmatpush.msrb.mxu2 %v1260_v34  ;;  %v1498_v25 = vld [vmem:[%s3790_s5 + $0xf8] sm:$0xff]  ;;  %v1497_v24 = vld [vmem:[%s3790_s5 + $0xf0] sm:$0xff] }
 0x157   :  { %1502 = vmatpush.msrb.mxu1 %v1479_v28  ;;  %1522 = vmatpush.msrb.mxu0 %v1498_v25  ;;  %v1494_v34 = vld [vmem:[%s3790_s5 + $0xd8] sm:$0xff] }
 0x158   :  { %1321 = vmatmul.f32.gmra.mxu0 %v1142_v31  ;;  %1447 = vmatpush.msrb.mxu2 %v1258_v37  ;;  %v1493_v37 = vld [vmem:[%s3790_s5 + $0xd0] sm:$0xff]  ;;  %v3230_v25 = vld [vmem:[#allocation12 + $0x138] sm:$0xff] }
 0x159   :  { %1503 = vmatpush.msrb.mxu1 %v1478_v16  ;;  %1523 = vmatpush.msrb.mxu0 %v1497_v24  ;;  %v1546_v24 = vld [vmem:[#allocation9 + $0x8] sm:$0xff] }
 0x15a   :  { %v1000_v35 = vpop.f32.mrf.mxu2  ;;  %1448 = vmatpush.msrb.mxu2 %v1256_v14  ;;  %v1492_v14 = vld [vmem:[%s3790_s5 + $0xc8] sm:$0xff] }
 0x15b   :  { %v1001_v32 = vadd.f32 %v1000_v35, %v527_v18  ;;  %1504 = vmatpush.msrb.mxu1 %v1477_v29  ;;  %1524 = vmatpush.msrb.mxu0 %v1496_v10  ;;  %v1469_v35 = vld [vmem:[%s3790_s5 + $0x10] sm:$0xff] }
 0x15c   :  { %1449 = vmatpush.msrb.mxu2 %v1254_v41  ;;  %v1490_v41 = vld [vmem:[%s3790_s5 + $0xb8] sm:$0xff] }
 0x15d   :  { %1505 = vmatpush.msrb.mxu1 %v1476_v17  ;;  %1525 = vmatpush.msrb.mxu0 %v1495_v8  ;;  %v3235_v10 = vld [vmem:[#allocation12 + $0x170] sm:$0xff]  ;;  %v1545_v8 = vld [vmem:[#allocation9] sm:$0xff] }
 0x15e   :  { %v1023_v39 = vpop.f32.mrf.mxu1  ;;  %1450 = vmatpush.msrb.mxu2 %v1252_v44  ;;  %v1487_v44 = vld [vmem:[%s3790_s5 + $0xa0] sm:$0xff] }
 0x15f   :  { %v1024_v40 = vadd.f32 %v1023_v39, %v1001_v32  ;;  %v1046_v43 = vpop.f32.mrf.mxu3  ;;  %1506 = vmatpush.msrb.mxu1 %v1475_v19  ;;  %1526 = vmatpush.msrb.mxu0 %v1494_v34  ;;  %v1468_v32 = vld [vmem:[%s3790_s5 + $0x8] sm:$0xff]  ;;  %v1467_v39 = vld [vmem:[%s3790_s5] sm:$0xff] }
 0x160   :  { %1410 = vmatmul.f32.vlgmr.msra.gmra.mxu0 %v1138_v49  ;;  %1451 = vmatpush.msrb.mxu2 %v1250_v45  ;;  %v1486_v45 = vld [vmem:[%s3790_s5 + $0x98] sm:$0xff]  ;;  %v3248_v34 = vld [vmem:[#allocation12 + $0x140] sm:$0xff] }
 0x161   :  { %v1047_v12 = vadd.f32 %v1046_v43, %v1024_v40  ;;  %1507 = vmatpush.msrb.mxu1 %v1474_v21  ;;  %1527 = vmatpush.msrb.mxu0 %v1493_v37  ;;  %v1491_v40 = vld [vmem:[%s3790_s5 + $0xc0] sm:$0xff]  ;;  %v1489_v43 = vld [vmem:[%s3790_s5 + $0xb0] sm:$0xff] }
 0x162   :  { %1452 = vmatpush.msrb.mxu2 %v1248_v52  ;;  %v3253_v37 = vld [vmem:[#allocation12 + $0x128] sm:$0xff] }
 0x163   :  { %v1127_v48 = vmax.f32 %v1047_v12, 0.0  ;;  %v1003_v50 = vpop.f32.mrf.mxu2  ;;  %1508 = vmatpush.msrb.mxu1 %v1473_v30  ;;  %1528 = vmatpush.msrb.mxu0 %v1492_v14  ;;  %v1488_v12 = vld [vmem:[%s3790_s5 + $0xa8] sm:$0xff]  ;;  %v3258_v14 = vld [vmem:[#allocation12 + $0x110] sm:$0xff] }
 0x164   :  { %v1004_v38 = vadd.f32 %v1003_v50, %v527_v18  ;;  %1453 = vmatpush.msrb.mxu2 %v1246_v55  ;;  %v1470_v18 = vld [vmem:[%s3790_s5 + $0x18] sm:$0xff]  ;;  %v3232_v30 = vld [vmem:[#allocation12 + $0x120] sm:$0xff] }
 0x165   :  { %v1139_v51 = vmax.f32 %v1123_v46, %v1127_v48  ;;  %1529 = vmatpush.msrb.mxu0 %v1491_v40  ;;  %v1485_v46 = vld [vmem:[%s3790_s5 + $0x90] sm:$0xff]  ;;  %v1484_v48 = vld [vmem:[%s3790_s5 + $0x88] sm:$0xff]  ;;  %v3264_v40 = vld [vmem:[#allocation12 + $0xf8] sm:$0xff] }
 0x166   :  { %v1026_v53 = vpop.f32.mrf.mxu1  ;;  %1454 = vmatpush.msrb.mxu2 %v1244_v57 }
 0x167   :  { %v1027_v56 = vadd.f32 %v1026_v53, %v1004_v38  ;;  %1341 = vmatmul.f32.vlgmr.msra.gmra.mxu3 %v1139_v51  ;;  %1530 = vmatpush.msrb.mxu0 %v1490_v41  ;;  %v1273_v38 = vld [vmem:[#allocation7] sm:$0x3]  ;;  %v3267_v41 = vld [vmem:[#allocation12 + $0x90] sm:$0xff] }
 0x168   :  { %v1049_v0 = vpop.f32.mrf.mxu3  ;;  %1413 = vmatmul.f32.gmra.mxu0 %v1142_v31  ;;  %1455 = vmatpush.msrb.mxu2 %v1242_v61  ;;  %v1472_v31 = vld [vmem:[%s3790_s5 + $0x28] sm:$0xff]  ;;  %v1275_v55 = vperm.slane %v1273_v38, 0  ;;  %v3226_v61 = vld [vmem:[#allocation12 + $0x150] sm:$0xff] }
 0x169   :  { %v1050_v59 = vadd.f32 %v1049_v0, %v1027_v56  ;;  %1509 = vmatpush.msrb.mxu1 %v1472_v31  ;;  %1531 = vmatpush.msrb.mxu0 %v1489_v43  ;;  %v3237_v31 = vld [vmem:[#allocation12 + $0x158] sm:$0xff]  ;;  %v3272_v43 = vld [vmem:[#allocation12 + $0xe0] sm:$0xff] }
 0x16a   :  { %1578 = vmatpush.msra.mxu3 %v1545_v8 }
 0x16b   :  { %v1135_v62 = vmax.f32 %v1050_v59, 0.0  ;;  %1510 = vmatpush.msrb.mxu1 %v1471_v33  ;;  %1532 = vmatpush.msrb.mxu0 %v1488_v12  ;;  %v3224_v59 = vld [vmem:[#allocation12 + $0x168] sm:$0xff]  ;;  %v3275_v12 = vld [vmem:[#allocation12 + $0x78] sm:$0xff] }
 0x16c   :  { %v3240_v33 = vld [vmem:[#allocation12 + $0x108] sm:$0xff] }
 0x16d   :  { %v1143_v20 = vmax.f32 %v1131_v47, %v1135_v62  ;;  %1511 = vmatpush.msrb.mxu1 %v1470_v18  ;;  %1533 = vmatpush.msrb.mxu0 %v1487_v44  ;;  %v3244_v18 = vld [vmem:[#allocation12 + $0xf0] sm:$0xff]  ;;  %v3278_v44 = vld [vmem:[#allocation12 + $0xc8] sm:$0xff] }
 0x16f   :  { %1344 = vmatmul.f32.gmra.mxu3 %v1143_v20  ;;  %v1069_v1 = vpop.f32.mrf.mxu0  ;;  %1512 = vmatpush.msrb.mxu1 %v1469_v35  ;;  %v3251_v35 = vld [vmem:[#allocation12 + $0xd8] sm:$0xff] }
 0x170   :  { %v1070_v27 = vadd.f32 %v1069_v1, %v528_v63  ;;  %1534 = vmatpush.msrb.mxu0 %v1486_v45  ;;  %v3281_v45 = vld [vmem:[#allocation12 + $0x60] sm:$0xff] }
 0x171   :  { %1513 = vmatpush.msrb.mxu1 %v1468_v32  ;;  %v3255_v32 = vld [vmem:[#allocation12 + $0xc0] sm:$0xff] }
 0x172   :  { %1535 = vmatpush.msrb.mxu0 %v1485_v46  ;;  %v3284_v46 = vld [vmem:[#allocation12 + $0xb0] sm:$0xff] }
 0x173   :  { %v1092_v2 = vpop.f32.mrf.mxu2  ;;  %1514 = vmatpush.msrb.mxu1 %v1467_v39  ;;  %v3261_v39 = vld [vmem:[#allocation12 + $0xa8] sm:$0xff] }
 0x174   :  { %v1093_v60 = vadd.f32 %v1092_v2, %v1070_v27  ;;  %1536 = vmatpush.msrb.mxu0 %v1484_v48  ;;  %v3286_v48 = vld [vmem:[#allocation12 + $0x48] sm:$0xff] }
 0x175   :  { %1701 = vmatpush.msra.mxu1 %v3224_v59  ;;  %3828 = vst [vmem:[#allocation21_spill] sm:$0xff] %v3286_v48 }
 0x176   :  { %v1115_v3 = vpop.f32.mrf.mxu3 }
 0x177   :  { %v1116_v5 = vadd.f32 %v1115_v3, %v1093_v60  ;;  %1433 = vmatmul.f32.vlgmr.msrb.gmra.mxu3 %v1139_v51  ;;  %v1072_v6 = vpop.f32.mrf.mxu0  ;;  %v1483_v51 = vld [vmem:[%s3790_s5 + $0x80] sm:$0xff]  ;;  %1702 = vmatpush.msra.mxu1 %v3226_v61 }
 0x178   :  { %v1073_v7 = vadd.f32 %v1072_v6, %v528_v63  ;;  %1537 = vmatpush.msrb.mxu0 %v1483_v51  ;;  %v3291_v51 = vld [vmem:[#allocation12 + $0x30] sm:$0xff] }
 0x179   :  { %v1128_v36 = vmax.f32 %v1116_v5, 0.0  ;;  %v1276_v5 = vperm.slane %v1273_v38, 1  ;;  %1703 = vmatpush.msra.mxu1 %v3230_v25  ;;  %3829 = vst [vmem:[#allocation22_spill] sm:$0xff] %v3291_v51  ;;  %v3296_v38 = vld [vmem:[#allocation12 + $0x80] sm:$0xff] }
 0x17b   :  { %v1140_v49 = vmax.f32 %v1124_v58, %v1128_v36  ;;  %v1095_v22 = vpop.f32.mrf.mxu2  ;;  %1704 = vmatpush.msra.mxu1 %v3232_v30 }
 0x17c   :  { %v1096_v9 = vadd.f32 %v1095_v22, %v1073_v7 }
 0x17d   :  { %1364 = vmatmul.f32.vlgmr.msra.gmra.mxu2 %v1140_v49  ;;  %1705 = vmatpush.msra.mxu1 %v3240_v33 }
 0x17e   :  { %v1118_v4 = vpop.f32.mrf.mxu3  ;;  %1601 = vmatpush.msra.mxu2 %v1546_v24 }
 0x17f   :  { %v1119_v26 = vadd.f32 %v1118_v4, %v1096_v9  ;;  %1436 = vmatmul.f32.gmra.mxu3 %v1143_v20  ;;  %1706 = vmatpush.msra.mxu1 %v3244_v18 }
 0x181   :  { %v1136_v42 = vmax.f32 %v1119_v26, 0.0  ;;  %1707 = vmatpush.msra.mxu1 %v3251_v35 }
 0x183   :  { %v1144_v11 = vmax.f32 %v1132_v23, %v1136_v42  ;;  %1708 = vmatpush.msra.mxu1 %v3255_v32 }
 0x185   :  { %1367 = vmatmul.f32.gmra.mxu2 %v1144_v11  ;;  %1709 = vmatpush.msra.mxu1 %v3261_v39 }
 0x187   :  { %1710 = vmatpush.msra.mxu1 %v3267_v41 }
 0x189   :  { %1711 = vmatpush.msra.mxu1 %v3275_v12 }
 0x18b   :  { %1712 = vmatpush.msra.mxu1 %v3281_v45 }
 0x18d   :  { %1456 = vmatmul.f32.vlgmr.msrb.gmra.mxu2 %v1140_v49  ;;  %1713 = vmatpush.msra.mxu1 %v3286_v48 }
 0x18e   :  { %1721 = vmatpush.msrb.mxu2 %v3235_v10 }
 0x18f   :  { %1714 = vmatpush.msra.mxu1 %v3291_v51 }
 0x190   :  { %1722 = vmatpush.msrb.mxu2 %v3237_v31 }
 0x192   :  { %1723 = vmatpush.msrb.mxu2 %v3248_v34 }
 0x194   :  { %1724 = vmatpush.msrb.mxu2 %v3253_v37 }
 0x195   :  { %1459 = vmatmul.f32.gmra.mxu2 %v1144_v11 }
 0x196   :  { %1725 = vmatpush.msrb.mxu2 %v3258_v14 }
 0x198   :  { %1726 = vmatpush.msrb.mxu2 %v3264_v40 }
 0x19a   :  { %1727 = vmatpush.msrb.mxu2 %v3272_v43 }
 0x19c   :  { %1728 = vmatpush.msrb.mxu2 %v3278_v44 }
 0x19e   :  { %1729 = vmatpush.msrb.mxu2 %v3284_v46 }
 0x1b2   :  { %v1296_v50 = vpop.f32.mrf.mxu1 }
 0x1b3   :  { %v1297_v56 = vadd.f32 %v1296_v50, %v1275_v55  ;;  %v3288_v50 = vld [vmem:[#allocation12 + $0x98] sm:$0xff] }
 0x1b4   :  { %1730 = vmatpush.msrb.mxu2 %v3288_v50 }
 0x1b6   :  { %1731 = vmatpush.msrb.mxu2 %v3296_v38 }
 0x1bc   :  { %v1299_v0 = vpop.f32.mrf.mxu1 }
 0x1bd   :  { %v1300_v27 = vadd.f32 %v1299_v0, %v1275_v55  ;;  %v3305_v55 = vld [vmem:[#allocation12] sm:$0xff]  ;;  %v3311_v0 = vld [vmem:[#allocation12 + $0x50] sm:$0xff] }
 0x1be   :  { %3832 = vst [vmem:[#allocation25_spill] sm:$0xff] %v3305_v55 }
 0x1bf   :  { %3833 = vst [vmem:[#allocation26_spill] sm:$0xff] %v3311_v0 }
 0x1c4   :  { %v1388_v3 = vpop.f32.mrf.mxu1 }
 0x1c5   :  { %v1389_v22 = vadd.f32 %v1388_v3, %v1276_v5  ;;  %v3339_v3 = vld [vmem:[#allocation12 + $0x100] sm:$0xff] }
 0x1cc   :  { %v1319_v52 = vpop.f32.mrf.mxu0  ;;  %v1391_v23 = vpop.f32.mrf.mxu1 }
 0x1cd   :  { %v1320_v57 = vadd.f32 %v1319_v52, %v1297_v56  ;;  %v1392_v13 = vadd.f32 %v1391_v23, %v1276_v5  ;;  %v3299_v52 = vld [vmem:[#allocation12 + $0x18] sm:$0xff]  ;;  %v3342_v5 = vld [vmem:[#allocation12 + $0xe8] sm:$0xff]  ;;  %v3372_v23 = vld [vmem:[#allocation12 + $0x40] sm:$0xff] }
 0x1ce   :  { %3830 = vst [vmem:[#allocation23_spill] sm:$0xff] %v3299_v52  ;;  %1715 = vmatpush.msra.mxu1 %v3299_v52  ;;  %v3307_v56 = vld [vmem:[#allocation12 + $0x178] sm:$0xff] }
 0x1cf   :  { %1741 = vmatpush.msra.mxu0 %v3307_v56  ;;  %3838 = vst [vmem:[#allocation31_spill] sm:$0xff] %v3372_v23 }
 0x1d0   :  { %1716 = vmatpush.msra.mxu1 %v3305_v55 }
 0x1d5   :  { %v1322_v62 = vpop.f32.mrf.mxu0 }
 0x1d6   :  { %v1323_v60 = vadd.f32 %v1322_v62, %v1300_v27  ;;  %v3315_v62 = vld [vmem:[#allocation12 + $0x38] sm:$0xff]  ;;  %v3326_v27 = vld [vmem:[#allocation12 + $0x130] sm:$0xff] }
 0x1d7   :  { %3834 = vst [vmem:[#allocation27_spill] sm:$0xff] %v3315_v62 }
 0x1dd   :  { %v1411_v58 = vpop.f32.mrf.mxu0 }
 0x1de   :  { %v1412_v4 = vadd.f32 %v1411_v58, %v1389_v22  ;;  %v3352_v58 = vld [vmem:[#allocation12 + $0xb8] sm:$0xff]  ;;  %v3362_v22 = vld [vmem:[#allocation12 + $0x70] sm:$0xff] }
 0x1e5   :  { %v1414_v54 = vpop.f32.mrf.mxu0 }
 0x1e6   :  { %v1415_v16 = vadd.f32 %v1414_v54, %v1392_v13 }
 0x1ea   :  { %v1342_v53 = vpop.f32.mrf.mxu3 }
 0x1eb   :  { %v1343_v47 = vadd.f32 %v1342_v53, %v1320_v57  ;;  %v3302_v53 = vld [vmem:[#allocation12 + $0x68] sm:$0xff]  ;;  %v3313_v57 = vld [vmem:[#allocation12 + $0x160] sm:$0xff] }
 0x1ec   :  { %3831 = vst [vmem:[#allocation24_spill] sm:$0xff] %v3302_v53  ;;  %1732 = vmatpush.msrb.mxu2 %v3302_v53  ;;  %1742 = vmatpush.msra.mxu0 %v3313_v57 }
 0x1ee   :  { %1733 = vmatpush.msrb.mxu2 %v3311_v0 }
 0x1f0   :  { %1734 = vmatpush.msrb.mxu2 %v3315_v62 }
 0x1f2   :  { %v1345_v20 = vpop.f32.mrf.mxu3 }
 0x1f3   :  { %v1346_v6 = vadd.f32 %v1345_v20, %v1323_v60  ;;  %v3319_v20 = vld [vmem:[#allocation12 + $0x148] sm:$0xff]  ;;  %v3336_v60 = vld [vmem:[#allocation12 + $0x118] sm:$0xff] }
 0x1f4   :  { %1743 = vmatpush.msra.mxu0 %v3319_v20 }
 0x1f6   :  { %1744 = vmatpush.msra.mxu0 %v3326_v27 }
 0x1f8   :  { %1745 = vmatpush.msra.mxu0 %v3336_v60 }
 0x1fa   :  { %v1434_v49 = vpop.f32.mrf.mxu3  ;;  %1746 = vmatpush.msra.mxu0 %v3339_v3 }
 0x1fb   :  { %v1435_v26 = vadd.f32 %v1434_v49, %v1412_v4 }
 0x1fc   :  { %1747 = vmatpush.msra.mxu0 %v3342_v5 }
 0x200   :  { %v1365_v63 = vpop.f32.mrf.mxu2 }
 0x201   :  { %v1366_v1 = vadd.f32 %v1365_v63, %v1343_v47  ;;  %v2829_v47 = vmov 0.0   ;;  %v3322_v63 = vld [vmem:[#allocation12 + $0x20] sm:$0xff] }
 0x202   :  { %v1437_v28 = vpop.f32.mrf.mxu3  ;;  %3835 = vst [vmem:[#allocation28_spill] sm:$0xff] %v3322_v63  ;;  %1735 = vmatpush.msrb.mxu2 %v3322_v63 }
 0x203   :  { %v1463_v2 = vmax.f32 %v1366_v1, 0.0  ;;  %v1438_v29 = vadd.f32 %v1437_v28, %v1415_v16  ;;  %v1547_v1 = vld [vmem:[#allocation9 + $0x10] sm:$0xff]  ;;  %v3505_v28 = vld [vmem:[#allocation10] sm:$0x7]  ;;  %v3507_v16 = vld [vmem:[#allocation13] sm:$0x7] }
 0x204   :  { %1624 = vmatpush.msrb.mxu3 %v1547_v1 }
 0x205   :  { %1515 = vmatmul.f32.vlgmr.msrb.gmra.mxu1 %v1463_v2  ;;  %v3329_v2 = vld [vmem:[#allocation12 + $0x8] sm:$0xff] }
 0x206   :  { %1843 = vmatpush.msrb.mxu1 %v3235_v10  ;;  %3836 = vst [vmem:[#allocation29_spill] sm:$0xff] %v3329_v2  ;;  %1736 = vmatpush.msrb.mxu2 %v3329_v2 }
 0x208   :  { %v1368_v36 = vpop.f32.mrf.mxu2  ;;  %1844 = vmatpush.msrb.mxu1 %v3237_v31 }
 0x209   :  { %v1369_v7 = vadd.f32 %v1368_v36, %v1346_v6  ;;  %v3346_v6 = vld [vmem:[#allocation12 + $0xd0] sm:$0xff]  ;;  %v3355_v36 = vld [vmem:[#allocation12 + $0xa0] sm:$0xff] }
 0x20a   :  { %1845 = vmatpush.msrb.mxu1 %v3248_v34  ;;  %1748 = vmatpush.msra.mxu0 %v3346_v6 }
 0x20b   :  { %v1465_v9 = vmax.f32 %v1369_v7, 0.0  ;;  %v3358_v7 = vld [vmem:[#allocation12 + $0x88] sm:$0xff] }
 0x20c   :  { %1846 = vmatpush.msrb.mxu1 %v3253_v37  ;;  %1749 = vmatpush.msra.mxu0 %v3352_v58 }
 0x20d   :  { %1518 = vmatmul.f32.gmra.mxu1 %v1465_v9 }
 0x20e   :  { %1847 = vmatpush.msrb.mxu1 %v3258_v14  ;;  %1750 = vmatpush.msra.mxu0 %v3355_v36 }
 0x210   :  { %v1457_v42 = vpop.f32.mrf.mxu2  ;;  %1848 = vmatpush.msrb.mxu1 %v3264_v40  ;;  %1751 = vmatpush.msra.mxu0 %v3358_v7 }
 0x211   :  { %v1458_v11 = vadd.f32 %v1457_v42, %v1435_v26  ;;  %v3367_v26 = vld [vmem:[#allocation12 + $0x58] sm:$0xff]  ;;  %v3376_v42 = vld [vmem:[#allocation12 + $0x28] sm:$0xff] }
 0x212   :  { %1849 = vmatpush.msrb.mxu1 %v3272_v43  ;;  %1752 = vmatpush.msra.mxu0 %v3362_v22  ;;  %3837 = vst [vmem:[#allocation30_spill] sm:$0xff] %v3367_v26 }
 0x213   :  { %v1464_v15 = vmax.f32 %v1458_v11, 0.0  ;;  %3839 = vst [vmem:[#allocation32_spill] sm:$0xff] %v3376_v42  ;;  %v3382_v11 = vld [vmem:[#allocation12 + $0x10] sm:$0xff] }
 0x214   :  { %1850 = vmatpush.msrb.mxu1 %v3278_v44  ;;  %1753 = vmatpush.msra.mxu0 %v3367_v26  ;;  %3840 = vst [vmem:[#allocation33_spill] sm:$0xff] %v3382_v11 }
 0x215   :  { %1538 = vmatmul.f32.vlgmr.msrb.gmra.mxu0 %v1464_v15  ;;  %1717 = vmatmul.f32.vlgmr.msra.gmra.mxu1 %v2829_v47 }
 0x216   :  { %1851 = vmatpush.msrb.mxu1 %v3284_v46  ;;  %1754 = vmatpush.msra.mxu0 %v3372_v23 }
 0x218   :  { %v1460_v17 = vpop.f32.mrf.mxu2  ;;  %1852 = vmatpush.msrb.mxu1 %v3288_v50  ;;  %1755 = vmatpush.msra.mxu0 %v3376_v42 }
 0x219   :  { %v1461_v19 = vadd.f32 %v1460_v17, %v1438_v29  ;;  %v1550_v29 = vperm.slane %v3505_v28, 0  ;;  %v1551_v17 = vperm.slane %v3505_v28, 1 }
 0x21a   :  { %1853 = vmatpush.msrb.mxu1 %v3296_v38  ;;  %1756 = vmatpush.msra.mxu0 %v3382_v11 }
 0x21b   :  { %v1466_v21 = vmax.f32 %v1461_v19, 0.0  ;;  %v3512_v19 = vperm.slane %v3507_v16, 0 }
 0x21c   :  { %1854 = vmatpush.msrb.mxu1 %v3302_v53  ;;  %1948 = vmatpush.msrb.mxu0 %v3224_v59 }
 0x21d   :  { %1541 = vmatmul.f32.gmra.mxu0 %v1466_v21  ;;  %3841 = vst [vmem:[#allocation34_spill] sm:$0xff] %v3512_v19 }
 0x21e   :  { %1855 = vmatpush.msrb.mxu1 %v3311_v0  ;;  %1949 = vmatpush.msrb.mxu0 %v3226_v61 }
 0x220   :  { %1856 = vmatpush.msrb.mxu1 %v3315_v62  ;;  %1950 = vmatpush.msrb.mxu0 %v3230_v25 }
 0x222   :  { %1857 = vmatpush.msrb.mxu1 %v3322_v63  ;;  %1951 = vmatpush.msrb.mxu0 %v3232_v30 }
 0x224   :  { %1858 = vmatpush.msrb.mxu1 %v3329_v2  ;;  %1952 = vmatpush.msrb.mxu0 %v3240_v33 }
 0x225   :  { %1757 = vmatmul.f32.vlgmr.msra.gmra.mxu0 %v2829_v47 }
 0x226   :  { %1988 = vmatpush.msra.mxu1 %v3307_v56  ;;  %1953 = vmatpush.msrb.mxu0 %v3244_v18 }
 0x228   :  { %1989 = vmatpush.msra.mxu1 %v3313_v57  ;;  %1954 = vmatpush.msrb.mxu0 %v3251_v35 }
 0x22a   :  { %1990 = vmatpush.msra.mxu1 %v3319_v20  ;;  %1955 = vmatpush.msrb.mxu0 %v3255_v32 }
 0x22c   :  { %1991 = vmatpush.msra.mxu1 %v3326_v27  ;;  %1956 = vmatpush.msrb.mxu0 %v3261_v39 }
 0x22e   :  { %1992 = vmatpush.msra.mxu1 %v3336_v60  ;;  %1957 = vmatpush.msrb.mxu0 %v3267_v41 }
 0x230   :  { %1993 = vmatpush.msra.mxu1 %v3339_v3  ;;  %1958 = vmatpush.msrb.mxu0 %v3275_v12 }
 0x232   :  { %1994 = vmatpush.msra.mxu1 %v3342_v5  ;;  %1959 = vmatpush.msrb.mxu0 %v3281_v45 }
 0x234   :  { %1995 = vmatpush.msra.mxu1 %v3346_v6  ;;  %1960 = vmatpush.msrb.mxu0 %v3286_v48 }
 0x236   :  { %1996 = vmatpush.msra.mxu1 %v3352_v58  ;;  %1961 = vmatpush.msrb.mxu0 %v3291_v51 }
 0x238   :  { %1997 = vmatpush.msra.mxu1 %v3355_v36  ;;  %1962 = vmatpush.msrb.mxu0 %v3299_v52 }
 0x23a   :  { %1998 = vmatpush.msra.mxu1 %v3358_v7  ;;  %1963 = vmatpush.msrb.mxu0 %v3305_v55 }
 0x23c   :  { %1999 = vmatpush.msra.mxu1 %v3362_v22  ;;  %2084 = vmatpush.msra.mxu0 %v3235_v10 }
 0x23e   :  { %2000 = vmatpush.msra.mxu1 %v3367_v26  ;;  %2085 = vmatpush.msra.mxu0 %v3237_v31 }
 0x240   :  { %2001 = vmatpush.msra.mxu1 %v3372_v23  ;;  %2086 = vmatpush.msra.mxu0 %v3248_v34 }
 0x242   :  { %2002 = vmatpush.msra.mxu1 %v3376_v42  ;;  %2087 = vmatpush.msra.mxu0 %v3253_v37 }
 0x244   :  { %2003 = vmatpush.msra.mxu1 %v3382_v11  ;;  %2088 = vmatpush.msra.mxu0 %v3258_v14 }
 0x246   :  { %2089 = vmatpush.msra.mxu0 %v3264_v40 }
 0x248   :  { %2090 = vmatpush.msra.mxu0 %v3272_v43 }
 0x24a   :  { %2091 = vmatpush.msra.mxu0 %v3278_v44 }
 0x24c   :  { %2092 = vmatpush.msra.mxu0 %v3284_v46 }
 0x24e   :  { %2093 = vmatpush.msra.mxu0 %v3288_v50 }
 0x250   :  { %2094 = vmatpush.msra.mxu0 %v3296_v38 }
 0x252   :  { %2095 = vmatpush.msra.mxu0 %v3302_v53 }
 0x254   :  { %2096 = vmatpush.msra.mxu0 %v3311_v0 }
 0x256   :  { %2097 = vmatpush.msra.mxu0 %v3315_v62 }
 0x258   :  { %2098 = vmatpush.msra.mxu0 %v3322_v63 }
 0x25a   :  { %2099 = vmatpush.msra.mxu0 %v3329_v2 }
 0x282   :  { %v1516_v49 = vpop.f32.mrf.mxu1 }
 0x28a   :  { %v1519_v54 = vpop.f32.mrf.mxu1 }
 0x292   :  { %v1539_v9 = vpop.f32.mrf.mxu0  ;;  %v1718_v21 = vpop.f32.mrf.mxu1 }
 0x293   :  { %v1540_v4 = vadd.f32 %v1539_v9, %v1516_v49  ;;  %v1719_v49 = vadd.f32 %v1718_v21, %v3512_v19 }
 0x295   :  { %2484 = vmatmul.msk.f32.vlgmr.msra.gmra.mxu3 %vm1556_vm2, %v1540_v4  ;;  %2486 = vmatmul.msk.f32.vlgmr.msra.gmra.mxu2 %vm1556_vm2, %v1540_v4 }
 0x296   :  { %1823 = vmatpush.msra.mxu3 %v3224_v59  ;;  %1863 = vmatpush.msra.mxu2 %v3307_v56 }
 0x298   :  { %1824 = vmatpush.msra.mxu3 %v3226_v61  ;;  %1864 = vmatpush.msra.mxu2 %v3313_v57 }
 0x29a   :  { %v1542_v13 = vpop.f32.mrf.mxu0  ;;  %1825 = vmatpush.msra.mxu3 %v3230_v25  ;;  %1865 = vmatpush.msra.mxu2 %v3319_v20 }
 0x29b   :  { %v1543_v15 = vadd.f32 %v1542_v13, %v1519_v54 }
 0x29c   :  { %1826 = vmatpush.msra.mxu3 %v3232_v30  ;;  %1866 = vmatpush.msra.mxu2 %v3326_v27 }
 0x29d   :  { %2485 = vmatmul.msk.f32.gmra.mxu3 %vm1556_vm2, %v1543_v15  ;;  %2487 = vmatmul.msk.f32.gmra.mxu2 %vm1556_vm2, %v1543_v15 }
 0x29e   :  { %1827 = vmatpush.msra.mxu3 %v3240_v33  ;;  %1867 = vmatpush.msra.mxu2 %v3336_v60 }
 0x2a0   :  { %1828 = vmatpush.msra.mxu3 %v3244_v18  ;;  %1868 = vmatpush.msra.mxu2 %v3339_v3 }
 0x2a2   :  { %1829 = vmatpush.msra.mxu3 %v3251_v35  ;;  %1869 = vmatpush.msra.mxu2 %v3342_v5 }
 0x2a4   :  { %1830 = vmatpush.msra.mxu3 %v3255_v32  ;;  %1870 = vmatpush.msra.mxu2 %v3346_v6 }
 0x2a5   :  { %2488 = vmatmul.msk.f32.vlgmr.msrb.gmra.mxu3 %vm1556_vm2, %v1540_v4  ;;  %1737 = vmatmul.f32.vlgmr.msrb.gmra.mxu2 %v2829_v47 }
 0x2a6   :  { %1831 = vmatpush.msra.mxu3 %v3261_v39  ;;  %1871 = vmatpush.msra.mxu2 %v3352_v58 }
 0x2a8   :  { %1832 = vmatpush.msra.mxu3 %v3267_v41  ;;  %1872 = vmatpush.msra.mxu2 %v3355_v36 }
 0x2aa   :  { %1833 = vmatpush.msra.mxu3 %v3275_v12  ;;  %1873 = vmatpush.msra.mxu2 %v3358_v7 }
 0x2ac   :  { %1834 = vmatpush.msra.mxu3 %v3281_v45  ;;  %1874 = vmatpush.msra.mxu2 %v3362_v22 }
 0x2ad   :  { %2489 = vmatmul.msk.f32.gmra.mxu3 %vm1556_vm2, %v1543_v15 }
 0x2ae   :  { %1835 = vmatpush.msra.mxu3 %v3286_v48  ;;  %1875 = vmatpush.msra.mxu2 %v3367_v26 }
 0x2b0   :  { %1836 = vmatpush.msra.mxu3 %v3291_v51  ;;  %1876 = vmatpush.msra.mxu2 %v3372_v23 }
 0x2b2   :  { %1837 = vmatpush.msra.mxu3 %v3299_v52  ;;  %1877 = vmatpush.msra.mxu2 %v3376_v42 }
 0x2b4   :  { %1838 = vmatpush.msra.mxu3 %v3305_v55  ;;  %1878 = vmatpush.msra.mxu2 %v3382_v11 }
 0x2b6   :  { %1968 = vmatpush.msrb.mxu3 %v3235_v10  ;;  %2064 = vmatpush.msrb.mxu2 %v3224_v59 }
 0x2b8   :  { %1969 = vmatpush.msrb.mxu3 %v3237_v31  ;;  %2065 = vmatpush.msrb.mxu2 %v3226_v61 }
 0x2ba   :  { %1970 = vmatpush.msrb.mxu3 %v3248_v34  ;;  %2066 = vmatpush.msrb.mxu2 %v3230_v25 }
 0x2bc   :  { %1971 = vmatpush.msrb.mxu3 %v3253_v37  ;;  %2067 = vmatpush.msrb.mxu2 %v3232_v30 }
 0x2be   :  { %1972 = vmatpush.msrb.mxu3 %v3258_v14  ;;  %2068 = vmatpush.msrb.mxu2 %v3240_v33 }
 0x2c0   :  { %1973 = vmatpush.msrb.mxu3 %v3264_v40  ;;  %2069 = vmatpush.msrb.mxu2 %v3244_v18 }
 0x2c2   :  { %1974 = vmatpush.msrb.mxu3 %v3272_v43  ;;  %2070 = vmatpush.msrb.mxu2 %v3251_v35 }
 0x2c4   :  { %1975 = vmatpush.msrb.mxu3 %v3278_v44  ;;  %2071 = vmatpush.msrb.mxu2 %v3255_v32 }
 0x2c6   :  { %1976 = vmatpush.msrb.mxu3 %v3284_v46  ;;  %2072 = vmatpush.msrb.mxu2 %v3261_v39 }
 0x2c8   :  { %1977 = vmatpush.msrb.mxu3 %v3288_v50  ;;  %2073 = vmatpush.msrb.mxu2 %v3267_v41 }
 0x2ca   :  { %1978 = vmatpush.msrb.mxu3 %v3296_v38  ;;  %2074 = vmatpush.msrb.mxu2 %v3275_v12 }
 0x2cc   :  { %1979 = vmatpush.msrb.mxu3 %v3302_v53  ;;  %2075 = vmatpush.msrb.mxu2 %v3281_v45 }
 0x2ce   :  { %1980 = vmatpush.msrb.mxu3 %v3311_v0  ;;  %2076 = vmatpush.msrb.mxu2 %v3286_v48 }
 0x2d0   :  { %1981 = vmatpush.msrb.mxu3 %v3315_v62  ;;  %2077 = vmatpush.msrb.mxu2 %v3291_v51 }
 0x2d2   :  { %1982 = vmatpush.msrb.mxu3 %v3322_v63  ;;  %2078 = vmatpush.msrb.mxu2 %v3299_v52 }
 0x2d4   :  { %1983 = vmatpush.msrb.mxu3 %v3329_v2  ;;  %2079 = vmatpush.msrb.mxu2 %v3305_v55 }
 0x318   :  { %v1580_v24 = vpop.f32.mrf.mxu3  ;;  %v1603_v8 = vpop.f32.mrf.mxu2 }
 0x319   :  { %v1581_v47 = vadd.f32 %v1580_v24, %v1550_v29  ;;  %v1604_v1 = vadd.f32 %v1603_v8, %v1551_v17 }
 0x31b   :  { %v1684_v9 = vrot.slane %v1581_v47, 5  ;;  %v1809_v4 = vrot.slane %v1604_v1, 1  ;;  %v1815_v54 = vrot.slane %v1604_v1, 6  ;;  %v1808_v13 = vrot.slane %v1581_v47, 1 }
 0x31c   :  { %v1814_v15 = vrot.slane %v1581_v47, 6  ;;  %v1685_v42 = vrot.slane %v1604_v1, 5  ;;  %v1930_v62 = vrot.slane %v1581_v47, 2  ;;  %v2056_v51 = vrot.slane %v1604_v1, 3 }
 0x31d   :  { %v1691_v2 = vsel %vm1690_vm3, %v1581_v47, %v1684_v9  ;;  %v3517_v55 = vsel %vm1690_vm3, %v1809_v4, %v1815_v54  ;;  %v2055_v23 = vrot.slane %v1581_v47, 3  ;;  %v1931_v0 = vrot.slane %v1604_v1, 2 }
 0x31e   :  { %v1761_v11 = vadd.f32 %v1719_v49, %v1691_v2  ;;  %v3520_v63 = vsel %vm1690_vm3, %v1808_v13, %v1814_v15  ;;  %v2171_v48 = vrot.slane %v1581_v47, 4  ;;  %v2172_v26 = vrot.slane %v1604_v1, 4 }
 0x320   :  { %v2490_v52 = vmul.f32 -1.442695, %v1761_v11  ;;  %v1583_v24 = vpop.f32.mrf.mxu3  ;;  %v1606_v8 = vpop.f32.mrf.mxu2 }
 0x321   :  { %v1584_v21 = vadd.f32 %v1583_v24, %v1550_v29  ;;  %v1607_v19 = vadd.f32 %v1606_v8, %v1551_v17  ;;  %v1552_v29 = vperm.slane %v3505_v28, 2  ;;  %v3530_v17 = vperm.slane %v3507_v16, 1 }
 0x322   :  { %2519 = vpow2.f32 %v2490_v52 }
 0x323   :  { %v1939_v53 = vrot.slane %v1584_v21, 7  ;;  %v1940_v4 = vrot.slane %v1607_v19, 7  ;;  %v3523_v2 = vsel %vm1690_vm3, %v2056_v51, %v1607_v19  ;;  %v3526_v49 = vsel %vm1690_vm3, %v2055_v23, %v1584_v21  ;;  %3844 = vst [vmem:[#allocation37_spill] sm:$0xff] %v3530_v17 }
 0x324   :  { %3842 = vst [vmem:[#allocation35_spill] sm:$0xff] %v3523_v2  ;;  %v2177_v11 = vrot.slane %v1584_v21, 1  ;;  %v2178_v54 = vrot.slane %v1607_v19, 1  ;;  %v2294_v13 = vrot.slane %v1607_v19, 2  ;;  %v2293_v15 = vrot.slane %v1584_v21, 2 }
 0x325   :  { %3843 = vst [vmem:[#allocation36_spill] sm:$0xff] %v3526_v49  ;;  %v3533_v52 = vsel %vm1690_vm3, %v1930_v62, %v1939_v53  ;;  %v3536_v47 = vsel %vm1690_vm3, %v1931_v0, %v1940_v4  ;;  %v1692_v4 = vsel %vm1690_vm3, %v1604_v1, %v1685_v42 }
 0x326   :  { %3845 = vst [vmem:[#allocation38_spill] sm:$0xff] %v3533_v52  ;;  %v3539_v51 = vsel %vm1690_vm3, %v2171_v48, %v2177_v11  ;;  %v3542_v23 = vsel %vm1690_vm3, %v2172_v26, %v2178_v54  ;;  %v3545_v19 = vsel %vm1690_vm3, %v1685_v42, %v2294_v13  ;;  %v3548_v28 = vsel %vm1690_vm3, %v1684_v9, %v2293_v15 }
 0x327   :  { %3846 = vst [vmem:[#allocation39_spill] sm:$0xff] %v3536_v47 }
 0x328   :  { %3847 = vst [vmem:[#allocation40_spill] sm:$0xff] %v3539_v51  ;;  %v2520_v24 = vpop.eup %2519  ;;  %v1626_v8 = vpop.f32.mrf.mxu3 }
 0x329   :  { %3848 = vst [vmem:[#allocation41_spill] sm:$0xff] %v3542_v23  ;;  %v1738_v21 = vpop.f32.mrf.mxu2  ;;  %v1765_v53 = vadd.f32 1.0, %v2520_v24  ;;  %v1627_v62 = vadd.f32 %v1626_v8, %v1552_v29 }
 0x32a   :  { %3849 = vst [vmem:[#allocation42_spill] sm:$0xff] %v3545_v19  ;;  %v1739_v0 = vadd.f32 %v1738_v21, %v3530_v17 }
 0x32b   :  { %3850 = vst [vmem:[#allocation43_spill] sm:$0xff] %v3548_v28  ;;  %2521 = vrcp.f32 %v1765_v53  ;;  %v1810_v11 = vrot.slane %v1627_v62, 1  ;;  %v1816_v26 = vrot.slane %v1627_v62, 6  ;;  %v2057_v19 = vrot.slane %v1627_v62, 3 }
 0x32c   :  { %v1781_v48 = vadd.f32 %v1739_v0, %v1692_v4  ;;  %v1686_v23 = vrot.slane %v1627_v62, 5  ;;  %v1932_v8 = vrot.slane %v1627_v62, 2  ;;  %v2173_v51 = vrot.slane %v1627_v62, 4 }
 0x32d   :  { %v3553_v13 = vsel %vm1690_vm3, %v1810_v11, %v1816_v26  ;;  %v3559_v0 = vperm.slane %v3507_v16, 2  ;;  %v1758_v11 = vpop.f32.mrf.mxu0  ;;  %v1777_v26 = vand.u32 2147483648, %v1765_v53  ;;  %vm1771_vm5 = vweird.f32 %v1765_v53 }
 0x32e   :  { %v2491_v54 = vmul.f32 -1.442695, %v1781_v48 }
 0x32f   :  { %v1759_v16 = vadd.f32 %v1758_v11, %v3559_v0 }
 0x330   :  { %2523 = vpow2.f32 %v2491_v54  ;;  %v1629_v9 = vpop.f32.mrf.mxu3 }
 0x331   :  { %v2522_v15 = vpop.eup %2521  ;;  %v1630_v28 = vadd.f32 %v1629_v9, %v1552_v29 }
 0x332   :  { %v1767_v24 = vmul.f32 %v2522_v15, %v1765_v53  ;;  %vm1772_vm4 = vweird.f32 %v2522_v15 }
 0x333   :  { %v1941_v21 = vrot.slane %v1630_v28, 7  ;;  %v2179_v49 = vrot.slane %v1630_v28, 1  ;;  %v2295_v42 = vrot.slane %v1630_v28, 2  ;;  %v3556_v1 = vsel %vm1690_vm3, %v2057_v19, %v1630_v28  ;;  %vm1773_vm6 = vmor %vm1771_vm5, %vm1772_vm4 }
 0x334   :  { %3851 = vst [vmem:[#allocation44_spill] sm:$0xff] %v3556_v1  ;;  %v1768_v4 = vsub.f32 1.0, %v1767_v24  ;;  %v1775_v19 = vand.u32 2147483647, %v1765_v53  ;;  %v1778_v24 = vor.u32 1.1754944e-38, %v1777_v26 }
 0x335   :  { %v3562_v29 = vsel %vm1690_vm3, %v1932_v8, %v1941_v21  ;;  %v3565_v54 = vsel %vm1690_vm3, %v2173_v51, %v2179_v49  ;;  %v3568_v9 = vsel %vm1690_vm3, %v1686_v23, %v2295_v42  ;;  %v1693_v42 = vsel %vm1690_vm3, %v1627_v62, %v1686_v23  ;;  %v3857_v23 = vld [vmem:[#allocation21_spill] sm:$0xff]  ;;  %v3858_v62 = vld [vmem:[#allocation26_spill] sm:$0xff] }
 0x336   :  { %v2524_v48 = vpop.eup %2523  ;;  %3852 = vst [vmem:[#allocation45_spill] sm:$0xff] %v3562_v29  ;;  %v1769_v47 = vmul.f32 %v2522_v15, %v1768_v4  ;;  %vm1776_vm7 = vcmp.eq.f32.partialorder %v1775_v19, 8.507059e+37 }
 0x337   :  { %3853 = vst [vmem:[#allocation46_spill] sm:$0xff] %v3565_v54  ;;  %v1785_v2 = vadd.f32 1.0, %v2524_v48 }
 0x338   :  { %3854 = vst [vmem:[#allocation47_spill] sm:$0xff] %v3568_v9  ;;  %v1770_v28 = vadd.f32 %v2522_v15, %v1769_v47 }
 0x339   :  { %2525 = vrcp.f32 %v1785_v2  ;;  %v1797_v4 = vand.u32 2147483648, %v1785_v2  ;;  %v1795_v29 = vand.u32 2147483647, %v1785_v2  ;;  %vm1791_vm9 = vweird.f32 %v1785_v2 }
 0x33a   :  { %v1774_v1 = vsel %vm1773_vm6, %v2522_v15, %v1770_v28 }
 0x33b   :  { %v1779_v8 = vsel %vm1776_vm7, %v1778_v24, %v1774_v1  ;;  %v1798_v53 = vor.u32 1.1754944e-38, %v1797_v4  ;;  %vm1796_vm11 = vcmp.eq.f32.partialorder %v1795_v29, 8.507059e+37  ;;  %v3859_v29 = vld [vmem:[#allocation31_spill] sm:$0xff]  ;;  %v3862_v24 = vld [vmem:[#allocation32_spill] sm:$0xff] }
 0x33c   :  { %v1801_v21 = vmul.f32 %v1779_v8, %v1759_v16  ;;  %v3863_v8 = vld [vmem:[#allocation23_spill] sm:$0xff] }
 0x33e   :  { %v1802_v9 = vadd.f32 %v1801_v21, %v1693_v42  ;;  %v3864_v21 = vld [vmem:[#allocation28_spill] sm:$0xff]  ;;  %v3867_v42 = vld [vmem:[#allocation29_spill] sm:$0xff] }
 0x33f   :  { %v2526_v49 = vpop.eup %2525 }
 0x340   :  { %v1787_v51 = vmul.f32 %v2526_v49, %v1785_v2  ;;  %vm1792_vm8 = vweird.f32 %v2526_v49  ;;  %2527 = vtanh.f32 %v1802_v9  ;;  %v3856_v2 = vld [vmem:[#allocation30_spill] sm:$0xff]  ;;  %v3861_v9 = vld [vmem:[#allocation27_spill] sm:$0xff] }
 0x341   :  { %vm1793_vm10 = vmor %vm1791_vm9, %vm1792_vm8 }
 0x342   :  { %v1788_v48 = vsub.f32 1.0, %v1787_v51  ;;  %v3866_v51 = vld [vmem:[#allocation25_spill] sm:$0xff] }
 0x344   :  { %v1789_v54 = vmul.f32 %v2526_v49, %v1788_v48 }
 0x346   :  { %v1790_v47 = vadd.f32 %v2526_v49, %v1789_v54  ;;  %v2528_v26 = vpop.eup %2527  ;;  %v3860_v54 = vld [vmem:[#allocation22_spill] sm:$0xff] }
 0x348   :  { %v1794_v11 = vsel %vm1793_vm10, %v2526_v49, %v1790_v47  ;;  %v3865_v49 = vld [vmem:[#allocation33_spill] sm:$0xff] }
 0x349   :  { %v1799_v15 = vsel %vm1796_vm11, %v1798_v53, %v1794_v11 }
 0x34a   :  { %v1804_v1 = vsub.f32 1.0, %v1799_v15  ;;  %v1806_v16 = vmul.f32 0.0, %v1799_v15  ;;  %v3868_v15 = vld [vmem:[#allocation34_spill] sm:$0xff] }
 0x34c   :  { %v1805_v19 = vmul.f32 %v2528_v26, %v1804_v1 }
 0x34e   :  { %v3572_v28 = vadd.f32 %v1806_v16, %v1805_v19 }
 0x350   :  { %1839 = vmatmul.f32.vlgmr.msra.gmra.mxu3 %v3572_v28  ;;  %1859 = vmatmul.f32.vlgmr.msrb.gmra.mxu1 %v3572_v28 }
 0x351   :  { %1879 = vmatmul.f32.vlgmr.msra.gmra.mxu2 %v3572_v28  ;;  %2104 = vmatpush.msra.mxu3 %v3307_v56 }
 0x352   :  { %2186 = vmatpush.msrb.mxu1 %v3224_v59  ;;  %2206 = vmatpush.msra.mxu2 %v3235_v10 }
 0x353   :  { %2105 = vmatpush.msra.mxu3 %v3313_v57 }
 0x354   :  { %2187 = vmatpush.msrb.mxu1 %v3226_v61  ;;  %2207 = vmatpush.msra.mxu2 %v3237_v31  ;;  %v3855_v61 = vld [vmem:[#allocation24_spill] sm:$0xff] }
 0x355   :  { %2106 = vmatpush.msra.mxu3 %v3319_v20 }
 0x356   :  { %2188 = vmatpush.msrb.mxu1 %v3230_v25  ;;  %2208 = vmatpush.msra.mxu2 %v3248_v34 }
 0x357   :  { %2107 = vmatpush.msra.mxu3 %v3326_v27 }
 0x358   :  { %2189 = vmatpush.msrb.mxu1 %v3232_v30  ;;  %2209 = vmatpush.msra.mxu2 %v3253_v37 }
 0x359   :  { %2108 = vmatpush.msra.mxu3 %v3336_v60 }
 0x35a   :  { %2190 = vmatpush.msrb.mxu1 %v3240_v33  ;;  %2210 = vmatpush.msra.mxu2 %v3258_v14 }
 0x35b   :  { %2109 = vmatpush.msra.mxu3 %v3339_v3 }
 0x35c   :  { %2191 = vmatpush.msrb.mxu1 %v3244_v18  ;;  %2211 = vmatpush.msra.mxu2 %v3264_v40 }
 0x35d   :  { %2110 = vmatpush.msra.mxu3 %v3342_v5 }
 0x35e   :  { %2192 = vmatpush.msrb.mxu1 %v3251_v35  ;;  %2212 = vmatpush.msra.mxu2 %v3272_v43 }
 0x35f   :  { %2111 = vmatpush.msra.mxu3 %v3346_v6 }
 0x360   :  { %2193 = vmatpush.msrb.mxu1 %v3255_v32  ;;  %2213 = vmatpush.msra.mxu2 %v3278_v44 }
 0x361   :  { %2112 = vmatpush.msra.mxu3 %v3352_v58 }
 0x362   :  { %2194 = vmatpush.msrb.mxu1 %v3261_v39  ;;  %2214 = vmatpush.msra.mxu2 %v3284_v46 }
 0x363   :  { %2113 = vmatpush.msra.mxu3 %v3355_v36 }
 0x364   :  { %2195 = vmatpush.msrb.mxu1 %v3267_v41  ;;  %2215 = vmatpush.msra.mxu2 %v3288_v50 }
 0x365   :  { %2114 = vmatpush.msra.mxu3 %v3358_v7 }
 0x366   :  { %2196 = vmatpush.msrb.mxu1 %v3275_v12  ;;  %2216 = vmatpush.msra.mxu2 %v3296_v38 }
 0x367   :  { %2115 = vmatpush.msra.mxu3 %v3362_v22 }
 0x368   :  { %2197 = vmatpush.msrb.mxu1 %v3281_v45  ;;  %2217 = vmatpush.msra.mxu2 %v3855_v61 }
 0x369   :  { %2116 = vmatpush.msra.mxu3 %v3856_v2 }
 0x36a   :  { %2198 = vmatpush.msrb.mxu1 %v3857_v23  ;;  %2218 = vmatpush.msra.mxu2 %v3858_v62 }
 0x36b   :  { %2117 = vmatpush.msra.mxu3 %v3859_v29 }
 0x36c   :  { %2199 = vmatpush.msrb.mxu1 %v3860_v54  ;;  %2219 = vmatpush.msra.mxu2 %v3861_v9 }
 0x36d   :  { %2118 = vmatpush.msra.mxu3 %v3862_v24 }
 0x36e   :  { %2200 = vmatpush.msrb.mxu1 %v3863_v8  ;;  %2220 = vmatpush.msra.mxu2 %v3864_v21 }
 0x36f   :  { %2119 = vmatpush.msra.mxu3 %v3865_v49 }
 0x370   :  { %2201 = vmatpush.msrb.mxu1 %v3866_v51  ;;  %2221 = vmatpush.msra.mxu2 %v3867_v42 }
 0x3cd   :  { %v1860_v48 = vpop.f32.mrf.mxu1 }
 0x3ce   :  { %v1861_v4 = vadd.f32 %v1860_v48, %v3530_v17 }
 0x3d0   :  { %v1903_v47 = vadd.f32 %v1861_v4, %v3517_v55 }
 0x3d2   :  { %v2493_v53 = vmul.f32 -1.442695, %v1903_v47 }
 0x3d3   :  { %v1840_v11 = vpop.f32.mrf.mxu3 }
 0x3d4   :  { %2529 = vpow2.f32 %v2493_v53  ;;  %v1841_v1 = vadd.f32 %v1840_v11, %v3868_v15  ;;  %v1880_v15 = vpop.f32.mrf.mxu2 }
 0x3d6   :  { %v1883_v26 = vadd.f32 %v1841_v1, %v3520_v63 }
 0x3d8   :  { %v2492_v19 = vmul.f32 -1.442695, %v1883_v26 }
 0x3da   :  { %v2530_v16 = vpop.eup %2529  ;;  %2531 = vpow2.f32 %v2492_v19  ;;  %v1881_v19 = vadd.f32 %v1880_v15, %v3559_v0 }
 0x3db   :  { %v1907_v52 = vadd.f32 1.0, %v2530_v16 }
 0x3dd   :  { %2533 = vrcp.f32 %v1907_v52  ;;  %vm1913_vm1 = vweird.f32 %v1907_v52 }
 0x3e0   :  { %v2532_v51 = vpop.eup %2531 }
 0x3e1   :  { %v1887_v49 = vadd.f32 1.0, %v2532_v51 }
 0x3e3   :  { %2535 = vrcp.f32 %v1887_v49  ;;  %v2534_v42 = vpop.eup %2533  ;;  %v1899_v47 = vand.u32 2147483648, %v1887_v49  ;;  %v1897_v11 = vand.u32 2147483647, %v1887_v49  ;;  %vm1893_vm13 = vweird.f32 %v1887_v49 }
 0x3e4   :  { %v1909_v21 = vmul.f32 %v2534_v42, %v1907_v52  ;;  %vm1914_vm0 = vweird.f32 %v2534_v42 }
 0x3e5   :  { %v1900_v26 = vor.u32 1.1754944e-38, %v1899_v47  ;;  %vm1898_vm15 = vcmp.eq.f32.partialorder %v1897_v11, 8.507059e+37  ;;  %vm1915_vm2 = vmor %vm1913_vm1, %vm1914_vm0 }
 0x3e6   :  { %v1910_v55 = vsub.f32 1.0, %v1909_v21  ;;  %v1919_v21 = vand.u32 2147483648, %v1907_v52 }
 0x3e8   :  { %v1911_v63 = vmul.f32 %v2534_v42, %v1910_v55  ;;  %v1920_v55 = vor.u32 1.1754944e-38, %v1919_v21 }
 0x3e9   :  { %v2536_v48 = vpop.eup %2535 }
 0x3ea   :  { %v1889_v17 = vmul.f32 %v2536_v48, %v1887_v49  ;;  %vm1894_vm12 = vweird.f32 %v2536_v48  ;;  %v1912_v8 = vadd.f32 %v2534_v42, %v1911_v63 }
 0x3eb   :  { %vm1895_vm14 = vmor %vm1893_vm13, %vm1894_vm12 }
 0x3ec   :  { %v1890_v4 = vsub.f32 1.0, %v1889_v17  ;;  %v1917_v17 = vand.u32 2147483647, %v1907_v52  ;;  %v1916_v9 = vsel %vm1915_vm2, %v2534_v42, %v1912_v8  ;;  %v2584_v52 = vld [vmem:[#allocation12 + $0x150] sm:$0xff] }
 0x3ee   :  { %v1891_v53 = vmul.f32 %v2536_v48, %v1890_v4  ;;  %vm1918_vm3 = vcmp.eq.f32.partialorder %v1917_v17, 8.507059e+37  ;;  %v3880_v17 = vld [vmem:[#allocation45_spill] sm:$0xff] }
 0x3ef   :  { %v1921_v49 = vsel %vm1918_vm3, %v1920_v55, %v1916_v9 }
 0x3f0   :  { %v1892_v1 = vadd.f32 %v2536_v48, %v1891_v53  ;;  %v1926_v47 = vsub.f32 1.0, %v1921_v49 }
 0x3f2   :  { %v1896_v51 = vsel %vm1895_vm14, %v2536_v48, %v1892_v1  ;;  %v1928_v48 = vmul.f32 %v1921_v49, %v3572_v28 }
 0x3f3   :  { %v1901_v16 = vsel %vm1898_vm15, %v1900_v26, %v1896_v51 }
 0x3f4   :  { %v1923_v24 = vmul.f32 %v1901_v16, %v1881_v19 }
 0x3f6   :  { %v1924_v4 = vadd.f32 %v1923_v24, %v3553_v13 }
 0x3f8   :  { %2537 = vtanh.f32 %v1924_v4 }
 0x3fe   :  { %v2538_v53 = vpop.eup %2537 }
 0x3ff   :  { %v1927_v15 = vmul.f32 %v2538_v53, %v1926_v47 }
 0x401   :  { %v3632_v11 = vadd.f32 %v1928_v48, %v1927_v15 }
 0x403   :  { %1964 = vmatmul.f32.vlgmr.msrb.gmra.mxu0 %v3632_v11  ;;  %1984 = vmatmul.f32.vlgmr.msrb.gmra.mxu3 %v3632_v11 }
 0x404   :  { %2004 = vmatmul.f32.vlgmr.msra.gmra.mxu1 %v3632_v11  ;;  %2226 = vmatpush.msrb.mxu0 %v3307_v56 }
 0x405   :  { %2302 = vmatpush.msrb.mxu3 %v3224_v59  ;;  %2322 = vmatpush.msra.mxu1 %v3235_v10  ;;  %v3869_v59 = vld [vmem:[#allocation27_spill] sm:$0xff]  ;;  %v3872_v10 = vld [vmem:[#allocation28_spill] sm:$0xff] }
 0x406   :  { %2227 = vmatpush.msrb.mxu0 %v3313_v57 }
 0x407   :  { %2303 = vmatpush.msrb.mxu3 %v2584_v52  ;;  %2323 = vmatpush.msra.mxu1 %v3237_v31  ;;  %v3873_v31 = vld [vmem:[#allocation33_spill] sm:$0xff] }
 0x408   :  { %2228 = vmatpush.msrb.mxu0 %v3319_v20 }
 0x409   :  { %2304 = vmatpush.msrb.mxu3 %v3230_v25  ;;  %2324 = vmatpush.msra.mxu1 %v3248_v34  ;;  %v3870_v25 = vld [vmem:[#allocation32_spill] sm:$0xff] }
 0x40a   :  { %2229 = vmatpush.msrb.mxu0 %v3326_v27 }
 0x40b   :  { %2305 = vmatpush.msrb.mxu3 %v3232_v30  ;;  %2325 = vmatpush.msra.mxu1 %v3253_v37  ;;  %v3871_v30 = vld [vmem:[#allocation23_spill] sm:$0xff] }
 0x40c   :  { %2230 = vmatpush.msrb.mxu0 %v3336_v60 }
 0x40d   :  { %2306 = vmatpush.msrb.mxu3 %v3240_v33  ;;  %2326 = vmatpush.msra.mxu1 %v3258_v14  ;;  %v3874_v33 = vld [vmem:[#allocation25_spill] sm:$0xff] }
 0x40e   :  { %2231 = vmatpush.msrb.mxu0 %v3339_v3 }
 0x40f   :  { %2307 = vmatpush.msrb.mxu3 %v3244_v18  ;;  %2327 = vmatpush.msra.mxu1 %v3264_v40  ;;  %v3875_v18 = vld [vmem:[#allocation29_spill] sm:$0xff] }
 0x410   :  { %2232 = vmatpush.msrb.mxu0 %v3342_v5 }
 0x411   :  { %2308 = vmatpush.msrb.mxu3 %v3251_v35  ;;  %2328 = vmatpush.msra.mxu1 %v3272_v43  ;;  %v3876_v35 = vld [vmem:[#allocation34_spill] sm:$0xff] }
 0x412   :  { %2233 = vmatpush.msrb.mxu0 %v3346_v6 }
 0x413   :  { %2309 = vmatpush.msrb.mxu3 %v3255_v32  ;;  %2329 = vmatpush.msra.mxu1 %v3278_v44  ;;  %v3877_v32 = vld [vmem:[#allocation38_spill] sm:$0xff] }
 0x414   :  { %2234 = vmatpush.msrb.mxu0 %v3352_v58 }
 0x415   :  { %2310 = vmatpush.msrb.mxu3 %v3261_v39  ;;  %2330 = vmatpush.msra.mxu1 %v3284_v46 }
 0x416   :  { %2235 = vmatpush.msrb.mxu0 %v3355_v36 }
 0x417   :  { %2311 = vmatpush.msrb.mxu3 %v3267_v41  ;;  %2331 = vmatpush.msra.mxu1 %v3288_v50  ;;  %v3878_v41 = vld [vmem:[#allocation37_spill] sm:$0xff] }
 0x418   :  { %2236 = vmatpush.msrb.mxu0 %v3358_v7 }
 0x419   :  { %2312 = vmatpush.msrb.mxu3 %v3275_v12  ;;  %2332 = vmatpush.msra.mxu1 %v3296_v38  ;;  %v3879_v12 = vld [vmem:[#allocation39_spill] sm:$0xff] }
 0x41a   :  { %2237 = vmatpush.msrb.mxu0 %v3362_v22 }
 0x41b   :  { %2313 = vmatpush.msrb.mxu3 %v3281_v45  ;;  %2333 = vmatpush.msra.mxu1 %v3855_v61 }
 0x41c   :  { %2238 = vmatpush.msrb.mxu0 %v3856_v2 }
 0x41d   :  { %2314 = vmatpush.msrb.mxu3 %v3857_v23  ;;  %2334 = vmatpush.msra.mxu1 %v3858_v62 }
 0x41e   :  { %2239 = vmatpush.msrb.mxu0 %v3859_v29 }
 0x41f   :  { %2315 = vmatpush.msrb.mxu3 %v3860_v54  ;;  %2335 = vmatpush.msra.mxu1 %v3869_v59 }
 0x420   :  { %2240 = vmatpush.msrb.mxu0 %v3870_v25 }
 0x421   :  { %2316 = vmatpush.msrb.mxu3 %v3871_v30  ;;  %2336 = vmatpush.msra.mxu1 %v3872_v10  ;;  %v2585_v10 = vld [vmem:[#allocation12 + $0x178] sm:$0xff] }
 0x422   :  { %2241 = vmatpush.msrb.mxu0 %v3873_v31 }
 0x423   :  { %2317 = vmatpush.msrb.mxu3 %v3874_v33  ;;  %2337 = vmatpush.msra.mxu1 %v3875_v18  ;;  %v2586_v33 = vld [vmem:[#allocation12 + $0x160] sm:$0xff]  ;;  %v2587_v18 = vld [vmem:[#allocation12 + $0x148] sm:$0xff] }
 0x480   :  { %v1965_v34 = vpop.f32.mrf.mxu0 }
 0x481   :  { %v1966_v37 = vadd.f32 %v1965_v34, %v3876_v35  ;;  %v2005_v54 = vpop.f32.mrf.mxu1 }
 0x482   :  { %v2006_v42 = vadd.f32 %v2005_v54, %v3559_v0 }
 0x483   :  { %v2008_v14 = vadd.f32 %v1966_v37, %v3877_v32 }
 0x485   :  { %v2494_v39 = vmul.f32 -1.442695, %v2008_v14 }
 0x486   :  { %v1985_v40 = vpop.f32.mrf.mxu3 }
 0x487   :  { %2539 = vpow2.f32 %v2494_v39  ;;  %v1986_v43 = vadd.f32 %v1985_v40, %v3878_v41 }
 0x489   :  { %v2028_v44 = vadd.f32 %v1986_v43, %v3879_v12 }
 0x48b   :  { %v2495_v45 = vmul.f32 -1.442695, %v2028_v44 }
 0x48d   :  { %v2540_v46 = vpop.eup %2539  ;;  %2541 = vpow2.f32 %v2495_v45 }
 0x48e   :  { %v2012_v50 = vadd.f32 1.0, %v2540_v46 }
 0x490   :  { %2543 = vrcp.f32 %v2012_v50  ;;  %v2024_v28 = vand.u32 2147483648, %v2012_v50  ;;  %v2022_v23 = vand.u32 2147483647, %v2012_v50  ;;  %vm2018_vm5 = vweird.f32 %v2012_v50 }
 0x492   :  { %v2025_v8 = vor.u32 1.1754944e-38, %v2024_v28  ;;  %vm2023_vm7 = vcmp.eq.f32.partialorder %v2022_v23, 8.507059e+37 }
 0x493   :  { %v2542_v38 = vpop.eup %2541 }
 0x494   :  { %v2032_v56 = vadd.f32 1.0, %v2542_v38 }
 0x496   :  { %v2544_v57 = vpop.eup %2543  ;;  %2545 = vrcp.f32 %v2032_v56  ;;  %v2044_v16 = vand.u32 2147483648, %v2032_v56  ;;  %v2042_v21 = vand.u32 2147483647, %v2032_v56  ;;  %vm2038_vm9 = vweird.f32 %v2032_v56 }
 0x497   :  { %v2014_v20 = vmul.f32 %v2544_v57, %v2012_v50  ;;  %vm2019_vm4 = vweird.f32 %v2544_v57 }
 0x498   :  { %vm2020_vm6 = vmor %vm2018_vm5, %vm2019_vm4  ;;  %v2045_v47 = vor.u32 1.1754944e-38, %v2044_v16  ;;  %vm2043_vm11 = vcmp.eq.f32.partialorder %v2042_v21, 8.507059e+37  ;;  %v3884_v21 = vld [vmem:[#allocation40_spill] sm:$0xff] }
 0x499   :  { %v2015_v13 = vsub.f32 1.0, %v2014_v20 }
 0x49b   :  { %v2016_v61 = vmul.f32 %v2544_v57, %v2015_v13 }
 0x49c   :  { %v2546_v62 = vpop.eup %2545 }
 0x49d   :  { %v2017_v9 = vadd.f32 %v2544_v57, %v2016_v61  ;;  %v2034_v24 = vmul.f32 %v2546_v62, %v2032_v56  ;;  %vm2039_vm8 = vweird.f32 %v2546_v62 }
 0x49e   :  { %vm2040_vm10 = vmor %vm2038_vm9, %vm2039_vm8 }
 0x49f   :  { %v2021_v63 = vsel %vm2020_vm6, %v2544_v57, %v2017_v9  ;;  %v2035_v1 = vsub.f32 1.0, %v2034_v24 }
 0x4a0   :  { %v2026_v26 = vsel %vm2023_vm7, %v2025_v8, %v2021_v63 }
 0x4a1   :  { %v2048_v19 = vmul.f32 %v2026_v26, %v2006_v42  ;;  %v2036_v51 = vmul.f32 %v2546_v62, %v2035_v1 }
 0x4a3   :  { %v2049_v4 = vadd.f32 %v2048_v19, %v3880_v17  ;;  %v2037_v55 = vadd.f32 %v2546_v62, %v2036_v51 }
 0x4a5   :  { %2547 = vtanh.f32 %v2049_v4  ;;  %v2041_v49 = vsel %vm2040_vm10, %v2546_v62, %v2037_v55  ;;  %v3883_v62 = vld [vmem:[#allocation44_spill] sm:$0xff] }
 0x4a6   :  { %v2046_v53 = vsel %vm2043_vm11, %v2045_v47, %v2041_v49  ;;  %v3885_v47 = vld [vmem:[#allocation41_spill] sm:$0xff] }
 0x4a7   :  { %v2051_v15 = vsub.f32 1.0, %v2046_v53  ;;  %v2053_v59 = vmul.f32 %v2046_v53, %v3632_v11 }
 0x4ab   :  { %v2548_v48 = vpop.eup %2547 }
 0x4ac   :  { %v2052_v52 = vmul.f32 %v2548_v48, %v2051_v15 }
 0x4ae   :  { %v3691_v30 = vadd.f32 %v2053_v59, %v2052_v52 }
 0x4b0   :  { %2080 = vmatmul.f32.vlgmr.msrb.gmra.mxu2 %v3691_v30  ;;  %2100 = vmatmul.f32.vlgmr.msra.gmra.mxu0 %v3691_v30 }
 0x4b1   :  { %2120 = vmatmul.f32.vlgmr.msra.gmra.mxu3 %v3691_v30  ;;  %2342 = vmatpush.msrb.mxu2 %v2585_v10 }
 0x4b3   :  { %2343 = vmatpush.msrb.mxu2 %v2586_v33 }
 0x4b5   :  { %2344 = vmatpush.msrb.mxu2 %v2587_v18 }
 0x4b7   :  { %2345 = vmatpush.msrb.mxu2 %v3326_v27 }
 0x4b9   :  { %2346 = vmatpush.msrb.mxu2 %v3336_v60 }
 0x4bb   :  { %2347 = vmatpush.msrb.mxu2 %v3339_v3  ;;  %v3881_v3 = vld [vmem:[#allocation35_spill] sm:$0xff] }
 0x4bd   :  { %2348 = vmatpush.msrb.mxu2 %v3342_v5 }
 0x4bf   :  { %2349 = vmatpush.msrb.mxu2 %v3346_v6 }
 0x4c1   :  { %2350 = vmatpush.msrb.mxu2 %v3352_v58 }
 0x4c3   :  { %2351 = vmatpush.msrb.mxu2 %v3355_v36 }
 0x4c5   :  { %2352 = vmatpush.msrb.mxu2 %v3358_v7  ;;  %v3882_v7 = vld [vmem:[#allocation36_spill] sm:$0xff] }
 0x4c7   :  { %2353 = vmatpush.msrb.mxu2 %v3362_v22 }
 0x4c9   :  { %2354 = vmatpush.msrb.mxu2 %v3856_v2 }
 0x4cb   :  { %2355 = vmatpush.msrb.mxu2 %v3859_v29 }
 0x4cd   :  { %2356 = vmatpush.msrb.mxu2 %v3870_v25 }
 0x4cf   :  { %2357 = vmatpush.msrb.mxu2 %v3873_v31 }
 0x52d   :  { %v2101_v27 = vpop.f32.mrf.mxu0 }
 0x52e   :  { %v2102_v60 = vadd.f32 %v2101_v27, %v3878_v41 }
 0x530   :  { %v2144_v5 = vadd.f32 %v2102_v60, %v3881_v3 }
 0x532   :  { %v2497_v6 = vmul.f32 -1.442695, %v2144_v5 }
 0x533   :  { %v2081_v58 = vpop.f32.mrf.mxu2 }
 0x534   :  { %2549 = vpow2.f32 %v2497_v6  ;;  %v2082_v36 = vadd.f32 %v2081_v58, %v3876_v35  ;;  %v2121_v45 = vpop.f32.mrf.mxu3 }
 0x535   :  { %v2122_v56 = vadd.f32 %v2121_v45, %v3559_v0 }
 0x536   :  { %v2124_v22 = vadd.f32 %v2082_v36, %v3882_v7 }
 0x538   :  { %v2496_v11 = vmul.f32 -1.442695, %v2124_v22 }
 0x53a   :  { %v2550_v2 = vpop.eup %2549  ;;  %2551 = vpow2.f32 %v2496_v11 }
 0x53b   :  { %v2148_v29 = vadd.f32 1.0, %v2550_v2 }
 0x53d   :  { %2553 = vrcp.f32 %v2148_v29  ;;  %v2160_v61 = vand.u32 2147483648, %v2148_v29  ;;  %vm2154_vm1 = vweird.f32 %v2148_v29  ;;  %v2158_v23 = vand.u32 2147483647, %v2148_v29 }
 0x53f   :  { %v2161_v24 = vor.u32 1.1754944e-38, %v2160_v61  ;;  %vm2159_vm3 = vcmp.eq.f32.partialorder %v2158_v23, 8.507059e+37  ;;  %v2420_v23 = vld [vmem:[%s3795_s10 + $0x58] sm:$0xff] }
 0x540   :  { %v2552_v25 = vpop.eup %2551 }
 0x541   :  { %v2128_v34 = vadd.f32 1.0, %v2552_v25 }
 0x543   :  { %2555 = vrcp.f32 %v2128_v34  ;;  %v2554_v31 = vpop.eup %2553  ;;  %v2140_v43 = vand.u32 2147483648, %v2128_v34  ;;  %v2138_v44 = vand.u32 2147483647, %v2128_v34  ;;  %vm2134_vm13 = vweird.f32 %v2128_v34 }
 0x544   :  { %v2150_v37 = vmul.f32 %v2554_v31, %v2148_v29  ;;  %vm2155_vm0 = vweird.f32 %v2554_v31 }
 0x545   :  { %v2141_v38 = vor.u32 1.1754944e-38, %v2140_v43  ;;  %vm2139_vm15 = vcmp.eq.f32.partialorder %v2138_v44, 8.507059e+37  ;;  %vm2156_vm2 = vmor %vm2154_vm1, %vm2155_vm0 }
 0x546   :  { %v2151_v39 = vsub.f32 1.0, %v2150_v37 }
 0x548   :  { %v2152_v46 = vmul.f32 %v2554_v31, %v2151_v39 }
 0x549   :  { %v2556_v32 = vpop.eup %2555 }
 0x54a   :  { %v2130_v14 = vmul.f32 %v2556_v32, %v2128_v34  ;;  %vm2135_vm12 = vweird.f32 %v2556_v32  ;;  %v2153_v13 = vadd.f32 %v2554_v31, %v2152_v46 }
 0x54b   :  { %vm2136_vm14 = vmor %vm2134_vm13, %vm2135_vm12 }
 0x54c   :  { %v2131_v40 = vsub.f32 1.0, %v2130_v14  ;;  %v2157_v9 = vsel %vm2156_vm2, %v2554_v31, %v2153_v13 }
 0x54d   :  { %v2162_v8 = vsel %vm2159_vm3, %v2161_v24, %v2157_v9  ;;  %v2419_v9 = vld [vmem:[%s3795_s10 + $0x50] sm:$0xff] }
 0x54e   :  { %v2132_v12 = vmul.f32 %v2556_v32, %v2131_v40  ;;  %v2167_v42 = vsub.f32 1.0, %v2162_v8  ;;  %v2169_v26 = vmul.f32 %v2162_v8, %v3691_v30 }
 0x550   :  { %v2133_v50 = vadd.f32 %v2556_v32, %v2132_v12 }
 0x552   :  { %v2137_v57 = vsel %vm2136_vm14, %v2556_v32, %v2133_v50  ;;  %v3886_v32 = vld [vmem:[#allocation46_spill] sm:$0xff] }
 0x553   :  { %v2142_v20 = vsel %vm2139_vm15, %v2141_v38, %v2137_v57  ;;  %v2423_v57 = vld [vmem:[%s3795_s10 + $0x70] sm:$0xff] }
 0x554   :  { %v2164_v28 = vmul.f32 %v2142_v20, %v2122_v56  ;;  %v2424_v56 = vld [vmem:[%s3795_s10 + $0x78] sm:$0xff]  ;;  %v2422_v20 = vld [vmem:[%s3795_s10 + $0x68] sm:$0xff] }
 0x555   :  { %2429 = vmatpush.msra.mxu0 %v2424_v56 }
 0x556   :  { %v2165_v54 = vadd.f32 %v2164_v28, %v3883_v62  ;;  %v2421_v28 = vld [vmem:[%s3795_s10 + $0x60] sm:$0xff]  ;;  %v3887_v62 = vld [vmem:[#allocation42_spill] sm:$0xff] }
 0x557   :  { %2430 = vmatpush.msra.mxu0 %v2423_v57 }
 0x558   :  { %2557 = vtanh.f32 %v2165_v54 }
 0x559   :  { %2431 = vmatpush.msra.mxu0 %v2422_v20 }
 0x55b   :  { %2432 = vmatpush.msra.mxu0 %v2421_v28 }
 0x55d   :  { %2433 = vmatpush.msra.mxu0 %v2420_v23 }
 0x55e   :  { %v2558_v63 = vpop.eup %2557 }
 0x55f   :  { %v2168_v1 = vmul.f32 %v2558_v63, %v2167_v42  ;;  %2434 = vmatpush.msra.mxu0 %v2419_v9  ;;  %v2418_v42 = vld [vmem:[%s3795_s10 + $0x48] sm:$0xff]  ;;  %v2417_v63 = vld [vmem:[%s3795_s10 + $0x40] sm:$0xff] }
 0x561   :  { %v2170_v19 = vadd.f32 %v2169_v26, %v2168_v1  ;;  %2435 = vmatpush.msra.mxu0 %v2418_v42  ;;  %v3888_v1 = vld [vmem:[#allocation43_spill] sm:$0xff] }
 0x563   :  { %2202 = vmatmul.f32.vlgmr.msrb.gmra.mxu1 %v2170_v19  ;;  %2222 = vmatmul.f32.vlgmr.msra.gmra.mxu2 %v2170_v19 }
 0x564   :  { %2242 = vmatmul.f32.vlgmr.msrb.gmra.mxu0 %v2170_v19 }
 0x565   :  { %2436 = vmatpush.msra.mxu0 %v2417_v63 }
 0x5e0   :  { %v2203_v51 = vpop.f32.mrf.mxu1 }
 0x5e1   :  { %v2204_v16 = vadd.f32 %v2203_v51, %v3876_v35  ;;  %v2243_v6 = vpop.f32.mrf.mxu0 }
 0x5e2   :  { %v2244_v22 = vadd.f32 %v2243_v6, %v3559_v0 }
 0x5e3   :  { %v2246_v17 = vadd.f32 %v2204_v16, %v3884_v21  ;;  %v2415_v16 = vld [vmem:[%s3795_s10 + $0x30] sm:$0xff] }
 0x5e5   :  { %v2498_v4 = vmul.f32 -1.442695, %v2246_v17 }
 0x5e6   :  { %v2223_v55 = vpop.f32.mrf.mxu2 }
 0x5e7   :  { %2559 = vpow2.f32 %v2498_v4  ;;  %v2224_v49 = vadd.f32 %v2223_v55, %v3878_v41  ;;  %v2413_v4 = vld [vmem:[%s3795_s10 + $0x20] sm:$0xff]  ;;  %v2412_v55 = vld [vmem:[%s3795_s10 + $0x18] sm:$0xff] }
 0x5e9   :  { %v2266_v53 = vadd.f32 %v2224_v49, %v3885_v47  ;;  %v2411_v49 = vld [vmem:[%s3795_s10 + $0x10] sm:$0xff] }
 0x5eb   :  { %v2499_v15 = vmul.f32 -1.442695, %v2266_v53 }
 0x5ed   :  { %v2560_v48 = vpop.eup %2559  ;;  %2561 = vpow2.f32 %v2499_v15  ;;  %v2410_v15 = vld [vmem:[%s3795_s10 + $0x8] sm:$0xff] }
 0x5ee   :  { %v2250_v52 = vadd.f32 1.0, %v2560_v48  ;;  %v2409_v48 = vld [vmem:[%s3795_s10] sm:$0xff] }
 0x5f0   :  { %2563 = vrcp.f32 %v2250_v52  ;;  %v2262_v27 = vand.u32 2147483648, %v2250_v52  ;;  %v2260_v3 = vand.u32 2147483647, %v2250_v52  ;;  %vm2256_vm5 = vweird.f32 %v2250_v52 }
 0x5f2   :  { %v2263_v7 = vor.u32 1.1754944e-38, %v2262_v27  ;;  %vm2261_vm7 = vcmp.eq.f32.partialorder %v2260_v3, 8.507059e+37 }
 0x5f3   :  { %v2562_v59 = vpop.eup %2561 }
 0x5f4   :  { %v2270_v30 = vadd.f32 1.0, %v2562_v59 }
 0x5f6   :  { %v2564_v10 = vpop.eup %2563  ;;  %2565 = vrcp.f32 %v2270_v30  ;;  %v2282_v31 = vand.u32 2147483648, %v2270_v30  ;;  %v2280_v37 = vand.u32 2147483647, %v2270_v30  ;;  %vm2276_vm9 = vweird.f32 %v2270_v30 }
 0x5f7   :  { %v2252_v33 = vmul.f32 %v2564_v10, %v2250_v52  ;;  %vm2257_vm4 = vweird.f32 %v2564_v10 }
 0x5f8   :  { %vm2258_vm6 = vmor %vm2256_vm5, %vm2257_vm4  ;;  %v2283_v40 = vor.u32 1.1754944e-38, %v2282_v31  ;;  %vm2281_vm11 = vcmp.eq.f32.partialorder %v2280_v37, 8.507059e+37  ;;  %v3889_v31 = vld [vmem:[#allocation47_spill] sm:$0xff]  ;;  %vm2449_vm4 = vcmask 254976  }
 0x5f9   :  { %v2253_v18 = vsub.f32 1.0, %v2252_v33 }
 0x5fb   :  { %v2254_v60 = vmul.f32 %v2564_v10, %v2253_v18 }
 0x5fc   :  { %v2566_v5 = vpop.eup %2565 }
 0x5fd   :  { %v2255_v58 = vadd.f32 %v2564_v10, %v2254_v60  ;;  %v2272_v36 = vmul.f32 %v2566_v5, %v2270_v30  ;;  %vm2277_vm8 = vweird.f32 %v2566_v5 }
 0x5fe   :  { %vm2278_vm10 = vmor %vm2276_vm9, %vm2277_vm8 }
 0x5ff   :  { %v2259_v11 = vsel %vm2258_vm6, %v2564_v10, %v2255_v58  ;;  %v2273_v2 = vsub.f32 1.0, %v2272_v36 }
 0x600   :  { %v2264_v29 = vsel %vm2261_vm7, %v2263_v7, %v2259_v11 }
 0x601   :  { %v2286_v25 = vmul.f32 %v2264_v29, %v2244_v22  ;;  %v2274_v34 = vmul.f32 %v2566_v5, %v2273_v2 }
 0x603   :  { %v2287_v14 = vadd.f32 %v2286_v25, %v3886_v32  ;;  %v2275_v39 = vadd.f32 %v2566_v5, %v2274_v34 }
 0x605   :  { %2567 = vtanh.f32 %v2287_v14  ;;  %v2279_v43 = vsel %vm2278_vm10, %v2566_v5, %v2275_v39 }
 0x606   :  { %v2284_v12 = vsel %vm2281_vm11, %v2283_v40, %v2279_v43 }
 0x607   :  { %v2289_v44 = vsub.f32 1.0, %v2284_v12  ;;  %v2291_v50 = vmul.f32 %v2284_v12, %v2170_v19  ;;  %v2416_v19 = vld [vmem:[%s3795_s10 + $0x38] sm:$0xff] }
 0x608   :  { %2437 = vmatpush.msra.mxu0 %v2416_v19 }
 0x60a   :  { %2438 = vmatpush.msra.mxu0 %v2415_v16 }
 0x60b   :  { %v2568_v45 = vpop.eup %2567 }
 0x60c   :  { %v2290_v46 = vmul.f32 %v2568_v45, %v2289_v44  ;;  %v2518_v45 = vld [vmem:[#allocation15] ss:$0 sm:$0xff] }
 0x60e   :  { %v3722_v38 = vadd.f32 %v2291_v50, %v2290_v46 }
 0x610   :  { %2318 = vmatmul.f32.vlgmr.msrb.gmra.mxu3 %v3722_v38  ;;  %2338 = vmatmul.f32.vlgmr.msra.gmra.mxu1 %v3722_v38 }
 0x611   :  { %2358 = vmatmul.f32.vlgmr.msrb.gmra.mxu2 %v3722_v38 }
 0x68d   :  { %v2339_v13 = vpop.f32.mrf.mxu1 }
 0x68e   :  { %v2340_v61 = vadd.f32 %v2339_v13, %v3878_v41 }
 0x690   :  { %v2382_v54 = vadd.f32 %v2340_v61, %v3887_v62 }
 0x692   :  { %v2501_v24 = vmul.f32 -1.442695, %v2382_v54 }
 0x693   :  { %v2319_v8 = vpop.f32.mrf.mxu3 }
 0x694   :  { %2569 = vpow2.f32 %v2501_v24  ;;  %v2320_v41 = vadd.f32 %v2319_v8, %v3876_v35  ;;  %v2414_v35 = vld [vmem:[%s3795_s10 + $0x28] sm:$0xff]  ;;  %v2359_v5 = vpop.f32.mrf.mxu2 }
 0x695   :  { %2439 = vmatpush.msra.mxu0 %v2414_v35  ;;  %v2360_v7 = vadd.f32 %v2359_v5, %v3559_v0 }
 0x696   :  { %v2362_v26 = vadd.f32 %v2320_v41, %v3888_v1 }
 0x697   :  { %2440 = vmatpush.msra.mxu0 %v2413_v4 }
 0x698   :  { %v2500_v51 = vmul.f32 -1.442695, %v2362_v26 }
 0x699   :  { %2441 = vmatpush.msra.mxu0 %v2412_v55 }
 0x69a   :  { %v2570_v21 = vpop.eup %2569  ;;  %2571 = vpow2.f32 %v2500_v51 }
 0x69b   :  { %v2386_v17 = vadd.f32 1.0, %v2570_v21  ;;  %2442 = vmatpush.msra.mxu0 %v2411_v49 }
 0x69d   :  { %2573 = vrcp.f32 %v2386_v17  ;;  %2443 = vmatpush.msra.mxu0 %v2410_v15  ;;  %v2398_v25 = vand.u32 2147483648, %v2386_v17  ;;  %vm2392_vm1 = vweird.f32 %v2386_v17  ;;  %v2396_v34 = vand.u32 2147483647, %v2386_v17 }
 0x69f   :  { %2444 = vmatpush.msra.mxu0 %v2409_v48  ;;  %v2399_v14 = vor.u32 1.1754944e-38, %v2398_v25  ;;  %vm2397_vm3 = vcmp.eq.f32.partialorder %v2396_v34, 8.507059e+37 }
 0x6a0   :  { %v2572_v47 = vpop.eup %2571 }
 0x6a1   :  { %v2366_v53 = vadd.f32 1.0, %v2572_v47 }
 0x6a3   :  { %2575 = vrcp.f32 %v2366_v53  ;;  %v2574_v52 = vpop.eup %2573  ;;  %v2378_v27 = vand.u32 2147483648, %v2366_v53  ;;  %v2376_v3 = vand.u32 2147483647, %v2366_v53  ;;  %vm2372_vm13 = vweird.f32 %v2366_v53 }
 0x6a4   :  { %v2388_v59 = vmul.f32 %v2574_v52, %v2386_v17  ;;  %vm2393_vm0 = vweird.f32 %v2574_v52 }
 0x6a5   :  { %v2379_v36 = vor.u32 1.1754944e-38, %v2378_v27  ;;  %vm2377_vm15 = vcmp.eq.f32.partialorder %v2376_v3, 8.507059e+37  ;;  %vm2394_vm2 = vmor %vm2392_vm1, %vm2393_vm0 }
 0x6a6   :  { %v2389_v33 = vsub.f32 1.0, %v2388_v59 }
 0x6a8   :  { %v2390_v6 = vmul.f32 %v2574_v52, %v2389_v33 }
 0x6a9   :  { %v2576_v30 = vpop.eup %2575 }
 0x6aa   :  { %v2368_v10 = vmul.f32 %v2576_v30, %v2366_v53  ;;  %vm2373_vm12 = vweird.f32 %v2576_v30  ;;  %v2391_v2 = vadd.f32 %v2574_v52, %v2390_v6 }
 0x6ab   :  { %vm2374_vm14 = vmor %vm2372_vm13, %vm2373_vm12 }
 0x6ac   :  { %v2369_v18 = vsub.f32 1.0, %v2368_v10  ;;  %v2395_v32 = vsel %vm2394_vm2, %v2574_v52, %v2391_v2 }
 0x6ad   :  { %v2400_v39 = vsel %vm2397_vm3, %v2399_v14, %v2395_v32 }
 0x6ae   :  { %v2370_v60 = vmul.f32 %v2576_v30, %v2369_v18  ;;  %v2405_v40 = vsub.f32 1.0, %v2400_v39  ;;  %v2407_v12 = vmul.f32 %v2400_v39, %v3722_v38 }
 0x6b0   :  { %v2371_v58 = vadd.f32 %v2576_v30, %v2370_v60 }
 0x6b2   :  { %v2375_v22 = vsel %vm2374_vm14, %v2576_v30, %v2371_v58 }
 0x6b3   :  { %v2380_v11 = vsel %vm2377_vm15, %v2379_v36, %v2375_v22 }
 0x6b4   :  { %v2402_v29 = vmul.f32 %v2380_v11, %v2360_v7 }
 0x6b6   :  { %v2403_v37 = vadd.f32 %v2402_v29, %v3889_v31 }
 0x6b8   :  { %2577 = vtanh.f32 %v2403_v37 }
 0x6be   :  { %v2578_v43 = vpop.eup %2577 }
 0x6bf   :  { %v2406_v0 = vmul.f32 %v2578_v43, %v2405_v40 }
 0x6c1   :  { %v2408_v44 = vadd.f32 %v2407_v12, %v2406_v0 }
 0x6c3   :  { %2445 = vmatmul.f32.vlgmr.msra.gmra.mxu0 %v2408_v44 }
 0x740   :  { %v2446_v46 = vpop.f32.mrf.mxu0 }
 0x741   :  { %v2447_v50 = vadd.f32 %v2518_v45, %v2446_v46 }
 0x743   :  { %2450 = vst.msk [vmem:[%s3797_s12] sm:$0x3] %vm2449_vm4, %v2447_v50 }
 0x744   :  { %2455 = vsyncpa [#allocation3], 1 }
 0x745   :  { %2456 = vsyncpa [#allocation5], 1 }
 0x746   :  { %2457 = vsyncpa [#allocation8], 1 }
 0x747   :  { %2458 = vsyncpa [#allocation11], 1 }
 0x748   :  { %2459 = vsyncpa [#allocation14], 1 }

</bundles_post_ra>
